<compile_context>
chip_gen: v6e
topology: v6e:2x2x1
jax: 0.10.0
libtpu: 0.0.40
codegen_flags: <defaults>
</compile_context>

<pallas_src>
import functools

import jax
import jax.numpy as jnp
from jax.experimental import pallas as pl
from jax.experimental.pallas import tpu as pltpu

# ---- model dimensions (from the torch module) ----
IN_FEATURES = 2048    # inception_v3 fc.in_features
HIDDEN = 128          # fc1: Linear(2048, 128)
NUM_CLASSES = 3       # fc2: Linear(128, 3)

# ---- stand-in stem (inception Conv2d_1a_3x3) ----
STEM_OUT = 32
KSIZE = 3
STRIDE = 2
CKK = 3 * KSIZE * KSIZE          # 27 (contraction dim of the im2col matmul)
CKK_PAD = 32                     # zero-padded contraction dim (sublanes)

NC_PAD = 128                     # lane-padded logits block, sliced to 3 outside
# One spatial tile covers a full 299x299 image (S = 149*149 = 22201 -> 22528),
# i.e. ~1.4 MiB per bf16 patch buffer; fits comfortably even in v7x's 64 MiB.
MAX_TILE_S = 22528


def _round_up(x, m):
    return ((x + m - 1) // m) * m


def _full_spec(shape):
    """BlockSpec covering the whole array (grid-independent)."""
    nd = len(shape)
    return pl.BlockSpec(shape, lambda *args, _nd=nd: (0,) * _nd)


# --------------------------------------------------------------------------
# Kernel
# --------------------------------------------------------------------------

def _stem_gap_head_kernel(patch_ref, w_ref, bias_ref, projT_ref, w1T_ref,
                          b1_ref, w2T_ref, b2_ref, out_ref, acc_ref,
                          *, pad_cols, inv_count):
    """Fused conv-as-matmul + bias + ReLU + global-average-pool + MLP head.

    grid = (B, S_tiles): axis 0 = one image per block ("parallel"),
    axis 1 = spatial reduction ("arbitrary").  acc_ref (STEM_OUT, 1) f32
    accumulates the pooled sum across spatial tiles; the head runs once per
    image in the finalize branch and writes the (NC_PAD, 1) logits block.
    """
    s = pl.program_id(1)

    @pl.when(s == 0)
    def _init():
        acc_ref[...] = jnp.zeros_like(acc_ref)

    x = patch_ref[0]                                   # (CKK_PAD, tile_s) bf16
    y = jnp.dot(w_ref[...], x, preferred_element_type=jnp.float32)
    y = jnp.maximum(y + bias_ref[...], 0.0)            # (STEM_OUT, tile_s) f32
    # No per-tile mask: padded patch columns are exactly zero, so each adds
    # exactly relu(bias); that constant is subtracted once in finalize.
    # (jnp.sum over lanes kept: the kernel stays HBM-bound on the patch stream;
    #  switch to an MXU ones-matmul if the XLU reduce ever binds.)
    acc_ref[...] += jnp.sum(y, axis=1, keepdims=True)

    @pl.when(s == pl.num_programs(1) - 1)
    def _finalize():
        relu_b = jnp.maximum(bias_ref[...], 0.0)       # (STEM_OUT, 1)
        pooled = (acc_ref[...] - pad_cols * relu_b) * inv_count
        pooled = pooled.astype(jnp.bfloat16)           # (STEM_OUT, 1)
        # Head in column-vector form (pre-transposed bf16 weights, f32 acc).
        feat = jnp.dot(projT_ref[...], pooled,
                       preferred_element_type=jnp.float32)        # (2048, 1)
        h = jnp.dot(w1T_ref[...], feat.astype(jnp.bfloat16),
                    preferred_element_type=jnp.float32) + b1_ref[...]
        h = jnp.maximum(h, 0.0)                                    # (128, 1)
        out_ref[0] = jnp.dot(w2T_ref[...], h.astype(jnp.bfloat16),
                             preferred_element_type=jnp.float32) + b2_ref[...]


# --------------------------------------------------------------------------
# JAX-side glue
# --------------------------------------------------------------------------

def _im2col_lane_dense(x, s_pad):
    """NCHW -> (B, CKK_PAD, s_pad) bf16 patches (valid padding, stride 2).

    Spatial positions land on the last (lane) dim; the small contraction dim
    (27, padded to 32) lands on sublanes — lane-dense for the dominant stream.
    """
    B, C, H, W = x.shape
    OH = (H - KSIZE) // STRIDE + 1
    OW = (W - KSIZE) // STRIDE + 1
    cols = []
    for kh in range(KSIZE):
        for kw in range(KSIZE):
            cols.append(x[:, :, kh:kh + STRIDE * OH:STRIDE,
                             kw:kw + STRIDE * OW:STRIDE])
    p = jnp.stack(cols, axis=2)                        # (B, C, k*k, OH, OW)
    p = p.reshape(B, C * KSIZE * KSIZE, OH * OW)
    p = p.astype(jnp.bfloat16)
    p = jnp.pad(p, ((0, 0), (0, CKK_PAD - CKK), (0, s_pad - OH * OW)))
    return p, OH, OW


def init_params(key):
    ks = jax.random.split(key, 8)
    return {
        "w_stem": jax.random.normal(ks[0], (STEM_OUT, CKK), jnp.float32) * 0.1,
        "bn_scale": 1.0 + 0.1 * jax.random.normal(ks[1], (STEM_OUT,), jnp.float32),
        "bn_bias": 0.1 * jax.random.normal(ks[2], (STEM_OUT,), jnp.float32),
        "proj": jax.random.normal(ks[3], (STEM_OUT, IN_FEATURES), jnp.float32) * 0.05,
        "w1": jax.random.normal(ks[4], (IN_FEATURES, HIDDEN), jnp.float32)
              * (1.0 / jnp.sqrt(1.0 * IN_FEATURES)),
        "b1": jax.random.normal(ks[5], (HIDDEN,), jnp.float32) * 0.01,
        "w2": jax.random.normal(ks[6], (HIDDEN, NUM_CLASSES), jnp.float32)
              * (1.0 / jnp.sqrt(1.0 * HIDDEN)),
        "b2": jax.random.normal(ks[7], (NUM_CLASSES,), jnp.float32) * 0.01,
    }


@functools.partial(jax.jit, static_argnames=("tile_s",))
def forward(params, x, *, tile_s=None):
    B, C, H, W = x.shape
    OH = (H - KSIZE) // STRIDE + 1
    OW = (W - KSIZE) // STRIDE + 1
    S = OH * OW
    if tile_s is None:
        tile_s = min(MAX_TILE_S, _round_up(S, 128))
    else:
        tile_s = _round_up(tile_s, 128)
    s_pad = _round_up(S, tile_s)
    s_tiles = s_pad // tile_s

    patches, _, _ = _im2col_lane_dense(x, s_pad)       # (B, CKK_PAD, s_pad) bf16

    # Fold the eval-mode BN scale into the conv weights; keep bias separate.
    w_eff = params["w_stem"] * params["bn_scale"][:, None]                # (32, 27)
    w_eff = jnp.pad(w_eff, ((0, 0), (0, CKK_PAD - CKK))).astype(jnp.bfloat16)
    bias = params["bn_bias"].reshape(STEM_OUT, 1).astype(jnp.float32)

    # Head weights: pre-transposed, bf16 (explicit; f32 accumulation in-kernel).
    projT = params["proj"].T.astype(jnp.bfloat16)                         # (2048, 32)
    w1T = params["w1"].T.astype(jnp.bfloat16)                             # (128, 2048)
    b1c = params["b1"].reshape(HIDDEN, 1).astype(jnp.float32)
    w2T = jnp.pad(params["w2"].T,
                  ((0, NC_PAD - NUM_CLASSES), (0, 0))).astype(jnp.bfloat16)  # (128, 128)
    b2c = jnp.pad(params["b2"],
                  ((0, NC_PAD - NUM_CLASSES),)).reshape(NC_PAD, 1).astype(jnp.float32)

    kernel = functools.partial(_stem_gap_head_kernel,
                               pad_cols=float(s_pad - S),
                               inv_count=1.0 / S)

    # VMEM budget from the actual tile: double-buffered bf16 patch tile plus
    # the f32 conv intermediate, plus ~0.75 MiB of resident head weights.
    # Cap below the ~48 MiB v7x-safe ceiling (v5e/v6e have 128 MiB physical).
    patch_block_bytes = CKK_PAD * tile_s * 2
    vmem_limit = int(min(48 * 1024 * 1024,
                         max(16 * 1024 * 1024,
                             8 * 1024 * 1024 + 6 * patch_block_bytes)))

    out = pl.pallas_call(
        kernel,
        out_shape=jax.ShapeDtypeStruct((B, NC_PAD, 1), jnp.float32),
        grid=(B, s_tiles),
        in_specs=[
            pl.BlockSpec((1, CKK_PAD, tile_s), lambda b, s: (b, 0, s)),
            _full_spec((STEM_OUT, CKK_PAD)),
            _full_spec((STEM_OUT, 1)),
            _full_spec((IN_FEATURES, STEM_OUT)),
            _full_spec((HIDDEN, IN_FEATURES)),
            _full_spec((HIDDEN, 1)),
            _full_spec((NC_PAD, HIDDEN)),
            _full_spec((NC_PAD, 1)),
        ],
        out_specs=pl.BlockSpec((1, NC_PAD, 1), lambda b, s: (b, 0, 0)),
        scratch_shapes=[pltpu.VMEM((STEM_OUT, 1), jnp.float32)],
        compiler_params=pltpu.CompilerParams(
            dimension_semantics=("parallel", "arbitrary"),
            vmem_limit_bytes=vmem_limit),
    )(patches, w_eff, bias, projT, w1T, b1c, w2T, b2c)

    return out[:, :NUM_CLASSES, 0]                     # (B, NUM_CLASSES)


def reference_forward(params, x):
    """Pure-JAX reference mirroring the kernel math (same bf16 round-trips)."""
    B, C, H, W = x.shape
    OH = (H - KSIZE) // STRIDE + 1
    OW = (W - KSIZE) // STRIDE + 1
    S = OH * OW
    patches, _, _ = _im2col_lane_dense(x, S)           # (B, CKK_PAD, S) bf16
    w_eff = params["w_stem"] * params["bn_scale"][:, None]
    w_eff = jnp.pad(w_eff, ((0, 0), (0, CKK_PAD - CKK))).astype(jnp.bfloat16)
    y = jnp.einsum("oc,bcs->bos", w_eff.astype(jnp.float32),
                   patches.astype(jnp.float32))
    y = jnp.maximum(y + params["bn_bias"][None, :, None], 0.0)
    pooled = jnp.mean(y, axis=-1)                      # (B, STEM_OUT)

    pooled_b = pooled.astype(jnp.bfloat16).astype(jnp.float32)
    proj_f = params["proj"].astype(jnp.bfloat16).astype(jnp.float32)
    w1_f = params["w1"].astype(jnp.bfloat16).astype(jnp.float32)
    w2_f = params["w2"].astype(jnp.bfloat16).astype(jnp.float32)

    feat = pooled_b @ proj_f                                              # (B, 2048)
    h = jnp.maximum(feat.astype(jnp.bfloat16).astype(jnp.float32) @ w1_f
                    + params["b1"][None, :], 0.0)
    return h.astype(jnp.bfloat16).astype(jnp.float32) @ w2_f + params["b2"][None, :]


if __name__ == "__main__":
    key = jax.random.PRNGKey(0)
    pkey, xkey = jax.random.split(key)
    params = init_params(pkey)
    # small RGB batch (inception normally takes 299x299; small for testing)
    x = jax.random.normal(xkey, (2, 3, 32, 32), jnp.float32)

    # tile_s=128 forces a multi-step spatial reduction (S = 15*15 = 225 -> 2 tiles),
    # exercising the accumulator + padded-column correction path.
    out_multi = forward(params, x, tile_s=128)
    jax.block_until_ready(out_multi)
    assert out_multi.shape == (2, NUM_CLASSES) and out_multi.dtype == jnp.float32

    # default path: whole spatial extent in one tile -> grid (B, 1)
    out_single = forward(params, x)
    jax.block_until_ready(out_single)
    assert out_single.shape == (2, NUM_CLASSES)

    ref = reference_forward(params, x)
    ok_multi = bool(jnp.allclose(out_multi, ref, rtol=2e-2, atol=2e-2))
    ok_single = bool(jnp.allclose(out_single, ref, rtol=2e-2, atol=2e-2))
    assert ok_multi and ok_single, (
        "mismatch, max abs diff = "
        f"{float(jnp.max(jnp.abs(out_multi - ref)))} / "
        f"{float(jnp.max(jnp.abs(out_single - ref)))}")
    print("KERNEL_OK")
</pallas_src>

<mosaic_0001>
module attributes {stable_mosaic.version = 11 : i64} {
  func.func @_stem_gap_head_kernel(%arg0: i32, %arg1: i32, %arg2: memref<1x32x128xbf16, #tpu.memory_space<vmem>>, %arg3: memref<32x32xbf16, #tpu.memory_space<vmem>>, %arg4: memref<32x1xf32, #tpu.memory_space<vmem>>, %arg5: memref<2048x32xbf16, #tpu.memory_space<vmem>>, %arg6: memref<128x2048xbf16, #tpu.memory_space<vmem>>, %arg7: memref<128x1xf32, #tpu.memory_space<vmem>>, %arg8: memref<128x128xbf16, #tpu.memory_space<vmem>>, %arg9: memref<128x1xf32, #tpu.memory_space<vmem>>, %arg10: memref<1x128x1xf32, #tpu.memory_space<vmem>>, %arg11: memref<32x1xf32, #tpu.memory_space<vmem>>) attributes {dimension_semantics = [#tpu.dimension_semantics<parallel>, #tpu.dimension_semantics<arbitrary>], iteration_bounds = array<i64: 2, 2>, scalar_prefetch = 0 : i64, scratch_operands = 1 : i64, tpu.core_type = #tpu.core_type<tc>, window_params = [{transform_indices = @transform_0, window_bounds = array<i64: 1, 32, 128>}, {pipeline_mode = #tpu.pipeline_mode<synchronous>, transform_indices = @transform_1, window_bounds = array<i64: 32, 32>}, {pipeline_mode = #tpu.pipeline_mode<synchronous>, transform_indices = @transform_2, window_bounds = array<i64: 32, 1>}, {pipeline_mode = #tpu.pipeline_mode<synchronous>, transform_indices = @transform_3, window_bounds = array<i64: 2048, 32>}, {pipeline_mode = #tpu.pipeline_mode<synchronous>, transform_indices = @transform_4, window_bounds = array<i64: 128, 2048>}, {pipeline_mode = #tpu.pipeline_mode<synchronous>, transform_indices = @transform_5, window_bounds = array<i64: 128, 1>}, {pipeline_mode = #tpu.pipeline_mode<synchronous>, transform_indices = @transform_6, window_bounds = array<i64: 128, 128>}, {pipeline_mode = #tpu.pipeline_mode<synchronous>, transform_indices = @transform_7, window_bounds = array<i64: 128, 1>}, {transform_indices = @transform_8, window_bounds = array<i64: 1, 128, 1>}]} {
    %c0_i32 = arith.constant 0 : i32
    %0 = arith.cmpi eq, %arg1, %c0_i32 : i32
    %1 = arith.extui %0 : i1 to i32
    %c0_i32_0 = arith.constant 0 : i32
    %2 = arith.cmpi ne, %1, %c0_i32_0 : i32
    scf.if %2 {
      %cst_14 = arith.constant 0.000000e+00 : f32
      %20 = vector.broadcast %cst_14 : f32 to vector<32x1xf32>
      %c0_15 = arith.constant 0 : index
      %c0_16 = arith.constant 0 : index
      %21 = vector.load %arg11[%c0_15, %c0_16] : memref<32x1xf32, #tpu.memory_space<vmem>>, vector<32x1xf32>
      tpu.vector_store %arg11[%c0_15, %c0_16], %20 {strides = array<i32>} : memref<32x1xf32, #tpu.memory_space<vmem>>, vector<32x1xf32>,
    } else {
    }
    %c0 = arith.constant 0 : index
    %c0_1 = arith.constant 0 : index
    %c0_2 = arith.constant 0 : index
    %3 = vector.load %arg2[%c0, %c0_1, %c0_2] : memref<1x32x128xbf16, #tpu.memory_space<vmem>>, vector<1x32x128xbf16>
    %4 = vector.shape_cast %3 : vector<1x32x128xbf16> to vector<32x128xbf16>
    %c0_3 = arith.constant 0 : index
    %c0_4 = arith.constant 0 : index
    %5 = vector.load %arg3[%c0_3, %c0_4] : memref<32x32xbf16, #tpu.memory_space<vmem>>, vector<32x32xbf16>
    %cst = arith.constant dense<0.000000e+00> : vector<32x128xf32>
    %6 = tpu.matmul %5, %4, %cst {dimension_numbers = #tpu.dot_dimension_numbers<[1], [0], [0], [1], [0, 0, 1, 1], [], []>} : vector<32x32xbf16>, vector<32x128xbf16>, vector<32x128xf32> -> vector<32x128xf32>
    %c0_5 = arith.constant 0 : index
    %c0_6 = arith.constant 0 : index
    %7 = vector.load %arg4[%c0_5, %c0_6] : memref<32x1xf32, #tpu.memory_space<vmem>>, vector<32x1xf32>
    %8 = vector.broadcast %7 : vector<32x1xf32> to vector<32x128xf32>
    %9 = arith.addf %6, %8 : vector<32x128xf32>
    %cst_7 = arith.constant 0.000000e+00 : f32
    %10 = vector.broadcast %cst_7 : f32 to vector<32x128xf32>
    %11 = arith.maximumf %9, %10 : vector<32x128xf32>
    %c0_8 = arith.constant 0 : index
    %c0_9 = arith.constant 0 : index
    %12 = vector.load %arg11[%c0_8, %c0_9] : memref<32x1xf32, #tpu.memory_space<vmem>>, vector<32x1xf32>
    %cst_10 = arith.constant dense<0.000000e+00> : vector<32xf32>
    %13 = vector.multi_reduction <add>, %11, %cst_10 [1] : vector<32x128xf32> to vector<32xf32>
    %14 = vector.shape_cast %13 : vector<32xf32> to vector<32x1xf32>
    %15 = arith.addf %12, %14 : vector<32x1xf32>
    %c0_11 = arith.constant 0 : index
    %c0_12 = arith.constant 0 : index
    %16 = vector.load %arg11[%c0_11, %c0_12] : memref<32x1xf32, #tpu.memory_space<vmem>>, vector<32x1xf32>
    tpu.vector_store %arg11[%c0_11, %c0_12], %15 {strides = array<i32>} : memref<32x1xf32, #tpu.memory_space<vmem>>, vector<32x1xf32>,
    %c1_i32 = arith.constant 1 : i32
    %17 = arith.cmpi eq, %arg1, %c1_i32 : i32
    %18 = arith.extui %17 : i1 to i32
    %c0_i32_13 = arith.constant 0 : i32
    %19 = arith.cmpi ne, %18, %c0_i32_13 : i32
    scf.if %19 {
      %c0_14 = arith.constant 0 : index
      %c0_15 = arith.constant 0 : index
      %20 = vector.load %arg4[%c0_14, %c0_15] : memref<32x1xf32, #tpu.memory_space<vmem>>, vector<32x1xf32>
      %cst_16 = arith.constant 0.000000e+00 : f32
      %21 = vector.broadcast %cst_16 : f32 to vector<32x1xf32>
      %22 = arith.maximumf %20, %21 : vector<32x1xf32>
      %c0_17 = arith.constant 0 : index
      %c0_18 = arith.constant 0 : index
      %23 = vector.load %arg11[%c0_17, %c0_18] : memref<32x1xf32, #tpu.memory_space<vmem>>, vector<32x1xf32>
      %cst_19 = arith.constant 3.100000e+01 : f32
      %24 = vector.broadcast %cst_19 : f32 to vector<32x1xf32>
      %25 = arith.mulf %24, %22 : vector<32x1xf32>
      %26 = arith.subf %23, %25 : vector<32x1xf32>
      %cst_20 = arith.constant 0.00444444455 : f32
      %27 = vector.broadcast %cst_20 : f32 to vector<32x1xf32>
      %28 = arith.mulf %26, %27 : vector<32x1xf32>
      %29 = arith.truncf %28 : vector<32x1xf32> to vector<32x1xbf16>
      %c0_21 = arith.constant 0 : index
      %c0_22 = arith.constant 0 : index
      %30 = vector.load %arg5[%c0_21, %c0_22] : memref<2048x32xbf16, #tpu.memory_space<vmem>>, vector<2048x32xbf16>
      %cst_23 = arith.constant dense<0.000000e+00> : vector<2048x1xf32>
      %31 = tpu.matmul %30, %29, %cst_23 {dimension_numbers = #tpu.dot_dimension_numbers<[1], [0], [0], [1], [0, 0, 1, 1], [], []>} : vector<2048x32xbf16>, vector<32x1xbf16>, vector<2048x1xf32> -> vector<2048x1xf32>
      %c0_24 = arith.constant 0 : index
      %c0_25 = arith.constant 0 : index
      %32 = vector.load %arg6[%c0_24, %c0_25] : memref<128x2048xbf16, #tpu.memory_space<vmem>>, vector<128x2048xbf16>
      %33 = arith.truncf %31 : vector<2048x1xf32> to vector<2048x1xbf16>
      %cst_26 = arith.constant dense<0.000000e+00> : vector<128x1xf32>
      %34 = tpu.matmul %32, %33, %cst_26 {dimension_numbers = #tpu.dot_dimension_numbers<[1], [0], [0], [1], [0, 0, 1, 1], [], []>} : vector<128x2048xbf16>, vector<2048x1xbf16>, vector<128x1xf32> -> vector<128x1xf32>
      %c0_27 = arith.constant 0 : index
      %c0_28 = arith.constant 0 : index
      %35 = vector.load %arg7[%c0_27, %c0_28] : memref<128x1xf32, #tpu.memory_space<vmem>>, vector<128x1xf32>
      %36 = arith.addf %34, %35 : vector<128x1xf32>
      %cst_29 = arith.constant 0.000000e+00 : f32
      %37 = vector.broadcast %cst_29 : f32 to vector<128x1xf32>
      %38 = arith.maximumf %36, %37 : vector<128x1xf32>
      %c0_30 = arith.constant 0 : index
      %c0_31 = arith.constant 0 : index
      %39 = vector.load %arg8[%c0_30, %c0_31] : memref<128x128xbf16, #tpu.memory_space<vmem>>, vector<128x128xbf16>
      %40 = arith.truncf %38 : vector<128x1xf32> to vector<128x1xbf16>
      %cst_32 = arith.constant dense<0.000000e+00> : vector<128x1xf32>
      %41 = tpu.matmul %39, %40, %cst_32 {dimension_numbers = #tpu.dot_dimension_numbers<[1], [0], [0], [1], [0, 0, 1, 1], [], []>} : vector<128x128xbf16>, vector<128x1xbf16>, vector<128x1xf32> -> vector<128x1xf32>
      %c0_33 = arith.constant 0 : index
      %c0_34 = arith.constant 0 : index
      %42 = vector.load %arg9[%c0_33, %c0_34] : memref<128x1xf32, #tpu.memory_space<vmem>>, vector<128x1xf32>
      %43 = arith.addf %41, %42 : vector<128x1xf32>
      %c0_35 = arith.constant 0 : index
      %c0_36 = arith.constant 0 : index
      %c0_37 = arith.constant 0 : index
      %44 = vector.load %arg10[%c0_35, %c0_36, %c0_37] : memref<1x128x1xf32, #tpu.memory_space<vmem>>, vector<1x128x1xf32>
      %45 = vector.shape_cast %44 : vector<1x128x1xf32> to vector<128x1xf32>
      %46 = vector.shape_cast %43 : vector<128x1xf32> to vector<1x128x1xf32>
      tpu.vector_store %arg10[%c0_35, %c0_36, %c0_37], %46 {strides = array<i32>} : memref<1x128x1xf32, #tpu.memory_space<vmem>>, vector<1x128x1xf32>,
    } else {
    }
    return
  }
  func.func @transform_0(%arg0: i32, %arg1: i32) -> (i32, i32, i32) {
    %c0_i32 = arith.constant 0 : i32
    %c0_i32_0 = arith.constant 0 : i32
    return %arg0, %c0_i32, %arg1 : i32, i32, i32
  }
  func.func @transform_1(%arg0: i32, %arg1: i32) -> (i32, i32) {
    %c0_i32 = arith.constant 0 : i32
    %c0_i32_0 = arith.constant 0 : i32
    %c0_i32_1 = arith.constant 0 : i32
    return %c0_i32, %c0_i32_0 : i32, i32
  }
  func.func @transform_2(%arg0: i32, %arg1: i32) -> (i32, i32) {
    %c0_i32 = arith.constant 0 : i32
    %c0_i32_0 = arith.constant 0 : i32
    %c0_i32_1 = arith.constant 0 : i32
    return %c0_i32, %c0_i32_0 : i32, i32
  }
  func.func @transform_3(%arg0: i32, %arg1: i32) -> (i32, i32) {
    %c0_i32 = arith.constant 0 : i32
    %c0_i32_0 = arith.constant 0 : i32
    %c0_i32_1 = arith.constant 0 : i32
    return %c0_i32, %c0_i32_0 : i32, i32
  }
  func.func @transform_4(%arg0: i32, %arg1: i32) -> (i32, i32) {
    %c0_i32 = arith.constant 0 : i32
    %c0_i32_0 = arith.constant 0 : i32
    %c0_i32_1 = arith.constant 0 : i32
    return %c0_i32, %c0_i32_0 : i32, i32
  }
  func.func @transform_5(%arg0: i32, %arg1: i32) -> (i32, i32) {
    %c0_i32 = arith.constant 0 : i32
    %c0_i32_0 = arith.constant 0 : i32
    %c0_i32_1 = arith.constant 0 : i32
    return %c0_i32, %c0_i32_0 : i32, i32
  }
  func.func @transform_6(%arg0: i32, %arg1: i32) -> (i32, i32) {
    %c0_i32 = arith.constant 0 : i32
    %c0_i32_0 = arith.constant 0 : i32
    %c0_i32_1 = arith.constant 0 : i32
    return %c0_i32, %c0_i32_0 : i32, i32
  }
  func.func @transform_7(%arg0: i32, %arg1: i32) -> (i32, i32) {
    %c0_i32 = arith.constant 0 : i32
    %c0_i32_0 = arith.constant 0 : i32
    %c0_i32_1 = arith.constant 0 : i32
    return %c0_i32, %c0_i32_0 : i32, i32
  }
  func.func @transform_8(%arg0: i32, %arg1: i32) -> (i32, i32, i32) {
    %c0_i32 = arith.constant 0 : i32
    %c0_i32_0 = arith.constant 0 : i32
    %c0_i32_1 = arith.constant 0 : i32
    return %arg0, %c0_i32, %c0_i32_0 : i32, i32, i32
  }
}

</mosaic_0001>

<bundles_post_ra>
// kernel: forward.1
= control target key start
LH: loop header
LB: loop body
LE: loop exit
PB: predicated region body
PF: predicated region fallthrough
CT: control target
= control target key end

     0   :  { %s6547_s27 = smov 0   ;;  %s6549_s28 = smov 0   ;;  %s8742_s0 = inlined_call_operand.vmem [shape: bf16[2,32,256], index: 0, kind: input, shape index: {}]   ;;  %s8743_s1 = inlined_call_operand.vmem [shape: bf16[32,32], index: 1, kind: input, shape index: {}]   ;;  %s8744_s2 = inlined_call_operand.vmem [shape: f32[32,1], index: 2, kind: input, shape index: {}]   ;;  %s8745_s3 = inlined_call_operand.vmem [shape: bf16[2048,32], index: 3, kind: input, shape index: {}]   ;;  %s8746_s4 = inlined_call_operand.vmem [shape: bf16[128,2048], index: 4, kind: input, shape index: {}]   ;;  %s8747_s5 = inlined_call_operand.vmem [shape: f32[128,1], index: 5, kind: input, shape index: {}]   ;;  %s8748_s6 = inlined_call_operand.vmem [shape: bf16[128,128], index: 6, kind: input, shape index: {}]   ;;  %s8749_s7 = inlined_call_operand.vmem [shape: f32[128,1], index: 7, kind: input, shape index: {}]   ;;  %s8750_s8 = inlined_call_operand.vmem [shape: f32[2,128,1], index: 8, kind: output, shape index: {}]  }
   0x1   :  { %s6551_s29 = smov 0   ;;  %s6553_s30 = smov 0  }
   0x2   :  { %s6555_s9 = smov 0   ;;  %s6557_s10 = smov 0  }
   0x3   :  { %s6559_s11 = smov 0  }
   0x4 LB: > { %s27_s12 = sadd.s32 1, %s6490_s9  ;;  %s30_s13 = sadd.s32 1, %s6494_s10  ;;  %s6498_s11 = sphi %s6559_s11, %s18_s11   ;;  %s6494_s10 = sphi %s6557_s10, %s8776_s10   ;;  %s6490_s9 = sphi %s6555_s9, %s8775_s9   ;;  %s6486_s30 = sphi %s6553_s30, %s8774_s30   ;;  %s6482_s29 = sphi %s6551_s29, %s8773_s29   ;;  %s6478_s28 = sphi %s6549_s28, %s8772_s28   ;;  %s6474_s27 = sphi %s6547_s27, %s8771_s27  }
   0x5   : > { %p28_p0 = scmp.ge.s32.totalorder %s27_s12, 2  ;;  %p46_p1 = scmp.ne.s32.totalorder %s6478_s28, %s6474_s27 }
   0x6   : > { %p47_p2 = scmp.eq.s32.totalorder %s6498_s11, 0  ;;  %s39_s17 = sadd.s32 1, %s6478_s28 }
   0x7   : > { %s8778_s12 = smov (%p28_p0, %s27_s12), 0  ;;  %s8780_s13 = smov (!%p28_p0, %s30_s13), %s6494_s10 }
   0x8   : > { %p48_p3 = por %p47_p2, %p46_p1  ;;  %p32_p4 = scmp.ge.s32.totalorder %s8780_s13, 2 }
   0x9   : > { %s35_s14 = ssub.s32 %s6490_s9, %s8778_s12  ;;  %p4871_p6 = scmp.ge.s32.totalorder %s6498_s11, 4 }
   0xa   : > { %s8782_s13 = smov (%p32_p4, %s8780_s13), 0 }
   0xb   : > { %s34_s15 = ssub.s32 %s6494_s10, %s8782_s13  ;;  %266 = sbr.rel (%p4871_p6) target bundleno = 24 (0x18), region = 44 }
   0xc   : > { %s36_s16 = sor.u32 %s35_s14, %s34_s15 }
   0xd   : > { %p37_p5 = scmp.eq.s32.totalorder %s36_s16, 0 }
   0xf   : > { %s6598_s18 = scalar_select %p37_p5, %s6478_s28, %s39_s17  }
  0x10   : > { %269 = sbr.rel (!%p48_p3) target bundleno = 24 (0x18), region = 48  ;;  %s271_s19 = sand.u32 (%p48_p3), 1, %s6478_s28  }
  0x11   : > { %s4873_s20 = sshll.u32 (%p48_p3), %s6494_s10, 3  ;;  %s4872_s21 = sshll.u32 (%p48_p3), %s271_s19, 4 }
  0x12   : > { %s275_s22 = sadd.s32 (%p48_p3), %s6490_s9, %s4873_s20  ;;  %s273_s14 = scalar_lea.vmem (%p48_p3), [#allocation3], %s4872_s21 }
  0x13   : > { %s4874_s23 = sshll.u32 (%p48_p3), %s275_s22, 2 }
  0x14   : > { %s277_s26 = scalar_lea.vmem (%p48_p3), %s8742_s0, %s4874_s23 }
  0x15   : > { %v294_v0 = vld [vmem:[%s277_s26] sm:$0xf]  ;;  %v296_v1 = vld [vmem:[%s277_s26 + $0x8] sm:$0xf]  ;;  %v298_v2 = vld [vmem:[%s277_s26 + $0x10] sm:$0xf] }
  0x16   : > { %295 = vst [vmem:[%s273_s14] sm:$0xf] %v294_v0  ;;  %297 = vst [vmem:[%s273_s14 + $0x4] sm:$0xf] %v296_v1  ;;  %v300_v3 = vld [vmem:[%s277_s26 + $0x18] sm:$0xf] }
  0x17   : > { %299 = vst [vmem:[%s273_s14 + $0x8] sm:$0xf] %v298_v2  ;;  %301 = vst [vmem:[%s273_s14 + $0xc] sm:$0xf] %v300_v3 }
  0x18 PF: > { %p4875_p7 = scmp.ge.s32.totalorder %s6498_s11, 1  ;;  %p332_p8 = scmp.lt.s32.totalorder %s6498_s11, 5 }
  0x1a   : > { %p333_p9 = pnand %p4875_p7, %p332_p8 }
  0x1b   : > { %s339_s15 = sand.u32 (!%p333_p9), 1, %s6474_s27   ;;  %p372_p10 = scmp.lt.s32.totalorder (!%p333_p9), %s6486_s30, 1 }
  0x1c   : > { %336 = sbr.rel (%p333_p9) target bundleno = 1675 (0x68b), region = 89  ;;  %s4876_s16 = sshll.u32 (!%p333_p9), %s339_s15, 4 }
  0x1d   : > { %s341_s22 = scalar_lea.vmem (!%p333_p9), [#allocation3], %s4876_s16  ;;  %p4879_p11 = scmp.ne.s32.totalorder (!%p333_p9), %s6482_s29, 0 }
  0x21   : > { %s8784_s30 = smov (!%p372_p10, %s6486_s30), 1  ;;  %381 = sbr.rel (%p4879_p11) target bundleno = 41 (0x29), region = 97 }
  0x22   : > { %s5281_s17 = sshll.u32 %s8784_s30, 7 }
  0x23   : > { %s6615_s21 = scalar_lea.vmem %s8750_s8, %s5281_s17 }
  0x26   : > { %vm382_vm0 = vcmask 7168   ;;  %v6500_v4 = vmov 0.0  }
  0x27   : > { %383 = vst.msk [vmem:[#allocation2] sm:$0xff] %vm382_vm0, %v6500_v4  ;;  %384 = vst.msk [vmem:[#allocation2 + $0x8] sm:$0xff] %vm382_vm0, %v6500_v4 }
  0x28   : > { %385 = vst.msk [vmem:[#allocation2 + $0x10] sm:$0xff] %vm382_vm0, %v6500_v4  ;;  %386 = vst.msk [vmem:[#allocation2 + $0x18] sm:$0xff] %vm382_vm0, %v6500_v4 }
  0x29 PF: > { %v6304_v5 = vld [vmem:[%s341_s22 + $0x8] sm:$0xff]   ;;  %vm441_vm1 = vcmask 261120   ;;  %v6305_v6 = vld [vmem:[%s341_s22] sm:$0xff]   ;;  %v6501_v8 = vmov 0   ;;  %vm517_vm2 = vcmask 7168   ;;  %p4886_p12 = scmp.ne.s32.totalorder %s6482_s29, 1 }
  0x2a   : > { %5944 = vmatprep.subr.bf16.mxu0 %v6304_v5  ;;  %v6306_v7 = vld [vmem:[%s8743_s1] sm:$0xff]   ;;  %6302 = vset.pattern.permute.xlu0 %v6501_v8  ;;  %v397_v10 = vld [vmem:[%s8744_s2 + $0x10] sm:$0xff]  ;;  %v6307_v11 = vld [vmem:[%s8743_s1 + $0x8] sm:$0xff]  }
  0x2b   : > { %5945 = vmatpush3.bf16.msra.mxu0 %v6304_v5  ;;  %6303 = vset.pattern.permute.xlu1 %v6501_v8  ;;  %v395_v9 = vld [vmem:[%s8744_s2] sm:$0xff]  ;;  %v396_v12 = vld [vmem:[%s8744_s2 + $0x8] sm:$0xff]  ;;  %v398_v13 = vld [vmem:[%s8744_s2 + $0x18] sm:$0xff] }
  0x2c   : > { %5946 = vmatprep.subr.bf16.mxu0 %v6305_v6  ;;  %5948 = vmatprep.mubr.msk.bf16.mxu0 %vm441_vm1, %v6306_v7 }
  0x2d   : > { %401 = vperm.xlu0 %6302, %v395_v9   ;;  %411 = vperm.xlu1 %6303, %v397_v10  }
  0x2e   : > { %v501_v30 = vld [vmem:[#allocation2] sm:$0xff]  ;;  %v502_v33 = vld [vmem:[#allocation2 + $0x8] sm:$0xff] }
  0x2f   : > { %5947 = vmatpush3.bf16.msra.mxu0 %v6305_v6  ;;  %v503_v34 = vld [vmem:[#allocation2 + $0x10] sm:$0xff]  ;;  %v504_v39 = vld [vmem:[#allocation2 + $0x18] sm:$0xff] }
  0x31   : > { %406 = vperm.xlu0 %6302, %v396_v12   ;;  %416 = vperm.xlu1 %6303, %v398_v13  }
  0x32   : > { %5949 = vmatmul.mubr.msk.bf16.vlgmr.msra.gmra.mxu0 %vm441_vm1, %v6307_v11 }
  0xa8   : > { %v402_v14 = vpop.permute.xlu0 %401  ;;  %v412_v15 = vpop.permute.xlu1 %411 }
  0xac   : > { %v407_v21 = vpop.permute.xlu0 %406  ;;  %v417_v23 = vpop.permute.xlu1 %416 }
  0xf2   : > { %v5950_v16 = vpop.f32.mrf.mxu0 }
  0xf3   : > { %v491_v20 = vadd.f32 %v5950_v16, %v412_v15 }
  0xf4   : > { %v482_v17 = vpop.f32.mrf.mxu0 }
  0xf5   : > { %v483_v18 = vadd.f32 %v482_v17, %v402_v14  ;;  %v499_v26 = vmax.f32 %v491_v20, 0.0 }
  0xf6   : > { %v5951_v19 = vpop.f32.mrf.mxu0 }
  0xf7   : > { %v497_v22 = vmax.f32 %v483_v18, 0.0  ;;  %v494_v27 = vadd.f32 %v5951_v19, %v417_v23 }
  0xf8   : > { %v485_v24 = vpop.f32.mrf.mxu0 }
  0xf9   : > { %v486_v25 = vadd.f32 %v485_v24, %v407_v21  ;;  %505 = vadd.xlane.f32.xlu0 %v497_v22  ;;  %v500_v29 = vmax.f32 %v494_v27, 0.0 }
  0xfb   : > { %v498_v28 = vmax.f32 %v486_v25, 0.0 }
  0xfd   : > { %507 = vadd.xlane.f32.xlu1 %v498_v28  ;;  %509 = vadd.xlane.f32.xlu0 %v499_v26 }
 0x101   : > { %511 = vadd.xlane.f32.xlu0 %v500_v29 }
 0x182   : > { %v506_v31 = vpop.xlane.xlu0 %505 }
 0x183   : > { %v513_v32 = vadd.f32 %v506_v31, %v501_v30 }
 0x185   : > { %518 = vst.msk [vmem:[#allocation2] sm:$0xff] %vm517_vm2, %v513_v32 }
 0x186   : > { %v508_v35 = vpop.xlane.xlu1 %507  ;;  %v510_v36 = vpop.xlane.xlu0 %509 }
 0x187   : > { %v514_v37 = vadd.f32 %v508_v35, %v502_v33  ;;  %v515_v38 = vadd.f32 %v510_v36, %v503_v34 }
 0x189   : > { %519 = vst.msk [vmem:[#allocation2 + $0x8] sm:$0xff] %vm517_vm2, %v514_v37  ;;  %520 = vst.msk [vmem:[#allocation2 + $0x10] sm:$0xff] %vm517_vm2, %v515_v38  ;;  %525 = sbr.rel (%p4886_p12) target bundleno = 1675 (0x68b), region = 101 }
 0x18a   : > { %v512_v40 = vpop.xlane.xlu0 %511 }
 0x18b   : > { %v516_v41 = vadd.f32 %v512_v40, %v504_v39 }
 0x18d   : > { %521 = vst.msk [vmem:[#allocation2 + $0x18] sm:$0xff] %vm517_vm2, %v516_v41 }
 0x18e   : > { %v528_v42 = vld [vmem:[%s8744_s2 + $0x10] sm:$0xff]  ;;  %v529_v43 = vld [vmem:[%s8744_s2 + $0x18] sm:$0xff]  ;;  %v526_v47 = vld [vmem:[%s8744_s2] sm:$0xff] }
 0x18f   : > { %v532_v44 = vmax.f32 %v528_v42, 0.0  ;;  %v533_v45 = vmax.f32 %v529_v43, 0.0  ;;  %v527_v48 = vld [vmem:[%s8744_s2 + $0x8] sm:$0xff]  ;;  %v530_v50 = vmax.f32 %v526_v47, 0.0  ;;  %v534_v52 = vld [vmem:[#allocation2] sm:$0xff]  ;;  %v6310_v6 = vld [vmem:[%s8745_s3 + $0x10] sm:$0xff]  }
 0x190   : > { %v536_v46 = vld [vmem:[#allocation2 + $0x10] sm:$0xff]  ;;  %v531_v51 = vmax.f32 %v527_v48, 0.0  ;;  %v535_v55 = vld [vmem:[#allocation2 + $0x8] sm:$0xff]  ;;  %v6308_v56 = vld [vmem:[%s8745_s3] sm:$0xff]  }
 0x191   : > { %v540_v53 = vmul.f32 31.0, %v532_v44  ;;  %v541_v54 = vmul.f32 31.0, %v533_v45  ;;  %v538_v57 = vmul.f32 31.0, %v530_v50  ;;  %5956 = vmatprep.mubr.msk.bf16.mxu0 %vm441_vm1, %v6308_v56  ;;  %v6309_v5 = vld [vmem:[%s8745_s3 + $0x8] sm:$0xff]   ;;  %v6311_v7 = vld [vmem:[%s8745_s3 + $0x18] sm:$0xff]   ;;  %v6312_v8 = vld [vmem:[%s8745_s3 + $0x20] sm:$0xff]  }
 0x192   : > { %v539_v58 = vmul.f32 31.0, %v531_v51  ;;  %v6313_v9 = vld [vmem:[%s8745_s3 + $0x28] sm:$0xff]   ;;  %v6314_v10 = vld [vmem:[%s8745_s3 + $0x30] sm:$0xff]   ;;  %v6315_v11 = vld [vmem:[%s8745_s3 + $0x38] sm:$0xff]  }
 0x193   : > { %v544_v59 = vsub.f32 %v536_v46, %v540_v53  ;;  %v542_v61 = vsub.f32 %v534_v52, %v538_v57  ;;  %v6316_v12 = vld [vmem:[%s8745_s3 + $0x40] sm:$0xff]   ;;  %v6317_v13 = vld [vmem:[%s8745_s3 + $0x48] sm:$0xff]   ;;  %v6318_v14 = vld [vmem:[%s8745_s3 + $0x50] sm:$0xff]  }
 0x194   : > { %v537_v49 = vld [vmem:[#allocation2 + $0x18] sm:$0xff]  ;;  %v543_v62 = vsub.f32 %v535_v55, %v539_v58  ;;  %v6320_v16 = vld [vmem:[%s8745_s3 + $0x60] sm:$0xff]   ;;  %v6321_v17 = vld [vmem:[%s8745_s3 + $0x68] sm:$0xff]  }
 0x195   : > { %v545_v60 = vsub.f32 %v537_v49, %v541_v54  ;;  %v548_v63 = vmul.f32 0.0044444446, %v544_v59  ;;  %v546_v1 = vmul.f32 0.0044444446, %v542_v61  ;;  %v6319_v15 = vld [vmem:[%s8745_s3 + $0x58] sm:$0xff]   ;;  %v6322_v18 = vld [vmem:[%s8745_s3 + $0x70] sm:$0xff]  }
 0x196   : > { %v547_v2 = vmul.f32 0.0044444446, %v543_v62  ;;  %v6323_v19 = vld [vmem:[%s8745_s3 + $0x78] sm:$0xff]   ;;  %v6324_v20 = vld [vmem:[%s8745_s3 + $0x80] sm:$0xff]   ;;  %v6325_v21 = vld [vmem:[%s8745_s3 + $0x88] sm:$0xff]  }
 0x197   : > { %v549_v0 = vmul.f32 0.0044444446, %v545_v60  ;;  %v6326_v22 = vld [vmem:[%s8745_s3 + $0x90] sm:$0xff]   ;;  %v6327_v23 = vld [vmem:[%s8745_s3 + $0x98] sm:$0xff]   ;;  %v6328_v24 = vld [vmem:[%s8745_s3 + $0xa0] sm:$0xff]  }
 0x198   : > { %v550_v4 = vpack.c.bf16 %v547_v2, %v546_v1  ;;  %v6329_v25 = vld [vmem:[%s8745_s3 + $0xa8] sm:$0xff]   ;;  %v6330_v26 = vld [vmem:[%s8745_s3 + $0xb0] sm:$0xff]   ;;  %v6331_v27 = vld [vmem:[%s8745_s3 + $0xb8] sm:$0xff]  }
 0x199   : > { %v551_v3 = vpack.c.bf16 %v549_v0, %v548_v63  ;;  %v6332_v28 = vld [vmem:[%s8745_s3 + $0xc0] sm:$0xff]   ;;  %v6333_v29 = vld [vmem:[%s8745_s3 + $0xc8] sm:$0xff]   ;;  %v6334_v30 = vld [vmem:[%s8745_s3 + $0xd0] sm:$0xff]  }
 0x19a   : > { %v6335_v31 = vld [vmem:[%s8745_s3 + $0xd8] sm:$0xff]   ;;  %v6336_v32 = vld [vmem:[%s8745_s3 + $0xe0] sm:$0xff]   ;;  %v6337_v33 = vld [vmem:[%s8745_s3 + $0xe8] sm:$0xff]  }
 0x19b   : > { %5952 = vmatprep.subr.bf16.mxu0 %v551_v3  ;;  %v6338_v34 = vld [vmem:[%s8745_s3 + $0xf0] sm:$0xff]   ;;  %v6339_v35 = vld [vmem:[%s8745_s3 + $0xf8] sm:$0xff]   ;;  %v6340_v36 = vld [vmem:[%s8745_s3 + $0x100] sm:$0xff]  }
 0x19c   : > { %5953 = vmatpush3.bf16.msra.mxu0 %v551_v3  ;;  %v6341_v37 = vld [vmem:[%s8745_s3 + $0x108] sm:$0xff]   ;;  %v6342_v38 = vld [vmem:[%s8745_s3 + $0x110] sm:$0xff]   ;;  %v6343_v39 = vld [vmem:[%s8745_s3 + $0x118] sm:$0xff]  }
 0x19d   : > { %5954 = vmatprep.subr.bf16.mxu0 %v550_v4  ;;  %v6344_v40 = vld [vmem:[%s8745_s3 + $0x120] sm:$0xff]   ;;  %v6345_v41 = vld [vmem:[%s8745_s3 + $0x128] sm:$0xff]   ;;  %v6346_v42 = vld [vmem:[%s8745_s3 + $0x130] sm:$0xff]  }
 0x19e   : > { %v6347_v43 = vld [vmem:[%s8745_s3 + $0x138] sm:$0xff]   ;;  %v6348_v44 = vld [vmem:[%s8745_s3 + $0x140] sm:$0xff]   ;;  %v6349_v47 = vld [vmem:[%s8745_s3 + $0x148] sm:$0xff]  }
 0x19f   : > { %v6822_v45 = vld [vmem:[%s8746_s4] sm:$0xff]  ;;  %v6350_v49 = vld [vmem:[%s8745_s3 + $0x150] sm:$0xff]   ;;  %v6351_v51 = vld [vmem:[%s8745_s3 + $0x158] sm:$0xff]  }
 0x1a0   : > { %5955 = vmatpush3.bf16.msra.mxu0 %v550_v4  ;;  %v6827_v46 = vld [vmem:[%s8746_s4 + $0x40] sm:$0xff]  ;;  %v6353_v53 = vld [vmem:[%s8745_s3 + $0x168] sm:$0xff]   ;;  %v6354_v54 = vld [vmem:[%s8745_s3 + $0x170] sm:$0xff]  }
 0x1a1   : > { %v5144_v48 = vcombine.high %v6822_v45, %v6827_v46  ;;  %v5143_v50 = vcombine.low %v6822_v45, %v6827_v46  ;;  %v6352_v52 = vld [vmem:[%s8745_s3 + $0x160] sm:$0xff]   ;;  %v6355_v55 = vld [vmem:[%s8745_s3 + $0x178] sm:$0xff]   ;;  %v6357_v57 = vld [vmem:[%s8745_s3 + $0x188] sm:$0xff]  }
 0x1a2   : > { %v6356_v56 = vld [vmem:[%s8745_s3 + $0x180] sm:$0xff]   ;;  %v6358_v58 = vld [vmem:[%s8745_s3 + $0x190] sm:$0xff]   ;;  %v6359_v62 = vld [vmem:[%s8745_s3 + $0x198] sm:$0xff]  }
 0x1a3   : > { %5957 = vmatmul.mubr.msk.bf16.vlgmr.msra.gmra.mxu0 %vm441_vm1, %v6309_v5  ;;  %3833 = vmatprep.mubr.bf16.mxu1 %v5144_v48  ;;  %v6360_v0 = vld [vmem:[%s8745_s3 + $0x1a0] sm:$0xff]   ;;  %v6374_v48 = vld [vmem:[%s8745_s3 + $0x210] sm:$0xff]   ;;  %v6383_v46 = vld [vmem:[%s8745_s3 + $0x258] sm:$0xff]  }
 0x1a4   : > { %5960 = vmatprep.mubr.msk.bf16.mxu0 %vm441_vm1, %v6310_v6  ;;  %v6361_v6 = vld [vmem:[%s8745_s3 + $0x1a8] sm:$0xff]  }
 0x1ab   : > { %5961 = vmatmul.mubr.msk.bf16.gmra.mxu0 %vm441_vm1, %v6311_v7 }
 0x1ac   : > { %5964 = vmatprep.mubr.msk.bf16.mxu0 %vm441_vm1, %v6312_v8  ;;  %v6362_v8 = vld [vmem:[%s8745_s3 + $0x1b0] sm:$0xff]  }
 0x1b3   : > { %5965 = vmatmul.mubr.msk.bf16.gmra.mxu0 %vm441_vm1, %v6313_v9 }
 0x1b4   : > { %5968 = vmatprep.mubr.msk.bf16.mxu0 %vm441_vm1, %v6314_v10 }
 0x1bb   : > { %5969 = vmatmul.mubr.msk.bf16.gmra.mxu0 %vm441_vm1, %v6315_v11 }
 0x1bc   : > { %5972 = vmatprep.mubr.msk.bf16.mxu0 %vm441_vm1, %v6316_v12 }
 0x1c3   : > { %5973 = vmatmul.mubr.msk.bf16.gmra.mxu0 %vm441_vm1, %v6317_v13 }
 0x1c4   : > { %5976 = vmatprep.mubr.msk.bf16.mxu0 %vm441_vm1, %v6318_v14  ;;  %v6363_v14 = vld [vmem:[%s8745_s3 + $0x1b8] sm:$0xff]  }
 0x1cb   : > { %5977 = vmatmul.mubr.msk.bf16.gmra.mxu0 %vm441_vm1, %v6319_v15  ;;  %v6364_v15 = vld [vmem:[%s8745_s3 + $0x1c0] sm:$0xff]  }
 0x1cc   : > { %5980 = vmatprep.mubr.msk.bf16.mxu0 %vm441_vm1, %v6320_v16 }
 0x1d3   : > { %5981 = vmatmul.mubr.msk.bf16.gmra.mxu0 %vm441_vm1, %v6321_v17 }
 0x1d4   : > { %5984 = vmatprep.mubr.msk.bf16.mxu0 %vm441_vm1, %v6322_v18 }
 0x1db   : > { %5985 = vmatmul.mubr.msk.bf16.gmra.mxu0 %vm441_vm1, %v6323_v19 }
 0x1dc   : > { %5988 = vmatprep.mubr.msk.bf16.mxu0 %vm441_vm1, %v6324_v20  ;;  %v6365_v20 = vld [vmem:[%s8745_s3 + $0x1c8] sm:$0xff]  }
 0x1e3   : > { %5989 = vmatmul.mubr.msk.bf16.gmra.mxu0 %vm441_vm1, %v6325_v21  ;;  %v6366_v21 = vld [vmem:[%s8745_s3 + $0x1d0] sm:$0xff]  }
 0x1e4   : > { %5992 = vmatprep.mubr.msk.bf16.mxu0 %vm441_vm1, %v6326_v22 }
 0x1eb   : > { %5993 = vmatmul.mubr.msk.bf16.gmra.mxu0 %vm441_vm1, %v6327_v23 }
 0x1ec   : > { %5996 = vmatprep.mubr.msk.bf16.mxu0 %vm441_vm1, %v6328_v24 }
 0x1f3   : > { %5997 = vmatmul.mubr.msk.bf16.gmra.mxu0 %vm441_vm1, %v6329_v25 }
 0x1f4   : > { %6000 = vmatprep.mubr.msk.bf16.mxu0 %vm441_vm1, %v6330_v26  ;;  %v6367_v26 = vld [vmem:[%s8745_s3 + $0x1d8] sm:$0xff]  }
 0x1fb   : > { %6001 = vmatmul.mubr.msk.bf16.gmra.mxu0 %vm441_vm1, %v6331_v27  ;;  %v6368_v27 = vld [vmem:[%s8745_s3 + $0x1e0] sm:$0xff]  }
 0x1fc   : > { %6004 = vmatprep.mubr.msk.bf16.mxu0 %vm441_vm1, %v6332_v28 }
 0x203   : > { %6005 = vmatmul.mubr.msk.bf16.gmra.mxu0 %vm441_vm1, %v6333_v29 }
 0x204   : > { %6008 = vmatprep.mubr.msk.bf16.mxu0 %vm441_vm1, %v6334_v30 }
 0x20b   : > { %6009 = vmatmul.mubr.msk.bf16.gmra.mxu0 %vm441_vm1, %v6335_v31 }
 0x20c   : > { %6012 = vmatprep.mubr.msk.bf16.mxu0 %vm441_vm1, %v6336_v32  ;;  %v6369_v32 = vld [vmem:[%s8745_s3 + $0x1e8] sm:$0xff]  }
 0x213   : > { %6013 = vmatmul.mubr.msk.bf16.gmra.mxu0 %vm441_vm1, %v6337_v33  ;;  %v6370_v33 = vld [vmem:[%s8745_s3 + $0x1f0] sm:$0xff]  }
 0x214   : > { %6016 = vmatprep.mubr.msk.bf16.mxu0 %vm441_vm1, %v6338_v34 }
 0x21b   : > { %6017 = vmatmul.mubr.msk.bf16.gmra.mxu0 %vm441_vm1, %v6339_v35 }
 0x21c   : > { %6020 = vmatprep.mubr.msk.bf16.mxu0 %vm441_vm1, %v6340_v36 }
 0x223   : > { %6021 = vmatmul.mubr.msk.bf16.gmra.mxu0 %vm441_vm1, %v6341_v37 }
 0x224   : > { %6024 = vmatprep.mubr.msk.bf16.mxu0 %vm441_vm1, %v6342_v38  ;;  %v6371_v38 = vld [vmem:[%s8745_s3 + $0x1f8] sm:$0xff]  }
 0x22b   : > { %6025 = vmatmul.mubr.msk.bf16.gmra.mxu0 %vm441_vm1, %v6343_v39  ;;  %v6372_v39 = vld [vmem:[%s8745_s3 + $0x200] sm:$0xff]  }
 0x22c   : > { %6028 = vmatprep.mubr.msk.bf16.mxu0 %vm441_vm1, %v6344_v40 }
 0x233   : > { %6029 = vmatmul.mubr.msk.bf16.gmra.mxu0 %vm441_vm1, %v6345_v41 }
 0x234   : > { %6032 = vmatprep.mubr.msk.bf16.mxu0 %vm441_vm1, %v6346_v42 }
 0x23b   : > { %6033 = vmatmul.mubr.msk.bf16.gmra.mxu0 %vm441_vm1, %v6347_v43 }
 0x23c   : > { %6036 = vmatprep.mubr.msk.bf16.mxu0 %vm441_vm1, %v6348_v44  ;;  %v6373_v44 = vld [vmem:[%s8745_s3 + $0x208] sm:$0xff]  }
 0x243   : > { %6037 = vmatmul.mubr.msk.bf16.gmra.mxu0 %vm441_vm1, %v6349_v47 }
 0x244   : > { %6040 = vmatprep.mubr.msk.bf16.mxu0 %vm441_vm1, %v6350_v49 }
 0x24b   : > { %6041 = vmatmul.mubr.msk.bf16.gmra.mxu0 %vm441_vm1, %v6351_v51 }
 0x24c   : > { %6044 = vmatprep.mubr.msk.bf16.mxu0 %vm441_vm1, %v6352_v52 }
 0x253   : > { %6045 = vmatmul.mubr.msk.bf16.gmra.mxu0 %vm441_vm1, %v6353_v53 }
 0x254   : > { %6048 = vmatprep.mubr.msk.bf16.mxu0 %vm441_vm1, %v6354_v54 }
 0x25b   : > { %6049 = vmatmul.mubr.msk.bf16.gmra.mxu0 %vm441_vm1, %v6355_v55 }
 0x25c   : > { %6052 = vmatprep.mubr.msk.bf16.mxu0 %vm441_vm1, %v6356_v56 }
 0x263   : > { %v6871_v59 = vpop.f32.mrf.mxu0  ;;  %6053 = vmatmul.mubr.msk.bf16.gmra.mxu0 %vm441_vm1, %v6357_v57 }
 0x264   : > { %6056 = vmatprep.mubr.msk.bf16.mxu0 %vm441_vm1, %v6358_v58  ;;  %v6375_v58 = vld [vmem:[%s8745_s3 + $0x218] sm:$0xff]  }
 0x265   : > { %v6875_v60 = vpop.f32.mrf.mxu0 }
 0x267   : > { %v6877_v61 = vpop.f32.mrf.mxu0 }
 0x268   : > { %v3018_v63 = vpack.c.bf16 %v6877_v61, %v6871_v59  ;;  %v6381_v59 = vld [vmem:[%s8745_s3 + $0x248] sm:$0xff]  }
 0x269   : > { %v6887_v1 = vpop.f32.mrf.mxu0 }
 0x26a   : > { %v3017_v2 = vpack.c.bf16 %v6887_v1, %v6875_v60  ;;  %v2921_v60 = vld [vmem:[%s8746_s4 + $0x100] sm:$0xff] }
 0x26b   : > { %v6891_v3 = vpop.f32.mrf.mxu0  ;;  %6057 = vmatmul.mubr.msk.bf16.gmra.mxu0 %vm441_vm1, %v6359_v62  ;;  %v2929_v1 = vld [vmem:[%s8746_s4 + $0x140] sm:$0xff] }
 0x26c   : > { %6060 = vmatprep.mubr.msk.bf16.mxu0 %vm441_vm1, %v6360_v0  ;;  %v6376_v0 = vld [vmem:[%s8745_s3 + $0x220] sm:$0xff]  }
 0x26d   : > { %v6895_v4 = vpop.f32.mrf.mxu0 }
 0x26f   : > { %v6897_v5 = vpop.f32.mrf.mxu0 }
 0x270   : > { %v3020_v7 = vpack.c.bf16 %v6897_v5, %v6891_v3  ;;  %v6380_v3 = vld [vmem:[%s8745_s3 + $0x240] sm:$0xff]  }
 0x271   : > { %v6907_v9 = vpop.f32.mrf.mxu0 }
 0x272   : > { %v3019_v10 = vpack.c.bf16 %v6907_v9, %v6895_v4  ;;  %v2905_v4 = vld [vmem:[%s8746_s4 + $0x80] sm:$0xff] }
 0x273   : > { %v6911_v11 = vpop.f32.mrf.mxu0  ;;  %6061 = vmatmul.mubr.msk.bf16.gmra.mxu0 %vm441_vm1, %v6361_v6  ;;  %v2913_v9 = vld [vmem:[%s8746_s4 + $0xc0] sm:$0xff] }
 0x274   : > { %6064 = vmatprep.mubr.msk.bf16.mxu0 %vm441_vm1, %v6362_v8  ;;  %v5160_v61 = vcombine.high %v2905_v4, %v2913_v9 }
 0x275   : > { %v6915_v12 = vpop.f32.mrf.mxu0 }
 0x277   : > { %v6917_v13 = vpop.f32.mrf.mxu0 }
 0x278   : > { %v3022_v6 = vpack.c.bf16 %v6917_v13, %v6911_v11 }
 0x279   : > { %v6925_v16 = vpop.f32.mrf.mxu0 }
 0x27b   : > { %v5970_v17 = vpop.f32.mrf.mxu0  ;;  %6065 = vmatmul.mubr.msk.bf16.gmra.mxu0 %vm441_vm1, %v6363_v14 }
 0x27c   : > { %6068 = vmatprep.mubr.msk.bf16.mxu0 %vm441_vm1, %v6364_v15 }
 0x27d   : > { %v1914_v18 = vpop.f32.mrf.mxu0 }
 0x27f   : > { %v5971_v19 = vpop.f32.mrf.mxu0 }
 0x280   : > { %v3024_v49 = vpack.c.bf16 %v5971_v19, %v5970_v17 }
 0x281   : > { %v1917_v22 = vpop.f32.mrf.mxu0 }
 0x282   : > { %v3023_v54 = vpack.c.bf16 %v1917_v22, %v1914_v18  ;;  %v3021_v18 = vpack.c.bf16 %v6925_v16, %v6915_v12  ;;  %v6378_v22 = vld [vmem:[%s8745_s3 + $0x230] sm:$0xff]  }
 0x283   : > { %v6935_v23 = vpop.f32.mrf.mxu0  ;;  %6069 = vmatmul.mubr.msk.bf16.gmra.mxu0 %vm441_vm1, %v6365_v20  ;;  %v6377_v20 = vld [vmem:[%s8745_s3 + $0x228] sm:$0xff]  }
 0x284   : > { %6072 = vmatprep.mubr.msk.bf16.mxu0 %vm441_vm1, %v6366_v21 }
 0x285   : > { %v6939_v24 = vpop.f32.mrf.mxu0 }
 0x287   : > { %v6941_v25 = vpop.f32.mrf.mxu0 }
 0x289   : > { %v6949_v28 = vpop.f32.mrf.mxu0 }
 0x28b   : > { %v5978_v29 = vpop.f32.mrf.mxu0  ;;  %6073 = vmatmul.mubr.msk.bf16.gmra.mxu0 %vm441_vm1, %v6367_v26 }
 0x28c   : > { %6076 = vmatprep.mubr.msk.bf16.mxu0 %vm441_vm1, %v6368_v27 }
 0x28d   : > { %v6953_v30 = vpop.f32.mrf.mxu0 }
 0x28f   : > { %v5979_v31 = vpop.f32.mrf.mxu0 }
 0x290   : > { %v3028_v11 = vpack.c.bf16 %v5979_v31, %v5978_v29  ;;  %v3026_v31 = vpack.c.bf16 %v6941_v25, %v6935_v23 }
 0x291   : > { %v1949_v34 = vpop.f32.mrf.mxu0 }
 0x292   : > { %v3027_v12 = vpack.c.bf16 %v1949_v34, %v6953_v30  ;;  %v6384_v34 = vld [vmem:[%s8745_s3 + $0x260] sm:$0xff]  }
 0x293   : > { %v5982_v35 = vpop.f32.mrf.mxu0  ;;  %6077 = vmatmul.mubr.msk.bf16.gmra.mxu0 %vm441_vm1, %v6369_v32  ;;  %v6379_v32 = vld [vmem:[%s8745_s3 + $0x238] sm:$0xff]  }
 0x294   : > { %6080 = vmatprep.mubr.msk.bf16.mxu0 %vm441_vm1, %v6370_v33  ;;  %v5159_v33 = vcombine.low %v2905_v4, %v2913_v9 }
 0x295   : > { %v1962_v36 = vpop.f32.mrf.mxu0 }
 0x297   : > { %v5983_v37 = vpop.f32.mrf.mxu0 }
 0x298   : > { %v3030_v56 = vpack.c.bf16 %v5983_v37, %v5982_v35  ;;  %v2937_v37 = vld [vmem:[%s8746_s4 + $0x180] sm:$0xff] }
 0x299   : > { %v1965_v40 = vpop.f32.mrf.mxu0 }
 0x29a   : > { %v3029_v14 = vpack.c.bf16 %v1965_v40, %v1962_v36  ;;  %v5175_v40 = vcombine.low %v2921_v60, %v2929_v1 }
 0x29b   : > { %v5986_v41 = vpop.f32.mrf.mxu0  ;;  %6081 = vmatmul.mubr.msk.bf16.gmra.mxu0 %vm441_vm1, %v6371_v38  ;;  %v2945_v38 = vld [vmem:[%s8746_s4 + $0x1c0] sm:$0xff] }
 0x29c   : > { %6084 = vmatprep.mubr.msk.bf16.mxu0 %vm441_vm1, %v6372_v39 }
 0x29d   : > { %v1978_v42 = vpop.f32.mrf.mxu0 }
 0x29f   : > { %v5987_v43 = vpop.f32.mrf.mxu0 }
 0x2a0   : > { %v3032_v47 = vpack.c.bf16 %v5987_v43, %v5986_v41  ;;  %v5192_v43 = vcombine.high %v2937_v37, %v2945_v38 }
 0x2a1   : > { %v1981_v51 = vpop.f32.mrf.mxu0 }
 0x2a2   : > { %v3031_v52 = vpack.c.bf16 %v1981_v51, %v1978_v42  ;;  %5416 = vmatprep.subr.bf16.mxu1 %v3032_v47  ;;  %v6385_v42 = vld [vmem:[%s8745_s3 + $0x268] sm:$0xff]   ;;  %v2961_v51 = vld [vmem:[%s8746_s4 + $0x240] sm:$0xff] }
 0x2a3   : > { %v6977_v53 = vpop.f32.mrf.mxu0  ;;  %6085 = vmatmul.mubr.msk.bf16.gmra.mxu0 %vm441_vm1, %v6373_v44  ;;  %5417 = vmatpush3.bf16.msra.mxu1 %v3024_v49  ;;  %v6386_v44 = vld [vmem:[%s8745_s3 + $0x270] sm:$0xff]   ;;  %v2953_v49 = vld [vmem:[%s8746_s4 + $0x200] sm:$0xff] }
 0x2a4   : > { %5418 = vmatprep.subr.bf16.mxu1 %v3031_v52  ;;  %6088 = vmatprep.mubr.msk.bf16.mxu0 %vm441_vm1, %v6374_v48 }
 0x2a5   : > { %v6981_v55 = vpop.f32.mrf.mxu0 }
 0x2a7   : > { %v6983_v57 = vpop.f32.mrf.mxu0  ;;  %5419 = vmatpush3.bf16.msra.mxu1 %v3023_v54  ;;  %v5191_v54 = vcombine.low %v2937_v37, %v2945_v38 }
 0x2a8   : > { %v3034_v62 = vpack.c.bf16 %v6983_v57, %v6977_v53  ;;  %5420 = vmatprep.subr.bf16.mxu1 %v3030_v56  ;;  %v6397_v53 = vld [vmem:[%s8745_s3 + $0x2c8] sm:$0xff]  }
 0x2a9   : > { %v6995_v8 = vpop.f32.mrf.mxu0 }
 0x2aa   : > { %v3033_v15 = vpack.c.bf16 %v6995_v8, %v6981_v55  ;;  %v2922_v55 = vld [vmem:[%s8746_s4 + $0x108] sm:$0xff] }
 0x2ab   : > { %v6999_v17 = vpop.f32.mrf.mxu0  ;;  %6089 = vmatmul.mubr.msk.bf16.gmra.mxu0 %vm441_vm1, %v6375_v58  ;;  %5421 = vmatpush3.bf16.msra.mxu1 %v3022_v6  ;;  %v6387_v58 = vld [vmem:[%s8745_s3 + $0x278] sm:$0xff]   ;;  %v6388_v6 = vld [vmem:[%s8745_s3 + $0x280] sm:$0xff]   ;;  %v2930_v8 = vld [vmem:[%s8746_s4 + $0x148] sm:$0xff] }
 0x2ac   : > { %5422 = vmatprep.subr.bf16.mxu1 %v3029_v14  ;;  %6092 = vmatprep.mubr.msk.bf16.mxu0 %vm441_vm1, %v6376_v0  ;;  %v5208_v0 = vcombine.high %v2953_v49, %v2961_v51 }
 0x2ad   : > { %v7005_v19 = vpop.f32.mrf.mxu0 }
 0x2af   : > { %v7007_v13 = vpop.f32.mrf.mxu0  ;;  %5423 = vmatpush3.bf16.msra.mxu1 %v3021_v18 }
 0x2b0   : > { %v3036_v21 = vpack.c.bf16 %v7007_v13, %v6999_v17  ;;  %5424 = vmatprep.subr.bf16.mxu1 %v3028_v11  ;;  %v6395_v13 = vld [vmem:[%s8745_s3 + $0x2b8] sm:$0xff]  }
 0x2b1   : > { %v7017_v26 = vpop.f32.mrf.mxu0 }
 0x2b2   : > { %v3035_v16 = vpack.c.bf16 %v7017_v26, %v7005_v19  ;;  %v2906_v19 = vld [vmem:[%s8746_s4 + $0x88] sm:$0xff] }
 0x2b3   : > { %v7022_v27 = vpop.f32.mrf.mxu0  ;;  %6093 = vmatmul.mubr.msk.bf16.gmra.mxu0 %vm441_vm1, %v6377_v20  ;;  %5425 = vmatpush3.bf16.msra.mxu1 %v3020_v7  ;;  %v3025_v7 = vpack.c.bf16 %v6949_v28, %v6939_v24  ;;  %v2969_v20 = vld [vmem:[%s8746_s4 + $0x280] sm:$0xff]  ;;  %v2914_v26 = vld [vmem:[%s8746_s4 + $0xc8] sm:$0xff] }
 0x2b4   : > { %5426 = vmatprep.subr.bf16.mxu1 %v3027_v12  ;;  %6096 = vmatprep.mubr.msk.bf16.mxu0 %vm441_vm1, %v6378_v22  ;;  %v2977_v22 = vld [vmem:[%s8746_s4 + $0x2c0] sm:$0xff]  ;;  %v5207_v12 = vcombine.low %v2953_v49, %v2961_v51  ;;  %v5162_v57 = vcombine.high %v2906_v19, %v2914_v26 }
 0x2b5   : > { %v7029_v29 = vpop.f32.mrf.mxu0  ;;  %v3009_v49 = vld [vmem:[%s8746_s4 + $0x3c0] sm:$0xff] }
 0x2b7   : > { %v7033_v30 = vpop.f32.mrf.mxu0  ;;  %5427 = vmatpush3.bf16.msra.mxu1 %v3019_v10 }
 0x2b8   : > { %5428 = vmatprep.subr.bf16.mxu1 %v3026_v31  ;;  %v3038_v37 = vpack.c.bf16 %v7033_v30, %v7022_v27 }
 0x2b9   : > { %v7044_v5 = vpop.f32.mrf.mxu0 }
 0x2ba   : > { %v3037_v27 = vpack.c.bf16 %v7044_v5, %v7029_v29  ;;  %v6393_v29 = vld [vmem:[%s8745_s3 + $0x2a8] sm:$0xff]  }
 0x2bb   : > { %v7048_v23 = vpop.f32.mrf.mxu0  ;;  %6097 = vmatmul.mubr.msk.bf16.gmra.mxu0 %vm441_vm1, %v6379_v32  ;;  %5429 = vmatpush3.bf16.msra.mxu1 %v3018_v63  ;;  %v6382_v63 = vld [vmem:[%s8745_s3 + $0x250] sm:$0xff]   ;;  %v6389_v32 = vld [vmem:[%s8745_s3 + $0x288] sm:$0xff]  }
 0x2bc   : > { %5430 = vmatprep.subr.bf16.mxu1 %v3025_v7  ;;  %6100 = vmatprep.mubr.msk.bf16.mxu0 %vm441_vm1, %v6380_v3  ;;  %v5224_v7 = vcombine.high %v2969_v20, %v2977_v22 }
 0x2bd   : > { %v7061_v10 = vpop.f32.mrf.mxu0 }
 0x2bf   : > { %v7063_v24 = vpop.f32.mrf.mxu0  ;;  %5431 = vmatpush3.bf16.msra.mxu1 %v3017_v2 }
 0x2c0   : > { %v3040_v4 = vpack.c.bf16 %v7063_v24, %v7048_v23  ;;  %v2985_v23 = vld [vmem:[%s8746_s4 + $0x300] sm:$0xff] }
 0x2c1   : > { %v7074_v25 = vpop.f32.mrf.mxu0  ;;  %v2993_v24 = vld [vmem:[%s8746_s4 + $0x340] sm:$0xff] }
 0x2c2   : > { %3834 = vmatmul.mubr.bf16.vlgmr.msra.gmra.mxu1 %v5143_v50  ;;  %v5176_v50 = vcombine.high %v2921_v60, %v2929_v1  ;;  %v3039_v60 = vpack.c.bf16 %v7074_v25, %v7061_v10  ;;  %v6391_v10 = vld [vmem:[%s8745_s3 + $0x298] sm:$0xff]  }
 0x2c3   : > { %v7079_v28 = vpop.f32.mrf.mxu0  ;;  %6101 = vmatmul.mubr.msk.bf16.gmra.mxu0 %vm441_vm1, %v6381_v59  ;;  %3841 = vmatprep.mubr.bf16.mxu1 %v5160_v61  ;;  %v6390_v59 = vld [vmem:[%s8745_s3 + $0x290] sm:$0xff]  }
 0x2c4   : > { %6104 = vmatprep.mubr.msk.bf16.mxu0 %vm441_vm1, %v6382_v63 }
 0x2c5   : > { %v7089_v2 = vpop.f32.mrf.mxu0 }
 0x2c7   : > { %v7091_v45 = vpop.f32.mrf.mxu0 }
 0x2c9   : > { %v7099_v35 = vpop.f32.mrf.mxu0 }
 0x2ca   : > { %3842 = vmatmul.mubr.bf16.gmra.mxu1 %v5159_v33 }
 0x2cb   : > { %v7101_v36 = vpop.f32.mrf.mxu0  ;;  %6105 = vmatmul.mubr.msk.bf16.gmra.mxu0 %vm441_vm1, %v6383_v46  ;;  %3849 = vmatprep.mubr.bf16.mxu1 %v5176_v50  ;;  %v5223_v46 = vcombine.low %v2969_v20, %v2977_v22  ;;  %v6396_v22 = vld [vmem:[%s8745_s3 + $0x2c0] sm:$0xff]  }
 0x2cc   : > { %6108 = vmatprep.mubr.msk.bf16.mxu0 %vm441_vm1, %v6384_v34  ;;  %v5240_v34 = vcombine.high %v2985_v23, %v2993_v24 }
 0x2cd   : > { %v7111_v39 = vpop.f32.mrf.mxu0 }
 0x2cf   : > { %v7113_v41 = vpop.f32.mrf.mxu0 }
 0x2d0   : > { %v3044_v51 = vpack.c.bf16 %v7113_v41, %v7101_v36 }
 0x2d1   : > { %v7121_v47 = vpop.f32.mrf.mxu0 }
 0x2d2   : > { %3850 = vmatmul.mubr.bf16.gmra.mxu1 %v5175_v40  ;;  %v6392_v40 = vld [vmem:[%s8745_s3 + $0x2a0] sm:$0xff]   ;;  %v3043_v36 = vpack.c.bf16 %v7121_v47, %v7111_v39  ;;  %v2890_v39 = vld [vmem:[%s8746_s4 + $0x8] sm:$0xff] }
 0x2d3   : > { %v6014_v48 = vpop.f32.mrf.mxu0  ;;  %6109 = vmatmul.mubr.msk.bf16.gmra.mxu0 %vm441_vm1, %v6385_v42  ;;  %3857 = vmatprep.mubr.bf16.mxu1 %v5192_v43  ;;  %v2898_v47 = vld [vmem:[%s8746_s4 + $0x48] sm:$0xff] }
 0x2d4   : > { %6112 = vmatprep.mubr.msk.bf16.mxu0 %vm441_vm1, %v6386_v44 }
 0x2d5   : > { %v2090_v52 = vpop.f32.mrf.mxu0 }
 0x2d7   : > { %v6015_v56 = vpop.f32.mrf.mxu0 }
 0x2d8   : > { %v3046_v33 = vpack.c.bf16 %v6015_v56, %v6014_v48  ;;  %v3001_v48 = vld [vmem:[%s8746_s4 + $0x380] sm:$0xff] }
 0x2d9   : > { %v2093_v14 = vpop.f32.mrf.mxu0  ;;  %v5256_v56 = vcombine.high %v3001_v48, %v3009_v49 }
 0x2da   : > { %3858 = vmatmul.mubr.bf16.gmra.mxu1 %v5191_v54  ;;  %v3045_v42 = vpack.c.bf16 %v2093_v14, %v2090_v52  ;;  %v5239_v52 = vcombine.low %v2985_v23, %v2993_v24  ;;  %v2946_v23 = vld [vmem:[%s8746_s4 + $0x1c8] sm:$0xff] }
 0x2db   : > { %v6018_v18 = vpop.f32.mrf.mxu0  ;;  %6113 = vmatmul.mubr.msk.bf16.gmra.mxu0 %vm441_vm1, %v6387_v58  ;;  %3865 = vmatprep.mubr.bf16.mxu1 %v5208_v0  ;;  %v6394_v0 = vld [vmem:[%s8745_s3 + $0x2b0] sm:$0xff]  }
 0x2dc   : > { %6116 = vmatprep.mubr.msk.bf16.mxu0 %vm441_vm1, %v6388_v6 }
 0x2dd   : > { %v2106_v11 = vpop.f32.mrf.mxu0 }
 0x2df   : > { %v6019_v31 = vpop.f32.mrf.mxu0 }
 0x2e0   : > { %v3048_v3 = vpack.c.bf16 %v6019_v31, %v6018_v18  ;;  %v3042_v18 = vpack.c.bf16 %v7091_v45, %v7079_v28  ;;  %v3041_v28 = vpack.c.bf16 %v7099_v35, %v7089_v2  ;;  %v5145_v2 = vcombine.low %v2890_v39, %v2898_v47 }
 0x2e1   : > { %v2109_v9 = vpop.f32.mrf.mxu0 }
 0x2e2   : > { %v3047_v61 = vpack.c.bf16 %v2109_v9, %v2106_v11  ;;  %3866 = vmatmul.mubr.bf16.gmra.mxu1 %v5207_v12  ;;  %5480 = vmatprep.subr.bf16.mxu1 %v3048_v3  ;;  %v5255_v11 = vcombine.low %v3001_v48, %v3009_v49  ;;  %v6400_v9 = vld [vmem:[%s8745_s3 + $0x2e0] sm:$0xff]   ;;  %v2962_v48 = vld [vmem:[%s8746_s4 + $0x248] sm:$0xff] }
 0x2e3   : > { %v7153_v63 = vpop.f32.mrf.mxu0  ;;  %6117 = vmatmul.mubr.msk.bf16.gmra.mxu0 %vm441_vm1, %v6389_v32  ;;  %5481 = vmatpush3.bf16.msra.mxu1 %v3040_v4  ;;  %v5161_v32 = vcombine.low %v2906_v19, %v2914_v26  ;;  %v5178_v4 = vcombine.high %v2922_v55, %v2930_v8 }
 0x2e4   : > { %5482 = vmatprep.subr.bf16.mxu1 %v3047_v61  ;;  %3873 = vmatprep.mubr.bf16.mxu1 %v5224_v7  ;;  %v6399_v7 = vld [vmem:[%s8745_s3 + $0x2d8] sm:$0xff]  }
 0x2e5   : > { %v7158_v1 = vpop.f32.mrf.mxu0  ;;  %6120 = vmatprep.mubr.msk.bf16.mxu0 %vm441_vm1, %v6390_v59 }
 0x2e7   : > { %v7167_v50 = vpop.f32.mrf.mxu0  ;;  %5483 = vmatpush3.bf16.msra.mxu1 %v3039_v60  ;;  %v2938_v60 = vld [vmem:[%s8746_s4 + $0x188] sm:$0xff] }
 0x2e8   : > { %v3050_v25 = vpack.c.bf16 %v7167_v50, %v7153_v63  ;;  %5484 = vmatprep.subr.bf16.mxu1 %v3046_v33  ;;  %v5177_v33 = vcombine.low %v2922_v55, %v2930_v8  ;;  %v6413_v63 = vld [vmem:[%s8745_s3 + $0x348] sm:$0xff]  }
 0x2e9   : > { %v7176_v38 = vpop.f32.mrf.mxu0 }
 0x2ea   : > { %v3049_v43 = vpack.c.bf16 %v7176_v38, %v7158_v1  ;;  %3874 = vmatmul.mubr.bf16.gmra.mxu1 %v5223_v46  ;;  %v2923_v1 = vld [vmem:[%s8746_s4 + $0x110] sm:$0xff] }
 0x2eb   : > { %v7183_v44 = vpop.f32.mrf.mxu0  ;;  %6121 = vmatmul.mubr.msk.bf16.gmra.mxu0 %vm441_vm1, %v6391_v10  ;;  %5485 = vmatpush3.bf16.msra.mxu1 %v3038_v37  ;;  %v6401_v10 = vld [vmem:[%s8745_s3 + $0x2e8] sm:$0xff]   ;;  %v6402_v37 = vld [vmem:[%s8745_s3 + $0x2f0] sm:$0xff]  }
 0x2ec   : > { %5486 = vmatprep.subr.bf16.mxu1 %v3045_v42  ;;  %3881 = vmatprep.mubr.bf16.mxu1 %v5240_v34  ;;  %v5194_v34 = vcombine.high %v2938_v60, %v2946_v23  ;;  %v2931_v38 = vld [vmem:[%s8746_s4 + $0x150] sm:$0xff] }
 0x2ed   : > { %v7188_v30 = vpop.f32.mrf.mxu0  ;;  %6124 = vmatprep.mubr.msk.bf16.mxu0 %vm441_vm1, %v6392_v40 }
 0x2ef   : > { %v7199_v54 = vpop.f32.mrf.mxu0  ;;  %5487 = vmatpush3.bf16.msra.mxu1 %v3037_v27  ;;  %v2954_v27 = vld [vmem:[%s8746_s4 + $0x208] sm:$0xff] }
 0x2f0   : > { %v3052_v5 = vpack.c.bf16 %v7199_v54, %v7183_v44  ;;  %5488 = vmatprep.subr.bf16.mxu1 %v3044_v51  ;;  %v5193_v51 = vcombine.low %v2938_v60, %v2946_v23  ;;  %v6411_v54 = vld [vmem:[%s8745_s3 + $0x338] sm:$0xff]  }
 0x2f1   : > { %v7206_v58 = vpop.f32.mrf.mxu0 }
 0x2f2   : > { %v3051_v41 = vpack.c.bf16 %v7206_v58, %v7188_v30  ;;  %3882 = vmatmul.mubr.bf16.gmra.mxu1 %v5239_v52  ;;  %v2907_v30 = vld [vmem:[%s8746_s4 + $0x90] sm:$0xff] }
 0x2f3   : > { %v7215_v6 = vpop.f32.mrf.mxu0  ;;  %6125 = vmatmul.mubr.msk.bf16.gmra.mxu0 %vm441_vm1, %v6393_v29  ;;  %5489 = vmatpush3.bf16.msra.mxu1 %v3036_v21  ;;  %v5146_v21 = vcombine.high %v2890_v39, %v2898_v47  ;;  %v6403_v29 = vld [vmem:[%s8745_s3 + $0x2f8] sm:$0xff]   ;;  %v2915_v58 = vld [vmem:[%s8746_s4 + $0xd0] sm:$0xff] }
 0x2f4   : > { %5490 = vmatprep.subr.bf16.mxu1 %v3043_v36  ;;  %3889 = vmatprep.mubr.bf16.mxu1 %v5256_v56  ;;  %v5210_v56 = vcombine.high %v2954_v27, %v2962_v48  ;;  %v5164_v50 = vcombine.high %v2907_v30, %v2915_v58 }
 0x2f5   : > { %v7221_v14 = vpop.f32.mrf.mxu0  ;;  %6128 = vmatprep.mubr.msk.bf16.mxu0 %vm441_vm1, %v6394_v0  ;;  %v6404_v0 = vld [vmem:[%s8745_s3 + $0x300] sm:$0xff]  }
 0x2f7   : > { %v7232_v17 = vpop.f32.mrf.mxu0  ;;  %5491 = vmatpush3.bf16.msra.mxu1 %v3035_v16 }
 0x2f8   : > { %5492 = vmatprep.subr.bf16.mxu1 %v3042_v18  ;;  %v2970_v18 = vld [vmem:[%s8746_s4 + $0x288] sm:$0xff]  ;;  %v3054_v60 = vpack.c.bf16 %v7232_v17, %v7215_v6 }
 0x2f9   : > { %v7240_v20 = vpop.f32.mrf.mxu0 }
 0x2fa   : > { %3890 = vmatmul.mubr.bf16.gmra.mxu1 %v5255_v11  ;;  %v2978_v11 = vld [vmem:[%s8746_s4 + $0x2c8] sm:$0xff]  ;;  %v3053_v6 = vpack.c.bf16 %v7240_v20, %v7221_v14 }
 0x2fb   : > { %v7247_v45 = vpop.f32.mrf.mxu0  ;;  %6129 = vmatmul.mubr.msk.bf16.gmra.mxu0 %vm441_vm1, %v6395_v13  ;;  %5493 = vmatpush3.bf16.msra.mxu1 %v3034_v62  ;;  %v6398_v62 = vld [vmem:[%s8745_s3 + $0x2d0] sm:$0xff]   ;;  %v5209_v13 = vcombine.low %v2954_v27, %v2962_v48  ;;  %v5226_v19 = vcombine.high %v2970_v18, %v2978_v11  ;;  %v3010_v27 = vld [vmem:[%s8746_s4 + $0x3c8] sm:$0xff] }
 0x2fc   : > { %5494 = vmatprep.subr.bf16.mxu1 %v3041_v28  ;;  %3930 = vmatprep.mubr.bf16.mxu1 %v5146_v21  ;;  %v6409_v14 = vld [vmem:[%s8745_s3 + $0x328] sm:$0xff]  }
 0x2fd   : > { %v7259_v16 = vpop.f32.mrf.mxu0  ;;  %6132 = vmatprep.mubr.msk.bf16.mxu0 %vm441_vm1, %v6396_v22  ;;  %v6405_v22 = vld [vmem:[%s8745_s3 + $0x308] sm:$0xff]  }
 0x2ff   : > { %v7262_v35 = vpop.f32.mrf.mxu0  ;;  %5495 = vmatpush3.bf16.msra.mxu1 %v3033_v15 }
 0x300   : > { %v3056_v26 = vpack.c.bf16 %v7262_v35, %v7247_v45  ;;  %v2986_v45 = vld [vmem:[%s8746_s4 + $0x308] sm:$0xff] }
 0x301   : > { %v7273_v12 = vpop.f32.mrf.mxu0  ;;  %v2994_v35 = vld [vmem:[%s8746_s4 + $0x348] sm:$0xff] }
 0x302   : > { %3931 = vmatmul.mubr.bf16.vlgmr.msra.gmra.mxu1 %v5145_v2  ;;  %v3055_v55 = vpack.c.bf16 %v7273_v12, %v7259_v16  ;;  %v6407_v16 = vld [vmem:[%s8745_s3 + $0x318] sm:$0xff]  }
 0x303   : > { %v7275_v31 = vpop.f32.mrf.mxu0  ;;  %6133 = vmatmul.mubr.msk.bf16.gmra.mxu0 %vm441_vm1, %v6397_v53  ;;  %3938 = vmatprep.mubr.bf16.mxu1 %v5162_v57  ;;  %v6406_v53 = vld [vmem:[%s8745_s3 + $0x310] sm:$0xff]  }
 0x304   : > { %6136 = vmatprep.mubr.msk.bf16.mxu0 %vm441_vm1, %v6398_v62 }
 0x305   : > { %v7285_v15 = vpop.f32.mrf.mxu0 }
 0x307   : > { %v7287_v3 = vpop.f32.mrf.mxu0 }
 0x309   : > { %v7295_v59 = vpop.f32.mrf.mxu0 }
 0x30a   : > { %3939 = vmatmul.mubr.bf16.gmra.mxu1 %v5161_v32 }
 0x30b   : > { %v7297_v61 = vpop.f32.mrf.mxu0  ;;  %6137 = vmatmul.mubr.msk.bf16.gmra.mxu0 %vm441_vm1, %v6399_v7  ;;  %3946 = vmatprep.mubr.bf16.mxu1 %v5178_v4  ;;  %v5225_v7 = vcombine.low %v2970_v18, %v2978_v11  ;;  %v6412_v11 = vld [vmem:[%s8745_s3 + $0x340] sm:$0xff]  }
 0x30c   : > { %6140 = vmatprep.mubr.msk.bf16.mxu0 %vm441_vm1, %v6400_v9  ;;  %v5242_v9 = vcombine.high %v2986_v45, %v2994_v35 }
 0x30d   : > { %v7307_v24 = vpop.f32.mrf.mxu0 }
 0x30f   : > { %v7309_v46 = vpop.f32.mrf.mxu0 }
 0x310   : > { %v3060_v48 = vpack.c.bf16 %v7309_v46, %v7297_v61 }
 0x311   : > { %v7317_v40 = vpop.f32.mrf.mxu0 }
 0x312   : > { %3947 = vmatmul.mubr.bf16.gmra.mxu1 %v5177_v33  ;;  %v6408_v33 = vld [vmem:[%s8745_s3 + $0x320] sm:$0xff]   ;;  %v3059_v61 = vpack.c.bf16 %v7317_v40, %v7307_v24  ;;  %v2891_v24 = vld [vmem:[%s8746_s4 + $0x10] sm:$0xff] }
 0x313   : > { %v6046_v42 = vpop.f32.mrf.mxu0  ;;  %6141 = vmatmul.mubr.msk.bf16.gmra.mxu0 %vm441_vm1, %v6401_v10  ;;  %3954 = vmatprep.mubr.bf16.mxu1 %v5194_v34  ;;  %v2899_v40 = vld [vmem:[%s8746_s4 + $0x50] sm:$0xff] }
 0x314   : > { %6144 = vmatprep.mubr.msk.bf16.mxu0 %vm441_vm1, %v6402_v37 }
 0x315   : > { %v2218_v49 = vpop.f32.mrf.mxu0 }
 0x317   : > { %v6047_v52 = vpop.f32.mrf.mxu0 }
 0x318   : > { %v3062_v32 = vpack.c.bf16 %v6047_v52, %v6046_v42  ;;  %v3002_v42 = vld [vmem:[%s8746_s4 + $0x388] sm:$0xff] }
 0x319   : > { %v2221_v36 = vpop.f32.mrf.mxu0  ;;  %v5258_v52 = vcombine.high %v3002_v42, %v3010_v27 }
 0x31a   : > { %3955 = vmatmul.mubr.bf16.gmra.mxu1 %v5193_v51  ;;  %v3061_v10 = vpack.c.bf16 %v2221_v36, %v2218_v49  ;;  %v5241_v49 = vcombine.low %v2986_v45, %v2994_v35  ;;  %v2947_v45 = vld [vmem:[%s8746_s4 + $0x1d0] sm:$0xff] }
 0x31b   : > { %v6050_v39 = vpop.f32.mrf.mxu0  ;;  %6145 = vmatmul.mubr.msk.bf16.gmra.mxu0 %vm441_vm1, %v6403_v29  ;;  %3962 = vmatprep.mubr.bf16.mxu1 %v5210_v56  ;;  %v6410_v56 = vld [vmem:[%s8745_s3 + $0x330] sm:$0xff]  }
 0x31c   : > { %6148 = vmatprep.mubr.msk.bf16.mxu0 %vm441_vm1, %v6404_v0 }
 0x31d   : > { %v2234_v47 = vpop.f32.mrf.mxu0 }
 0x31f   : > { %v6051_v21 = vpop.f32.mrf.mxu0 }
 0x320   : > { %v3064_v28 = vpack.c.bf16 %v6051_v21, %v6050_v39  ;;  %v3058_v39 = vpack.c.bf16 %v7287_v3, %v7275_v31  ;;  %v3057_v31 = vpack.c.bf16 %v7295_v59, %v7285_v15  ;;  %v5147_v15 = vcombine.low %v2891_v24, %v2899_v40 }
 0x321   : > { %v2237_v2 = vpop.f32.mrf.mxu0 }
 0x322   : > { %v3063_v57 = vpack.c.bf16 %v2237_v2, %v2234_v47  ;;  %3963 = vmatmul.mubr.bf16.gmra.mxu1 %v5209_v13  ;;  %5544 = vmatprep.subr.bf16.mxu1 %v3064_v28  ;;  %v5257_v47 = vcombine.low %v3002_v42, %v3010_v27  ;;  %v6416_v2 = vld [vmem:[%s8745_s3 + $0x360] sm:$0xff]   ;;  %v2963_v42 = vld [vmem:[%s8746_s4 + $0x250] sm:$0xff] }
 0x323   : > { %v7349_v62 = vpop.f32.mrf.mxu0  ;;  %6149 = vmatmul.mubr.msk.bf16.gmra.mxu0 %vm441_vm1, %v6405_v22  ;;  %5545 = vmatpush3.bf16.msra.mxu1 %v3056_v26  ;;  %v5163_v22 = vcombine.low %v2907_v30, %v2915_v58  ;;  %v5180_v26 = vcombine.high %v2923_v1, %v2931_v38 }
 0x324   : > { %5546 = vmatprep.subr.bf16.mxu1 %v3063_v57  ;;  %3970 = vmatprep.mubr.bf16.mxu1 %v5226_v19  ;;  %v6415_v19 = vld [vmem:[%s8745_s3 + $0x358] sm:$0xff]  }
 0x325   : > { %v7354_v8 = vpop.f32.mrf.mxu0  ;;  %6152 = vmatprep.mubr.msk.bf16.mxu0 %vm441_vm1, %v6406_v53 }
 0x327   : > { %v7363_v4 = vpop.f32.mrf.mxu0  ;;  %5547 = vmatpush3.bf16.msra.mxu1 %v3055_v55  ;;  %v2939_v55 = vld [vmem:[%s8746_s4 + $0x190] sm:$0xff] }
 0x328   : > { %v3066_v12 = vpack.c.bf16 %v7363_v4, %v7349_v62  ;;  %5548 = vmatprep.subr.bf16.mxu1 %v3062_v32  ;;  %v5179_v32 = vcombine.low %v2923_v1, %v2931_v38  ;;  %v6429_v62 = vld [vmem:[%s8745_s3 + $0x3c8] sm:$0xff]  }
 0x329   : > { %v7372_v23 = vpop.f32.mrf.mxu0 }
 0x32a   : > { %v3065_v34 = vpack.c.bf16 %v7372_v23, %v7354_v8  ;;  %3971 = vmatmul.mubr.bf16.gmra.mxu1 %v5225_v7  ;;  %v2924_v23 = vld [vmem:[%s8746_s4 + $0x118] sm:$0xff] }
 0x32b   : > { %v7379_v37 = vpop.f32.mrf.mxu0  ;;  %6153 = vmatmul.mubr.msk.bf16.gmra.mxu0 %vm441_vm1, %v6407_v16  ;;  %5549 = vmatpush3.bf16.msra.mxu1 %v3054_v60  ;;  %v6417_v16 = vld [vmem:[%s8745_s3 + $0x368] sm:$0xff]   ;;  %v6418_v60 = vld [vmem:[%s8745_s3 + $0x370] sm:$0xff]  }
 0x32c   : > { %5550 = vmatprep.subr.bf16.mxu1 %v3061_v10  ;;  %3978 = vmatprep.mubr.bf16.mxu1 %v5242_v9  ;;  %v5196_v9 = vcombine.high %v2939_v55, %v2947_v45 }
 0x32d   : > { %v7384_v17 = vpop.f32.mrf.mxu0  ;;  %6156 = vmatprep.mubr.msk.bf16.mxu0 %vm441_vm1, %v6408_v33 }
 0x32f   : > { %v7395_v51 = vpop.f32.mrf.mxu0  ;;  %5551 = vmatpush3.bf16.msra.mxu1 %v3053_v6  ;;  %v2955_v6 = vld [vmem:[%s8746_s4 + $0x210] sm:$0xff] }
 0x330   : > { %v3068_v20 = vpack.c.bf16 %v7395_v51, %v7379_v37  ;;  %5552 = vmatprep.subr.bf16.mxu1 %v3060_v48  ;;  %v5195_v48 = vcombine.low %v2939_v55, %v2947_v45  ;;  %v6427_v51 = vld [vmem:[%s8745_s3 + $0x3b8] sm:$0xff]  }
 0x331   : > { %v7402_v29 = vpop.f32.mrf.mxu0 }
 0x332   : > { %v3067_v46 = vpack.c.bf16 %v7402_v29, %v7384_v17  ;;  %3979 = vmatmul.mubr.bf16.gmra.mxu1 %v5241_v49  ;;  %v2908_v17 = vld [vmem:[%s8746_s4 + $0x98] sm:$0xff] }
 0x333   : > { %v7411_v0 = vpop.f32.mrf.mxu0  ;;  %6157 = vmatmul.mubr.msk.bf16.gmra.mxu0 %vm441_vm1, %v6409_v14  ;;  %5553 = vmatpush3.bf16.msra.mxu1 %v3052_v5  ;;  %v5148_v5 = vcombine.high %v2891_v24, %v2899_v40  ;;  %v6419_v14 = vld [vmem:[%s8745_s3 + $0x378] sm:$0xff]  }
 0x334   : > { %5554 = vmatprep.subr.bf16.mxu1 %v3059_v61  ;;  %3986 = vmatprep.mubr.bf16.mxu1 %v5258_v52  ;;  %v5212_v52 = vcombine.high %v2955_v6, %v2963_v42  ;;  %v2916_v29 = vld [vmem:[%s8746_s4 + $0xd8] sm:$0xff] }
 0x335   : > { %v7417_v36 = vpop.f32.mrf.mxu0  ;;  %6160 = vmatprep.mubr.msk.bf16.mxu0 %vm441_vm1, %v6410_v56  ;;  %v6420_v56 = vld [vmem:[%s8745_s3 + $0x380] sm:$0xff]   ;;  %v5166_v4 = vcombine.high %v2908_v17, %v2916_v29 }
 0x337   : > { %v7428_v44 = vpop.f32.mrf.mxu0  ;;  %5555 = vmatpush3.bf16.msra.mxu1 %v3051_v41 }
 0x338   : > { %5556 = vmatprep.subr.bf16.mxu1 %v3058_v39  ;;  %v2971_v39 = vld [vmem:[%s8746_s4 + $0x290] sm:$0xff]  ;;  %v3070_v55 = vpack.c.bf16 %v7428_v44, %v7411_v0 }
 0x339   : > { %v7436_v18 = vpop.f32.mrf.mxu0 }
 0x33a   : > { %3987 = vmatmul.mubr.bf16.gmra.mxu1 %v5257_v47  ;;  %v2979_v47 = vld [vmem:[%s8746_s4 + $0x2d0] sm:$0xff]  ;;  %v3069_v0 = vpack.c.bf16 %v7436_v18, %v7417_v36  ;;  %v6425_v36 = vld [vmem:[%s8745_s3 + $0x3a8] sm:$0xff]  }
 0x33b   : > { %v7443_v3 = vpop.f32.mrf.mxu0  ;;  %6161 = vmatmul.mubr.msk.bf16.gmra.mxu0 %vm441_vm1, %v6411_v54  ;;  %5557 = vmatpush3.bf16.msra.mxu1 %v3050_v25  ;;  %v6414_v25 = vld [vmem:[%s8745_s3 + $0x350] sm:$0xff]   ;;  %v5211_v54 = vcombine.low %v2955_v6, %v2963_v42  ;;  %v5228_v30 = vcombine.high %v2971_v39, %v2979_v47 }
 0x33c   : > { %5558 = vmatprep.subr.bf16.mxu1 %v3057_v31  ;;  %4027 = vmatprep.mubr.bf16.mxu1 %v5148_v5  ;;  %v3011_v6 = vld [vmem:[%s8746_s4 + $0x3d0] sm:$0xff] }
 0x33d   : > { %v7455_v41 = vpop.f32.mrf.mxu0  ;;  %6164 = vmatprep.mubr.msk.bf16.mxu0 %vm441_vm1, %v6412_v11  ;;  %v6421_v11 = vld [vmem:[%s8745_s3 + $0x388] sm:$0xff]  }
 0x33f   : > { %v7458_v59 = vpop.f32.mrf.mxu0  ;;  %5559 = vmatpush3.bf16.msra.mxu1 %v3049_v43 }
 0x340   : > { %v3072_v58 = vpack.c.bf16 %v7458_v59, %v7443_v3  ;;  %v2987_v3 = vld [vmem:[%s8746_s4 + $0x310] sm:$0xff] }
 0x341   : > { %v7469_v13 = vpop.f32.mrf.mxu0  ;;  %v2995_v59 = vld [vmem:[%s8746_s4 + $0x350] sm:$0xff] }
 0x342   : > { %4028 = vmatmul.mubr.bf16.vlgmr.msra.gmra.mxu1 %v5147_v15  ;;  %v3071_v1 = vpack.c.bf16 %v7469_v13, %v7455_v41  ;;  %v6423_v41 = vld [vmem:[%s8745_s3 + $0x398] sm:$0xff]  }
 0x343   : > { %v7471_v21 = vpop.f32.mrf.mxu0  ;;  %6165 = vmatmul.mubr.msk.bf16.gmra.mxu0 %vm441_vm1, %v6413_v63  ;;  %4035 = vmatprep.mubr.bf16.mxu1 %v5164_v50  ;;  %v6422_v63 = vld [vmem:[%s8745_s3 + $0x390] sm:$0xff]  }
 0x344   : > { %6168 = vmatprep.mubr.msk.bf16.mxu0 %vm441_vm1, %v6414_v25 }
 0x345   : > { %v7481_v43 = vpop.f32.mrf.mxu0 }
 0x347   : > { %v7483_v28 = vpop.f32.mrf.mxu0 }
 0x349   : > { %v7491_v53 = vpop.f32.mrf.mxu0 }
 0x34a   : > { %4036 = vmatmul.mubr.bf16.gmra.mxu1 %v5163_v22 }
 0x34b   : > { %v7493_v57 = vpop.f32.mrf.mxu0  ;;  %6169 = vmatmul.mubr.msk.bf16.gmra.mxu0 %vm441_vm1, %v6415_v19  ;;  %4043 = vmatprep.mubr.bf16.mxu1 %v5180_v26  ;;  %v5227_v19 = vcombine.low %v2971_v39, %v2979_v47  ;;  %v6428_v47 = vld [vmem:[%s8745_s3 + $0x3c0] sm:$0xff]  }
 0x34c   : > { %6172 = vmatprep.mubr.msk.bf16.mxu0 %vm441_vm1, %v6416_v2  ;;  %v5244_v2 = vcombine.high %v2987_v3, %v2995_v59 }
 0x34d   : > { %v7503_v35 = vpop.f32.mrf.mxu0 }
 0x34f   : > { %v7505_v7 = vpop.f32.mrf.mxu0 }
 0x350   : > { %v3076_v42 = vpack.c.bf16 %v7505_v7, %v7493_v57 }
 0x351   : > { %v7513_v33 = vpop.f32.mrf.mxu0 }
 0x352   : > { %4044 = vmatmul.mubr.bf16.gmra.mxu1 %v5179_v32  ;;  %v6424_v32 = vld [vmem:[%s8745_s3 + $0x3a0] sm:$0xff]   ;;  %v3075_v57 = vpack.c.bf16 %v7513_v33, %v7503_v35  ;;  %v2892_v35 = vld [vmem:[%s8746_s4 + $0x18] sm:$0xff] }
 0x353   : > { %v6078_v10 = vpop.f32.mrf.mxu0  ;;  %6173 = vmatmul.mubr.msk.bf16.gmra.mxu0 %vm441_vm1, %v6417_v16  ;;  %4051 = vmatprep.mubr.bf16.mxu1 %v5196_v9  ;;  %v2900_v33 = vld [vmem:[%s8746_s4 + $0x58] sm:$0xff] }
 0x354   : > { %6176 = vmatprep.mubr.msk.bf16.mxu0 %vm441_vm1, %v6418_v60 }
 0x355   : > { %v2346_v27 = vpop.f32.mrf.mxu0 }
 0x357   : > { %v6079_v49 = vpop.f32.mrf.mxu0 }
 0x358   : > { %v3078_v22 = vpack.c.bf16 %v6079_v49, %v6078_v10  ;;  %v3003_v10 = vld [vmem:[%s8746_s4 + $0x390] sm:$0xff] }
 0x359   : > { %v2349_v61 = vpop.f32.mrf.mxu0  ;;  %v5260_v49 = vcombine.high %v3003_v10, %v3011_v6 }
 0x35a   : > { %4052 = vmatmul.mubr.bf16.gmra.mxu1 %v5195_v48  ;;  %v3077_v16 = vpack.c.bf16 %v2349_v61, %v2346_v27  ;;  %v5243_v27 = vcombine.low %v2987_v3, %v2995_v59  ;;  %v6432_v59 = vld [vmem:[%s8745_s3 + $0x3e0] sm:$0xff]  }
 0x35b   : > { %v6082_v24 = vpop.f32.mrf.mxu0  ;;  %6177 = vmatmul.mubr.msk.bf16.gmra.mxu0 %vm441_vm1, %v6419_v14  ;;  %4059 = vmatprep.mubr.bf16.mxu1 %v5212_v52  ;;  %v6426_v52 = vld [vmem:[%s8745_s3 + $0x3b0] sm:$0xff]  }
 0x35c   : > { %6180 = vmatprep.mubr.msk.bf16.mxu0 %vm441_vm1, %v6420_v56 }
 0x35d   : > { %v2362_v40 = vpop.f32.mrf.mxu0 }
 0x35f   : > { %v6083_v5 = vpop.f32.mrf.mxu0 }
 0x360   : > { %v3080_v31 = vpack.c.bf16 %v6083_v5, %v6082_v24  ;;  %v3074_v24 = vpack.c.bf16 %v7483_v28, %v7471_v21  ;;  %v3073_v21 = vpack.c.bf16 %v7491_v53, %v7481_v43  ;;  %v5149_v43 = vcombine.low %v2892_v35, %v2900_v33 }
 0x361   : > { %v2365_v15 = vpop.f32.mrf.mxu0 }
 0x362   : > { %v3079_v50 = vpack.c.bf16 %v2365_v15, %v2362_v40  ;;  %4060 = vmatmul.mubr.bf16.gmra.mxu1 %v5211_v54  ;;  %5608 = vmatprep.subr.bf16.mxu1 %v3080_v31  ;;  %v5259_v40 = vcombine.low %v3003_v10, %v3011_v6  ;;  %v5165_v15 = vcombine.low %v2908_v17, %v2916_v29 }
 0x363   : > { %v7545_v25 = vpop.f32.mrf.mxu0  ;;  %6181 = vmatmul.mubr.msk.bf16.gmra.mxu0 %vm441_vm1, %v6421_v11  ;;  %5609 = vmatpush3.bf16.msra.mxu1 %v3072_v58 }
 0x364   : > { %5610 = vmatprep.subr.bf16.mxu1 %v3079_v50  ;;  %4067 = vmatprep.mubr.bf16.mxu1 %v5228_v30  ;;  %v6431_v50 = vld [vmem:[%s8745_s3 + $0x3d8] sm:$0xff]  }
 0x365   : > { %v7550_v38 = vpop.f32.mrf.mxu0  ;;  %6184 = vmatprep.mubr.msk.bf16.mxu0 %vm441_vm1, %v6422_v63 }
 0x367   : > { %v7559_v26 = vpop.f32.mrf.mxu0  ;;  %5611 = vmatpush3.bf16.msra.mxu1 %v3071_v1 }
 0x368   : > { %v3082_v13 = vpack.c.bf16 %v7559_v26, %v7545_v25  ;;  %5612 = vmatprep.subr.bf16.mxu1 %v3078_v22 }
 0x369   : > { %v7568_v45 = vpop.f32.mrf.mxu0 }
 0x36a   : > { %v3081_v9 = vpack.c.bf16 %v7568_v45, %v7550_v38  ;;  %4068 = vmatmul.mubr.bf16.gmra.mxu1 %v5227_v19  ;;  %v2925_v38 = vld [vmem:[%s8746_s4 + $0x120] sm:$0xff] }
 0x36b   : > { %v7575_v60 = vpop.f32.mrf.mxu0  ;;  %6185 = vmatmul.mubr.msk.bf16.gmra.mxu0 %vm441_vm1, %v6423_v41  ;;  %5613 = vmatpush3.bf16.msra.mxu1 %v3070_v55  ;;  %v2933_v45 = vld [vmem:[%s8746_s4 + $0x160] sm:$0xff] }
 0x36c   : > { %5614 = vmatprep.subr.bf16.mxu1 %v3077_v16  ;;  %4075 = vmatprep.mubr.bf16.mxu1 %v5244_v2  ;;  %v2948_v16 = vld [vmem:[%s8746_s4 + $0x1d8] sm:$0xff] }
 0x36d   : > { %v7580_v44 = vpop.f32.mrf.mxu0  ;;  %6188 = vmatprep.mubr.msk.bf16.mxu0 %vm441_vm1, %v6424_v32  ;;  %v2940_v32 = vld [vmem:[%s8746_s4 + $0x198] sm:$0xff] }
 0x36f   : > { %v7591_v48 = vpop.f32.mrf.mxu0  ;;  %5615 = vmatpush3.bf16.msra.mxu1 %v3069_v0 }
 0x370   : > { %v3084_v18 = vpack.c.bf16 %v7591_v48, %v7575_v60  ;;  %5616 = vmatprep.subr.bf16.mxu1 %v3076_v42 }
 0x371   : > { %v7598_v14 = vpop.f32.mrf.mxu0 }
 0x372   : > { %v3083_v7 = vpack.c.bf16 %v7598_v14, %v7580_v44  ;;  %4076 = vmatmul.mubr.bf16.gmra.mxu1 %v5243_v27  ;;  %v2909_v14 = vld [vmem:[%s8746_s4 + $0xa0] sm:$0xff] }
 0x373   : > { %v7607_v56 = vpop.f32.mrf.mxu0  ;;  %6189 = vmatmul.mubr.msk.bf16.gmra.mxu0 %vm441_vm1, %v6425_v36  ;;  %5617 = vmatpush3.bf16.msra.mxu1 %v3068_v20  ;;  %v5150_v20 = vcombine.high %v2892_v35, %v2900_v33  ;;  %v6433_v36 = vld [vmem:[%s8745_s3 + $0x3e8] sm:$0xff]  }
 0x374   : > { %5618 = vmatprep.subr.bf16.mxu1 %v3075_v57  ;;  %4083 = vmatprep.mubr.bf16.mxu1 %v5260_v49  ;;  %v5198_v49 = vcombine.high %v2940_v32, %v2948_v16  ;;  %v6434_v57 = vld [vmem:[%s8745_s3 + $0x3f0] sm:$0xff]  }
 0x375   : > { %v7613_v61 = vpop.f32.mrf.mxu0  ;;  %6192 = vmatprep.mubr.msk.bf16.mxu0 %vm441_vm1, %v6426_v52 }
 0x377   : > { %v7624_v37 = vpop.f32.mrf.mxu0  ;;  %5619 = vmatpush3.bf16.msra.mxu1 %v3067_v46 }
 0x378   : > { %5620 = vmatprep.subr.bf16.mxu1 %v3074_v24 }
 0x379   : > { %v7632_v39 = vpop.f32.mrf.mxu0 }
 0x37a   : > { %4084 = vmatmul.mubr.bf16.gmra.mxu1 %v5259_v40 }
 0x37b   : > { %v7639_v28 = vpop.f32.mrf.mxu0  ;;  %6193 = vmatmul.mubr.msk.bf16.gmra.mxu0 %vm441_vm1, %v6427_v51  ;;  %5621 = vmatpush3.bf16.msra.mxu1 %v3066_v12  ;;  %v6430_v12 = vld [vmem:[%s8745_s3 + $0x3d0] sm:$0xff]  }
 0x37c   : > { %5622 = vmatprep.subr.bf16.mxu1 %v3073_v21  ;;  %4124 = vmatprep.mubr.bf16.mxu1 %v5150_v20  ;;  %v2956_v20 = vld [vmem:[%s8746_s4 + $0x218] sm:$0xff] }
 0x37d   : > { %v7651_v46 = vpop.f32.mrf.mxu0  ;;  %6196 = vmatprep.mubr.msk.bf16.mxu0 %vm441_vm1, %v6428_v47  ;;  %v2964_v47 = vld [vmem:[%s8746_s4 + $0x258] sm:$0xff] }
 0x37f   : > { %v7654_v53 = vpop.f32.mrf.mxu0  ;;  %5623 = vmatpush3.bf16.msra.mxu1 %v3065_v34  ;;  %v2932_v34 = vld [vmem:[%s8746_s4 + $0x158] sm:$0xff] }
 0x380   : > { %v5182_v1 = vcombine.high %v2924_v23, %v2932_v34  ;;  %v5181_v42 = vcombine.low %v2924_v23, %v2932_v34 }
 0x381   : > { %v7665_v54 = vpop.f32.mrf.mxu0 }
 0x382   : > { %v5432_v5 = vpop.f32.mrf.mxu1  ;;  %4125 = vmatmul.mubr.bf16.vlgmr.msra.gmra.mxu1 %v5149_v43  ;;  %v5197_v43 = vcombine.low %v2940_v32, %v2948_v16 }
 0x383   : > { %v7667_v11 = vpop.f32.mrf.mxu0  ;;  %6197 = vmatmul.mubr.msk.bf16.gmra.mxu0 %vm441_vm1, %v6429_v62  ;;  %4132 = vmatprep.mubr.bf16.mxu1 %v5166_v4  ;;  %v6435_v4 = vld [vmem:[%s8745_s3 + $0x3f8] sm:$0xff]  }
 0x384   : > { %v5433_v8 = vpop.f32.mrf.mxu1  ;;  %6200 = vmatprep.mubr.msk.bf16.mxu0 %vm441_vm1, %v6430_v12  ;;  %v5214_v12 = vcombine.high %v2956_v20, %v2964_v47 }
 0x385   : > { %v7677_v31 = vadd.f32 %v5433_v8, %v5432_v5  ;;  %v7679_v30 = vpop.f32.mrf.mxu0 }
 0x386   : > { %v5435_v58 = vpop.f32.mrf.mxu1 }
 0x387   : > { %v7681_v63 = vpop.f32.mrf.mxu0 }
 0x388   : > { %v5436_v3 = vpop.f32.mrf.mxu1 }
 0x389   : > { %v7689_v22 = vadd.f32 %v5436_v3, %v5435_v58  ;;  %v7691_v19 = vpop.f32.mrf.mxu0 }
 0x38a   : > { %v5438_v41 = vpop.f32.mrf.mxu1  ;;  %4133 = vmatmul.mubr.bf16.gmra.mxu1 %v5165_v15 }
 0x38b   : > { %v7693_v2 = vpop.f32.mrf.mxu0  ;;  %6201 = vmatmul.mubr.msk.bf16.gmra.mxu0 %vm441_vm1, %v6431_v50  ;;  %4140 = vmatprep.mubr.bf16.mxu1 %v5182_v1  ;;  %v2972_v50 = vld [vmem:[%s8746_s4 + $0x298] sm:$0xff] }
 0x38c   : > { %v5439_v55 = vpop.f32.mrf.mxu1  ;;  %6204 = vmatprep.mubr.msk.bf16.mxu0 %vm441_vm1, %v6432_v59  ;;  %v2980_v1 = vld [vmem:[%s8746_s4 + $0x2d8] sm:$0xff] }
 0x38d   : > { %v7703_v0 = vadd.f32 %v5439_v55, %v5438_v41  ;;  %v7705_v10 = vpop.f32.mrf.mxu0  ;;  %v5213_v55 = vcombine.low %v2956_v20, %v2964_v47  ;;  %v5230_v16 = vcombine.high %v2972_v50, %v2980_v1  ;;  %v2988_v20 = vld [vmem:[%s8746_s4 + $0x318] sm:$0xff] }
 0x38e   : > { %v5441_v6 = vpop.f32.mrf.mxu1 }
 0x38f   : > { %v7707_v27 = vpop.f32.mrf.mxu0 }
 0x390   : > { %v5442_v52 = vpop.f32.mrf.mxu1 }
 0x391   : > { %v7715_v35 = vadd.f32 %v5442_v52, %v5441_v6  ;;  %v7717_v33 = vpop.f32.mrf.mxu0 }
 0x392   : > { %v5444_v24 = vpop.f32.mrf.mxu1  ;;  %4141 = vmatmul.mubr.bf16.gmra.mxu1 %v5181_v42 }
 0x393   : > { %v6110_v40 = vpop.f32.mrf.mxu0  ;;  %6205 = vmatmul.mubr.msk.bf16.gmra.mxu0 %vm441_vm1, %v6433_v36  ;;  %4148 = vmatprep.mubr.bf16.mxu1 %v5198_v49  ;;  %v3088_v36 = vpack.c.bf16 %v7654_v53, %v7639_v28  ;;  %v2996_v28 = vld [vmem:[%s8746_s4 + $0x358] sm:$0xff]  ;;  %v3087_v53 = vpack.c.bf16 %v7665_v54, %v7651_v46 }
 0x394   : > { %v5445_v51 = vpop.f32.mrf.mxu1  ;;  %6208 = vmatprep.mubr.msk.bf16.mxu0 %vm441_vm1, %v6434_v57 }
 0x395   : > { %v7727_v21 = vadd.f32 %v5445_v51, %v5444_v24  ;;  %v2474_v17 = vpop.f32.mrf.mxu0 }
 0x396   : > { %v5447_v29 = vpop.f32.mrf.mxu1 }
 0x397   : > { %v6111_v62 = vpop.f32.mrf.mxu0 }
 0x398   : > { %v5448_v5 = vpop.f32.mrf.mxu1 }
 0x399   : > { %v7732_v8 = vadd.f32 %v5448_v5, %v5447_v29  ;;  %v2477_v23 = vpop.f32.mrf.mxu0  ;;  %v5229_v5 = vcombine.low %v2972_v50, %v2980_v1 }
 0x39a   : > { %v5450_v34 = vpop.f32.mrf.mxu1  ;;  %4149 = vmatmul.mubr.bf16.gmra.mxu1 %v5197_v43 }
 0x39b   : > { %v6114_v58 = vpop.f32.mrf.mxu0  ;;  %6209 = vmatmul.mubr.msk.bf16.gmra.mxu0 %vm441_vm1, %v6435_v4  ;;  %4156 = vmatprep.mubr.bf16.mxu1 %v5214_v12  ;;  %v3094_v4 = vpack.c.bf16 %v6111_v62, %v6110_v40 }
 0x39c   : > { %v5451_v15 = vpop.f32.mrf.mxu1 }
 0x39d   : > { %v7741_v3 = vadd.f32 %v5451_v15, %v5450_v34  ;;  %v2490_v59 = vpop.f32.mrf.mxu0 }
 0x39e   : > { %v5453_v41 = vpop.f32.mrf.mxu1 }
 0x39f   : > { %v6115_v32 = vpop.f32.mrf.mxu0 }
 0x3a0   : > { %v3096_v6 = vpack.c.bf16 %v6115_v32, %v6114_v58  ;;  %v5454_v42 = vpop.f32.mrf.mxu1  ;;  %v5246_v58 = vcombine.high %v2988_v20, %v2996_v28 }
 0x3a1   : > { %v7745_v49 = vadd.f32 %v5454_v42, %v5453_v41  ;;  %v2493_v52 = vpop.f32.mrf.mxu0  ;;  %v3086_v41 = vpack.c.bf16 %v7624_v37, %v7607_v56  ;;  %v3004_v56 = vld [vmem:[%s8746_s4 + $0x398] sm:$0xff]  ;;  %v5245_v42 = vcombine.low %v2988_v20, %v2996_v28 }
 0x3a2   : > { %v3095_v57 = vpack.c.bf16 %v2493_v52, %v2490_v59  ;;  %v5456_v24 = vpop.f32.mrf.mxu1  ;;  %4157 = vmatmul.mubr.bf16.gmra.mxu1 %v5213_v55  ;;  %5672 = vmatprep.subr.bf16.mxu1 %v3096_v6  ;;  %v3093_v55 = vpack.c.bf16 %v2477_v23, %v2474_v17  ;;  %v3012_v37 = vld [vmem:[%s8746_s4 + $0x3d8] sm:$0xff]  ;;  %v3085_v17 = vpack.c.bf16 %v7632_v39, %v7613_v61 }
 0x3a3   : > { %v7747_v51 = vpop.f32.mrf.mxu0  ;;  %5673 = vmatpush3.bf16.msra.mxu1 %v3088_v36  ;;  %4164 = vmatprep.mubr.bf16.mxu1 %v5230_v16  ;;  %v3092_v16 = vpack.c.bf16 %v7707_v27, %v7693_v2  ;;  %v5262_v52 = vcombine.high %v3004_v56, %v3012_v37  ;;  %v3091_v39 = vpack.c.bf16 %v7717_v33, %v7705_v10  ;;  %v2901_v10 = vld [vmem:[%s8746_s4 + $0x60] sm:$0xff] }
 0x3a4   : > { %v5457_v29 = vpop.f32.mrf.mxu1  ;;  %5674 = vmatprep.subr.bf16.mxu1 %v3095_v57  ;;  %v5261_v48 = vcombine.low %v3004_v56, %v3012_v37 }
 0x3a5   : > { %v7757_v47 = vadd.f32 %v5457_v29, %v5456_v24  ;;  %v7759_v43 = vpop.f32.mrf.mxu0 }
 0x3a6   : > { %v5459_v12 = vpop.f32.mrf.mxu1 }
 0x3a7   : > { %v7761_v34 = vpop.f32.mrf.mxu0  ;;  %5675 = vmatpush3.bf16.msra.mxu1 %v3087_v53  ;;  %v2893_v53 = vld [vmem:[%s8746_s4 + $0x20] sm:$0xff] }
 0x3a8   : > { %v5460_v59 = vpop.f32.mrf.mxu1  ;;  %5676 = vmatprep.subr.bf16.mxu1 %v3094_v4 }
 0x3a9   : > { %v7767_v46 = vadd.f32 %v5460_v59, %v5459_v12  ;;  %v7769_v54 = vpop.f32.mrf.mxu0  ;;  %v3090_v12 = vpack.c.bf16 %v7681_v63, %v7667_v11 }
 0x3aa   : > { %v5462_v62 = vpop.f32.mrf.mxu1  ;;  %4165 = vmatmul.mubr.bf16.gmra.mxu1 %v5229_v5  ;;  %v5152_v5 = vcombine.high %v2893_v53, %v2901_v10 }
 0x3ab   : > { %v7773_v50 = vpop.f32.mrf.mxu0  ;;  %5677 = vmatpush3.bf16.msra.mxu1 %v3086_v41  ;;  %4172 = vmatprep.mubr.bf16.mxu1 %v5246_v58 }
 0x3ac   : > { %v5463_v1 = vpop.f32.mrf.mxu1  ;;  %5678 = vmatprep.subr.bf16.mxu1 %v3093_v55  ;;  %v3089_v55 = vpack.c.bf16 %v7691_v19, %v7679_v30 }
 0x3ad   : > { %v7783_v23 = vadd.f32 %v5463_v1, %v5462_v62  ;;  %v7785_v32 = vpop.f32.mrf.mxu0  ;;  %v5151_v1 = vcombine.low %v2893_v53, %v2901_v10 }
 0x3ae   : > { %v5465_v6 = vpop.f32.mrf.mxu1 }
 0x3af   : > { %v7789_v36 = vpop.f32.mrf.mxu0  ;;  %5679 = vmatpush3.bf16.msra.mxu1 %v3085_v17  ;;  %v3145_v17 = vld [vmem:[%s8747_s5] sm:$0xff] }
 0x3b0   : > { %v5466_v24 = vpop.f32.mrf.mxu1  ;;  %5680 = vmatprep.subr.bf16.mxu1 %v3092_v16 }
 0x3b1   : > { %v7793_v29 = vadd.f32 %v5466_v24, %v5465_v6  ;;  %v7795_v61 = vpop.f32.mrf.mxu0 }
 0x3b2   : > { %v5468_v27 = vpop.f32.mrf.mxu1  ;;  %4173 = vmatmul.mubr.bf16.gmra.mxu1 %v5245_v42 }
 0x3b3   : > { %v7801_v20 = vpop.f32.mrf.mxu0  ;;  %5681 = vmatpush3.bf16.msra.mxu1 %v3084_v18  ;;  %4180 = vmatprep.mubr.bf16.mxu1 %v5262_v52 }
 0x3b4   : > { %v5469_v28 = vpop.f32.mrf.mxu1  ;;  %5682 = vmatprep.subr.bf16.mxu1 %v3091_v39  ;;  %v3146_v39 = vld [vmem:[%s8747_s5 + $0x8] sm:$0xff] }
 0x3b5   : > { %v7812_v33 = vadd.f32 %v5469_v28, %v5468_v27  ;;  %v7814_v4 = vpop.f32.mrf.mxu0 }
 0x3b6   : > { %v5471_v60 = vpop.f32.mrf.mxu1 }
 0x3b7   : > { %v7818_v18 = vpop.f32.mrf.mxu0  ;;  %5683 = vmatpush3.bf16.msra.mxu1 %v3083_v7  ;;  %v2917_v7 = vld [vmem:[%s8746_s4 + $0xe0] sm:$0xff] }
 0x3b8   : > { %v5472_v58 = vpop.f32.mrf.mxu1  ;;  %5684 = vmatprep.subr.bf16.mxu1 %v3090_v12  ;;  %v5168_v25 = vcombine.high %v2909_v14, %v2917_v7  ;;  %v5167_v28 = vcombine.low %v2909_v14, %v2917_v7  ;;  %v5184_v12 = vcombine.high %v2925_v38, %v2933_v45  ;;  %v2941_v7 = vld [vmem:[%s8746_s4 + $0x1a0] sm:$0xff] }
 0x3b9   : > { %v7823_v59 = vadd.f32 %v5472_v58, %v5471_v60  ;;  %v7825_v41 = vpop.f32.mrf.mxu0 }
 0x3ba   : > { %v5474_v62 = vpop.f32.mrf.mxu1  ;;  %4181 = vmatmul.mubr.bf16.gmra.mxu1 %v5261_v48  ;;  %v3839_v48 = vadd.f32 %v7689_v22, %v3146_v39  ;;  %v2949_v22 = vld [vmem:[%s8746_s4 + $0x1e0] sm:$0xff] }
 0x3bb   : > { %v7829_v11 = vpop.f32.mrf.mxu0  ;;  %5685 = vmatpush3.bf16.msra.mxu1 %v3082_v13  ;;  %4221 = vmatprep.mubr.bf16.mxu1 %v5152_v5 }
 0x3bc   : > { %v5475_v44 = vpop.f32.mrf.mxu1  ;;  %5686 = vmatprep.subr.bf16.mxu1 %v3089_v55 }
 0x3bd   : > { %v7840_v30 = vadd.f32 %v5475_v44, %v5474_v62  ;;  %v7842_v63 = vpop.f32.mrf.mxu0 }
 0x3be   : > { %v5477_v19 = vpop.f32.mrf.mxu1 }
 0x3bf   : > { %v7844_v56 = vpop.f32.mrf.mxu0  ;;  %5687 = vmatpush3.bf16.msra.mxu1 %v3081_v9  ;;  %v3836_v9 = vadd.f32 %v7677_v31, %v3145_v17  ;;  %v3147_v31 = vld [vmem:[%s8747_s5 + $0x10] sm:$0xff] }
 0x3c0   : > { %v5478_v26 = vpop.f32.mrf.mxu1 }
 0x3c1   : > { %v7849_v13 = vadd.f32 %v5478_v26, %v5477_v19  ;;  %v7851_v37 = vpop.f32.mrf.mxu0  ;;  %v3844_v19 = vadd.f32 %v7703_v0, %v3147_v31  ;;  %v3148_v26 = vld [vmem:[%s8747_s5 + $0x18] sm:$0xff]  ;;  %v3149_v0 = vld [vmem:[%s8747_s5 + $0x20] sm:$0xff] }
 0x3c2   : > { %v5496_v16 = vpop.f32.mrf.mxu1  ;;  %4222 = vmatmul.mubr.bf16.vlgmr.msra.gmra.mxu1 %v5151_v1  ;;  %v3852_v31 = vadd.f32 %v7727_v21, %v3149_v0  ;;  %v3151_v21 = vld [vmem:[%s8747_s5 + $0x30] sm:$0xff] }
 0x3c3   : > { %v7856_v6 = vpop.f32.mrf.mxu0  ;;  %4229 = vmatprep.mubr.bf16.mxu1 %v5168_v25 }
 0x3c4   : > { %v5497_v42 = vpop.f32.mrf.mxu1 }
 0x3c5   : > { %v5498_v52 = vadd.f32 %v5497_v42, %v5496_v16  ;;  %v7865_v24 = vpop.f32.mrf.mxu0  ;;  %v5183_v16 = vcombine.low %v2925_v38, %v2933_v45 }
 0x3c6   : > { %v5499_v27 = vpop.f32.mrf.mxu1 }
 0x3c7   : > { %v7870_v53 = vadd.f32 %v5498_v52, %v3836_v9  ;;  %v7872_v10 = vpop.f32.mrf.mxu0  ;;  %v5200_v52 = vcombine.high %v2941_v7, %v2949_v22 }
 0x3c8   : > { %v5500_v60 = vpop.f32.mrf.mxu1 }
 0x3c9   : > { %v5501_v5 = vadd.f32 %v5500_v60, %v5499_v27  ;;  %v7875_v58 = vpop.f32.mrf.mxu0  ;;  %v3847_v27 = vadd.f32 %v7715_v35, %v3148_v26  ;;  %v2965_v35 = vld [vmem:[%s8746_s4 + $0x260] sm:$0xff]  ;;  %v5199_v26 = vcombine.low %v2941_v7, %v2949_v22 }
 0x3ca   : > { %v5502_v55 = vpop.f32.mrf.mxu1  ;;  %4230 = vmatmul.mubr.bf16.gmra.mxu1 %v5167_v28  ;;  %v2973_v22 = vld [vmem:[%s8746_s4 + $0x2a0] sm:$0xff] }
 0x3cb   : > { %v7880_v62 = vadd.f32 %v5501_v5, %v3839_v48  ;;  %v7882_v44 = vpop.f32.mrf.mxu0  ;;  %4237 = vmatprep.mubr.bf16.mxu1 %v5184_v12  ;;  %v2957_v5 = vld [vmem:[%s8746_s4 + $0x220] sm:$0xff] }
 0x3cc   : > { %v5503_v14 = vpop.f32.mrf.mxu1 }
 0x3cd   : > { %v5504_v1 = vadd.f32 %v5503_v14, %v5502_v55  ;;  %v7891_v25 = vpop.f32.mrf.mxu0 }
 0x3ce   : > { %v5505_v17 = vpop.f32.mrf.mxu1 }
 0x3cf   : > { %v7896_v42 = vadd.f32 %v5504_v1, %v3844_v19  ;;  %v7898_v9 = vpop.f32.mrf.mxu0  ;;  %v3150_v19 = vld [vmem:[%s8747_s5 + $0x28] sm:$0xff] }
 0x3d0   : > { %v5506_v39 = vpop.f32.mrf.mxu1 }
 0x3d1   : > { %v5507_v28 = vadd.f32 %v5506_v39, %v5505_v17  ;;  %v7901_v12 = vpop.f32.mrf.mxu0 }
 0x3d2   : > { %v5508_v60 = vpop.f32.mrf.mxu1  ;;  %4238 = vmatmul.mubr.bf16.gmra.mxu1 %v5183_v16 }
 0x3d3   : > { %v7906_v48 = vadd.f32 %v5507_v28, %v3847_v27  ;;  %v7908_v38 = vpop.f32.mrf.mxu0  ;;  %4245 = vmatprep.mubr.bf16.mxu1 %v5200_v52  ;;  %v5216_v52 = vcombine.high %v2957_v5, %v2965_v35  ;;  %v3855_v27 = vadd.f32 %v7732_v8, %v3150_v19  ;;  %v2981_v8 = vld [vmem:[%s8746_s4 + $0x2e0] sm:$0xff] }
 0x3d4   : > { %v5509_v45 = vpop.f32.mrf.mxu1 }
 0x3d5   : > { %v5510_v55 = vadd.f32 %v5509_v45, %v5508_v60  ;;  %v7917_v14 = vpop.f32.mrf.mxu0 }
 0x3d6   : > { %v5511_v1 = vpop.f32.mrf.mxu1 }
 0x3d7   : > { %v7922_v17 = vadd.f32 %v5510_v55, %v3852_v31  ;;  %v6143_v16 = vpop.f32.mrf.mxu0  ;;  %v3860_v31 = vadd.f32 %v7741_v3, %v3151_v21 }
 0x3d8   : > { %v5512_v39 = vpop.f32.mrf.mxu1 }
 0x3d9   : > { %8751 = vst [vmem:[#allocation4_spill] sm:$0xff] %v7922_v17  ;;  %v5513_v28 = vadd.f32 %v5512_v39, %v5511_v1  ;;  %v7925_v40 = vpop.f32.mrf.mxu0  ;;  %v3152_v1 = vld [vmem:[%s8747_s5 + $0x38] sm:$0xff]  ;;  %v5215_v39 = vcombine.low %v2957_v5, %v2965_v35 }
 0x3da   : > { %v5514_v0 = vpop.f32.mrf.mxu1  ;;  %4246 = vmatmul.mubr.bf16.gmra.mxu1 %v5199_v26  ;;  %v3863_v57 = vadd.f32 %v7745_v49, %v3152_v1 }
 0x3db   : > { %v7930_v60 = vadd.f32 %v5513_v28, %v3855_v27  ;;  %v6146_v45 = vpop.f32.mrf.mxu0  ;;  %4253 = vmatprep.mubr.bf16.mxu1 %v5216_v52  ;;  %v5232_v28 = vcombine.high %v2973_v22, %v2981_v8 }
 0x3dc   : > { %v5515_v7 = vpop.f32.mrf.mxu1 }
 0x3dd   : > { %8752 = vst [vmem:[#allocation5_spill] sm:$0xff] %v7930_v60  ;;  %v5516_v55 = vadd.f32 %v5515_v7, %v5514_v0  ;;  %v2618_v19 = vpop.f32.mrf.mxu0  ;;  %v3104_v60 = vpack.c.bf16 %v7844_v56, %v7829_v11  ;;  %v3153_v0 = vld [vmem:[%s8747_s5 + $0x40] sm:$0xff] }
 0x3de   : > { %v5517_v26 = vpop.f32.mrf.mxu1  ;;  %v2997_v11 = vld [vmem:[%s8746_s4 + $0x360] sm:$0xff]  ;;  %v3868_v56 = vadd.f32 %v7757_v47, %v3153_v0 }
 0x3df   : > { %v7942_v52 = vadd.f32 %v5516_v55, %v3860_v31  ;;  %v6147_v27 = vpop.f32.mrf.mxu0  ;;  %v3110_v31 = vpack.c.bf16 %v6143_v16, %v7908_v38  ;;  %v3155_v16 = vld [vmem:[%s8747_s5 + $0x50] sm:$0xff] }
 0x3e0   : > { %v3112_v15 = vpack.c.bf16 %v6147_v27, %v6146_v45  ;;  %v5518_v2 = vpop.f32.mrf.mxu1 }
 0x3e1   : > { %v5519_v3 = vadd.f32 %v5518_v2, %v5517_v26  ;;  %v2621_v21 = vpop.f32.mrf.mxu0  ;;  %v2989_v2 = vld [vmem:[%s8746_s4 + $0x320] sm:$0xff] }
 0x3e2   : > { %v3111_v7 = vpack.c.bf16 %v2621_v21, %v2618_v19  ;;  %v5520_v17 = vpop.f32.mrf.mxu1  ;;  %4254 = vmatmul.mubr.bf16.gmra.mxu1 %v5215_v39  ;;  %5736 = vmatprep.subr.bf16.mxu1 %v3112_v15  ;;  %v3103_v15 = vpack.c.bf16 %v7851_v37, %v7842_v63  ;;  %v5231_v19 = vcombine.low %v2973_v22, %v2981_v8 }
 0x3e3   : > { %v7950_v5 = vadd.f32 %v5519_v3, %v3863_v57  ;;  %v7952_v35 = vpop.f32.mrf.mxu0  ;;  %5737 = vmatpush3.bf16.msra.mxu1 %v3104_v60  ;;  %4261 = vmatprep.mubr.bf16.mxu1 %v5232_v28  ;;  %v3154_v60 = vld [vmem:[%s8747_s5 + $0x48] sm:$0xff]  ;;  %v5248_v47 = vcombine.high %v2989_v2, %v2997_v11  ;;  %v3102_v39 = vpack.c.bf16 %v7818_v18, %v7801_v20  ;;  %v3005_v18 = vld [vmem:[%s8746_s4 + $0x3a0] sm:$0xff] }
 0x3e4   : > { %v5521_v49 = vpop.f32.mrf.mxu1  ;;  %5738 = vmatprep.subr.bf16.mxu1 %v3111_v7  ;;  %v3109_v22 = vpack.c.bf16 %v7925_v40, %v7917_v14  ;;  %v3013_v40 = vld [vmem:[%s8746_s4 + $0x3e0] sm:$0xff]  ;;  %v3876_v14 = vadd.f32 %v7783_v23, %v3155_v16  ;;  %v3101_v21 = vpack.c.bf16 %v7825_v41, %v7814_v4 }
 0x3e5   : > { %v5522_v57 = vadd.f32 %v5521_v49, %v5520_v17  ;;  %v7963_v45 = vpop.f32.mrf.mxu0  ;;  %v3871_v17 = vadd.f32 %v7767_v46, %v3154_v60  ;;  %v3156_v49 = vld [vmem:[%s8747_s5 + $0x58] sm:$0xff]  ;;  %v5264_v23 = vcombine.high %v3005_v18, %v3013_v40 }
 0x3e6   : > { %v5523_v55 = vpop.f32.mrf.mxu1 }
 0x3e7   : > { %v7969_v1 = vadd.f32 %v5522_v57, %v3868_v56  ;;  %v7971_v26 = vpop.f32.mrf.mxu0  ;;  %5739 = vmatpush3.bf16.msra.mxu1 %v3103_v15  ;;  %v3108_v56 = vpack.c.bf16 %v7898_v9, %v7882_v44  ;;  %v5247_v57 = vcombine.low %v2989_v2, %v2997_v11  ;;  %v3157_v44 = vld [vmem:[%s8747_s5 + $0x60] sm:$0xff]  ;;  %v3107_v9 = vpack.c.bf16 %v7901_v12, %v7891_v25  ;;  %v2894_v25 = vld [vmem:[%s8746_s4 + $0x28] sm:$0xff] }
 0x3e8   : > { %v5524_v37 = vpop.f32.mrf.mxu1  ;;  %5740 = vmatprep.subr.bf16.mxu1 %v3110_v31  ;;  %v2902_v12 = vld [vmem:[%s8746_s4 + $0x68] sm:$0xff] }
 0x3e9   : > { %v5525_v27 = vadd.f32 %v5524_v37, %v5523_v55  ;;  %v7978_v38 = vpop.f32.mrf.mxu0  ;;  %v3879_v55 = vadd.f32 %v7793_v29, %v3156_v49  ;;  %v8753_v29 = vpack.c.bf16 %v7789_v36, %v7773_v50  ;;  %v3158_v50 = vld [vmem:[%s8747_s5 + $0x68] sm:$0xff]  ;;  %v3106_v36 = vpack.c.bf16 %v7872_v10, %v7856_v6  ;;  %v3159_v6 = vld [vmem:[%s8747_s5 + $0x70] sm:$0xff] }
 0x3ea   : > { %v5526_v28 = vpop.f32.mrf.mxu1  ;;  %4262 = vmatmul.mubr.bf16.gmra.mxu1 %v5231_v19  ;;  %v3105_v10 = vpack.c.bf16 %v7875_v58, %v7865_v24  ;;  %v2918_v24 = vld [vmem:[%s8746_s4 + $0xe8] sm:$0xff]  ;;  %v3892_v58 = vadd.f32 %v7840_v30, %v3159_v6 }
 0x3eb   : > { %v7987_v3 = vadd.f32 %v5525_v27, %v3871_v17  ;;  %v7989_v46 = vpop.f32.mrf.mxu0  ;;  %5741 = vmatpush3.bf16.msra.mxu1 %v3102_v39  ;;  %4269 = vmatprep.mubr.bf16.mxu1 %v5248_v47  ;;  %v3884_v27 = vadd.f32 %v7812_v33, %v3157_v44  ;;  %v5154_v33 = vcombine.high %v2894_v25, %v2902_v12 }
 0x3ec   : > { %v5527_v20 = vpop.f32.mrf.mxu1  ;;  %5742 = vmatprep.subr.bf16.mxu1 %v3109_v22 }
 0x3ed   : > { %v5528_v0 = vadd.f32 %v5527_v20, %v5526_v28  ;;  %v8000_v7 = vpop.f32.mrf.mxu0  ;;  %v5263_v20 = vcombine.low %v3005_v18, %v3013_v40 }
 0x3ee   : > { %v5529_v15 = vpop.f32.mrf.mxu1 }
 0x3ef   : > { %v8007_v60 = vadd.f32 %v5528_v0, %v3876_v14  ;;  %v8009_v31 = vpop.f32.mrf.mxu0  ;;  %5743 = vmatpush3.bf16.msra.mxu1 %v3101_v21  ;;  %v8754_v0 = vpack.c.bf16 %v7795_v61, %v7785_v32  ;;  %v8755_v61 = vpack.c.bf16 %v7761_v34, %v7747_v51  ;;  %v3160_v51 = vld [vmem:[%s8747_s5 + $0x78] sm:$0xff] }
 0x3f0   : > { %v5530_v41 = vpop.f32.mrf.mxu1  ;;  %5744 = vmatprep.subr.bf16.mxu1 %v3108_v56  ;;  %v3887_v56 = vadd.f32 %v7823_v59, %v3158_v50  ;;  %v3895_v30 = vadd.f32 %v7849_v13, %v3160_v51 }
 0x3f1   : > { %v5531_v19 = vadd.f32 %v5530_v41, %v5529_v15  ;;  %v8014_v47 = vpop.f32.mrf.mxu0 }
 0x3f2   : > { %v5532_v11 = vpop.f32.mrf.mxu1  ;;  %4270 = vmatmul.mubr.bf16.gmra.mxu1 %v5247_v57 }
 0x3f3   : > { %v8023_v37 = vadd.f32 %v5531_v19, %v3879_v55  ;;  %v8025_v17 = vpop.f32.mrf.mxu0  ;;  %5745 = vmatpush3.bf16.msra.mxu1 %v8753_v29  ;;  %4277 = vmatprep.mubr.bf16.mxu1 %v5264_v23  ;;  %v2910_v23 = vld [vmem:[%s8746_s4 + $0xa8] sm:$0xff]  ;;  %v5153_v19 = vcombine.low %v2894_v25, %v2902_v12 }
 0x3f4   : > { %v5533_v39 = vpop.f32.mrf.mxu1  ;;  %5746 = vmatprep.subr.bf16.mxu1 %v3107_v9  ;;  %v5170_v29 = vcombine.high %v2910_v23, %v2918_v24 }
 0x3f5   : > { %v5534_v16 = vadd.f32 %v5533_v39, %v5532_v11  ;;  %v8037_v22 = vpop.f32.mrf.mxu0  ;;  %v8756_v11 = vpack.c.bf16 %v7769_v54, %v7759_v43  ;;  %v2926_v43 = vld [vmem:[%s8746_s4 + $0x128] sm:$0xff] }
 0x3f6   : > { %v5535_v28 = vpop.f32.mrf.mxu1  ;;  %v2934_v54 = vld [vmem:[%s8746_s4 + $0x168] sm:$0xff] }
 0x3f7   : > { %v8044_v14 = vadd.f32 %v5534_v16, %v3884_v27  ;;  %v8046_v21 = vpop.f32.mrf.mxu0  ;;  %5747 = vmatpush3.bf16.msra.mxu1 %v8754_v0  ;;  %v5169_v0 = vcombine.low %v2910_v23, %v2918_v24  ;;  %v2950_v23 = vld [vmem:[%s8746_s4 + $0x1e8] sm:$0xff] }
 0x3f8   : > { %v5536_v49 = vpop.f32.mrf.mxu1  ;;  %5748 = vmatprep.subr.bf16.mxu1 %v3106_v36 }
 0x3f9   : > { %v5537_v15 = vadd.f32 %v5536_v49, %v5535_v28  ;;  %v8052_v57 = vpop.f32.mrf.mxu0 }
 0x3fa   : > { %v5538_v18 = vpop.f32.mrf.mxu1  ;;  %4278 = vmatmul.mubr.bf16.gmra.mxu1 %v5263_v20 }
 0x3fb   : > { %v8059_v40 = vadd.f32 %v5537_v15, %v3887_v56  ;;  %v8061_v32 = vpop.f32.mrf.mxu0  ;;  %5749 = vmatpush3.bf16.msra.mxu1 %v8755_v61  ;;  %4318 = vmatprep.mubr.bf16.mxu1 %v5154_v33  ;;  %v5186_v56 = vcombine.high %v2926_v43, %v2934_v54 }
 0x3fc   : > { %v5539_v59 = vpop.f32.mrf.mxu1  ;;  %5750 = vmatprep.subr.bf16.mxu1 %v3105_v10 }
 0x3fd   : > { %v5540_v41 = vadd.f32 %v5539_v59, %v5538_v18  ;;  %v8073_v55 = vpop.f32.mrf.mxu0 }
 0x3fe   : > { %v5541_v34 = vpop.f32.mrf.mxu1 }
 0x3ff   : > { %v8078_v44 = vadd.f32 %v5540_v41, %v3892_v58  ;;  %v8080_v9 = vpop.f32.mrf.mxu0  ;;  %5751 = vmatpush3.bf16.msra.mxu1 %v8756_v11 }
 0x400   : > { %v5542_v39 = vpop.f32.mrf.mxu1  ;;  %v3120_v8 = vpack.c.bf16 %v8080_v9, %v8061_v32 }
 0x401   : > { %v5543_v27 = vadd.f32 %v5542_v39, %v5541_v34  ;;  %v8086_v16 = vpop.f32.mrf.mxu0  ;;  %v5185_v34 = vcombine.low %v2926_v43, %v2934_v54  ;;  %v2966_v43 = vld [vmem:[%s8746_s4 + $0x268] sm:$0xff] }
 0x402   : > { %v5560_v50 = vpop.f32.mrf.mxu1  ;;  %4319 = vmatmul.mubr.bf16.vlgmr.msra.gmra.mxu1 %v5153_v19  ;;  %v3119_v32 = vpack.c.bf16 %v8086_v16, %v8073_v55  ;;  %v3118_v55 = vpack.c.bf16 %v8046_v21, %v8025_v17  ;;  %v3006_v17 = vld [vmem:[%s8746_s4 + $0x3a8] sm:$0xff] }
 0x403   : > { %v8088_v36 = vadd.f32 %v5543_v27, %v3895_v30  ;;  %v8090_v25 = vpop.f32.mrf.mxu0  ;;  %4326 = vmatprep.mubr.bf16.mxu1 %v5170_v29  ;;  %v3014_v21 = vld [vmem:[%s8746_s4 + $0x3e8] sm:$0xff] }
 0x404   : > { %v5561_v12 = vpop.f32.mrf.mxu1 }
 0x405   : > { %v5562_v13 = vadd.f32 %v5561_v12, %v5560_v50  ;;  %v8098_v28 = vpop.f32.mrf.mxu0 }
 0x406   : > { %v5563_v20 = vpop.f32.mrf.mxu1 }
 0x407   : > { %v8101_v33 = vadd.f32 %v5562_v13, %v7870_v53  ;;  %v8103_v49 = vpop.f32.mrf.mxu0  ;;  %v2942_v53 = vld [vmem:[%s8746_s4 + $0x1a8] sm:$0xff] }
 0x408   : > { %v5564_v15 = vpop.f32.mrf.mxu1  ;;  %v5202_v11 = vcombine.high %v2942_v53, %v2950_v23 }
 0x409   : > { %v5565_v6 = vadd.f32 %v5564_v15, %v5563_v20  ;;  %v8105_v10 = vpop.f32.mrf.mxu0  ;;  %v8757_v15 = vld [vmem:[#allocation4_spill] sm:$0xff] }
 0x40a   : > { %v5566_v18 = vpop.f32.mrf.mxu1  ;;  %4327 = vmatmul.mubr.bf16.gmra.mxu1 %v5169_v0 }
 0x40b   : > { %v8108_v61 = vadd.f32 %v5565_v6, %v7880_v62  ;;  %v8110_v59 = vpop.f32.mrf.mxu0  ;;  %4334 = vmatprep.mubr.bf16.mxu1 %v5186_v56  ;;  %v5201_v56 = vcombine.low %v2942_v53, %v2950_v23  ;;  %v2974_v53 = vld [vmem:[%s8746_s4 + $0x2a8] sm:$0xff] }
 0x40c   : > { %v5567_v58 = vpop.f32.mrf.mxu1  ;;  %v2982_v23 = vld [vmem:[%s8746_s4 + $0x2e8] sm:$0xff] }
 0x40d   : > { %v5568_v24 = vadd.f32 %v5567_v58, %v5566_v18  ;;  %v8118_v41 = vpop.f32.mrf.mxu0 }
 0x40e   : > { %v5569_v51 = vpop.f32.mrf.mxu1 }
 0x40f   : > { %v8121_v62 = vadd.f32 %v5568_v24, %v7896_v42  ;;  %v8123_v19 = vpop.f32.mrf.mxu0  ;;  %v2958_v42 = vld [vmem:[%s8746_s4 + $0x228] sm:$0xff] }
 0x410   : > { %v5570_v29 = vpop.f32.mrf.mxu1  ;;  %v5218_v18 = vcombine.high %v2958_v42, %v2966_v43 }
 0x411   : > { %v5571_v39 = vadd.f32 %v5570_v29, %v5569_v51  ;;  %v8125_v30 = vpop.f32.mrf.mxu0 }
 0x412   : > { %v5572_v27 = vpop.f32.mrf.mxu1  ;;  %4335 = vmatmul.mubr.bf16.gmra.mxu1 %v5185_v34 }
 0x413   : > { %v8128_v50 = vadd.f32 %v5571_v39, %v7906_v48  ;;  %v6174_v12 = vpop.f32.mrf.mxu0  ;;  %4342 = vmatprep.mubr.bf16.mxu1 %v5202_v11  ;;  %v8758_v11 = vld [vmem:[#allocation5_spill] sm:$0xff] }
 0x414   : > { %v5573_v13 = vpop.f32.mrf.mxu1 }
 0x415   : > { %v5574_v54 = vadd.f32 %v5573_v13, %v5572_v27  ;;  %v8136_v20 = vpop.f32.mrf.mxu0 }
 0x416   : > { %v5575_v0 = vpop.f32.mrf.mxu1 }
 0x417   : > { %v8139_v6 = vadd.f32 %v5574_v54, %v8757_v15  ;;  %v6175_v48 = vpop.f32.mrf.mxu0  ;;  %v5217_v15 = vcombine.low %v2958_v42, %v2966_v43  ;;  %v2990_v43 = vld [vmem:[%s8746_s4 + $0x328] sm:$0xff] }
 0x418   : > { %v5576_v58 = vpop.f32.mrf.mxu1 }
 0x419   : > { %v5577_v24 = vadd.f32 %v5576_v58, %v5575_v0  ;;  %v2733_v51 = vpop.f32.mrf.mxu0 }
 0x41a   : > { %v5578_v34 = vpop.f32.mrf.mxu1  ;;  %4343 = vmatmul.mubr.bf16.gmra.mxu1 %v5201_v56 }
 0x41b   : > { %v8142_v29 = vadd.f32 %v5577_v24, %v8758_v11  ;;  %v6178_v39 = vpop.f32.mrf.mxu0  ;;  %4350 = vmatprep.mubr.bf16.mxu1 %v5218_v18  ;;  %v5234_v24 = vcombine.high %v2974_v53, %v2982_v23 }
 0x41c   : > { %v5579_v27 = vpop.f32.mrf.mxu1 }
 0x41d   : > { %8759 = vst [vmem:[#allocation4_spill] sm:$0xff] %v8142_v29  ;;  %v5580_v13 = vadd.f32 %v5579_v27, %v5578_v34  ;;  %v2746_v54 = vpop.f32.mrf.mxu0 }
 0x41e   : > { %v5581_v0 = vpop.f32.mrf.mxu1 }
 0x41f   : > { %v8151_v56 = vadd.f32 %v5580_v13, %v7942_v52  ;;  %v6179_v58 = vpop.f32.mrf.mxu0 }
 0x420   : > { %v3128_v11 = vpack.c.bf16 %v6179_v58, %v6178_v39  ;;  %v5582_v18 = vpop.f32.mrf.mxu1  ;;  %v3124_v58 = vpack.c.bf16 %v8123_v19, %v8110_v59  ;;  %v3123_v59 = vpack.c.bf16 %v8125_v30, %v8118_v41  ;;  %v2895_v41 = vld [vmem:[%s8746_s4 + $0x30] sm:$0xff] }
 0x421   : > { %v5583_v63 = vadd.f32 %v5582_v18, %v5581_v0  ;;  %v2749_v2 = vpop.f32.mrf.mxu0  ;;  %v2903_v30 = vld [vmem:[%s8746_s4 + $0x70] sm:$0xff] }
 0x422   : > { %v3127_v4 = vpack.c.bf16 %v2749_v2, %v2746_v54  ;;  %v5584_v29 = vpop.f32.mrf.mxu1  ;;  %4351 = vmatmul.mubr.bf16.gmra.mxu1 %v5217_v15  ;;  %5800 = vmatprep.subr.bf16.mxu1 %v3128_v11  ;;  %v2998_v2 = vld [vmem:[%s8746_s4 + $0x368] sm:$0xff] }
 0x423   : > { %v8156_v34 = vadd.f32 %v5583_v63, %v7950_v5  ;;  %v8158_v42 = vpop.f32.mrf.mxu0  ;;  %5801 = vmatpush3.bf16.msra.mxu1 %v3120_v8  ;;  %4358 = vmatprep.mubr.bf16.mxu1 %v5234_v24  ;;  %v3126_v63 = vpack.c.bf16 %v6175_v48, %v6174_v12  ;;  %v5233_v8 = vcombine.low %v2974_v53, %v2982_v23 }
 0x424   : > { %v5585_v52 = vpop.f32.mrf.mxu1  ;;  %5802 = vmatprep.subr.bf16.mxu1 %v3127_v4  ;;  %v5250_v13 = vcombine.high %v2990_v43, %v2998_v2  ;;  %v3125_v12 = vpack.c.bf16 %v2733_v51, %v8136_v20  ;;  %v3117_v20 = vpack.c.bf16 %v8052_v57, %v8037_v22  ;;  %v5249_v11 = vcombine.low %v2990_v43, %v2998_v2 }
 0x425   : > { %v5586_v9 = vadd.f32 %v5585_v52, %v5584_v29  ;;  %v8168_v5 = vpop.f32.mrf.mxu0 }
 0x426   : > { %v5587_v39 = vpop.f32.mrf.mxu1 }
 0x427   : > { %v8171_v27 = vadd.f32 %v5586_v9, %v7969_v1  ;;  %v8173_v4 = vpop.f32.mrf.mxu0  ;;  %5803 = vmatpush3.bf16.msra.mxu1 %v3119_v32  ;;  %v5266_v32 = vcombine.high %v3006_v17, %v3014_v21 }
 0x428   : > { %v5588_v0 = vpop.f32.mrf.mxu1  ;;  %5804 = vmatprep.subr.bf16.mxu1 %v3126_v63 }
 0x429   : > { %v5589_v16 = vadd.f32 %v5588_v0, %v5587_v39  ;;  %v8179_v29 = vpop.f32.mrf.mxu0  ;;  %v8760_v39 = vpack.c.bf16 %v8009_v31, %v7989_v46  ;;  %v3122_v0 = vpack.c.bf16 %v8103_v49, %v8090_v25  ;;  %v5265_v46 = vcombine.low %v3006_v17, %v3014_v21  ;;  %v2911_v21 = vld [vmem:[%s8746_s4 + $0xb0] sm:$0xff] }
 0x42a   : > { %v5590_v48 = vpop.f32.mrf.mxu1  ;;  %4359 = vmatmul.mubr.bf16.gmra.mxu1 %v5233_v8  ;;  %v3121_v25 = vpack.c.bf16 %v8105_v10, %v8098_v28  ;;  %v2919_v28 = vld [vmem:[%s8746_s4 + $0xf0] sm:$0xff] }
 0x42b   : > { %v8185_v53 = vadd.f32 %v5589_v16, %v7987_v3  ;;  %v8187_v23 = vpop.f32.mrf.mxu0  ;;  %5805 = vmatpush3.bf16.msra.mxu1 %v3118_v55  ;;  %4366 = vmatprep.mubr.bf16.mxu1 %v5250_v13 }
 0x42c   : > { %v5591_v15 = vpop.f32.mrf.mxu1  ;;  %5806 = vmatprep.subr.bf16.mxu1 %v3125_v12  ;;  %v8761_v12 = vpack.c.bf16 %v8014_v47, %v8000_v7  ;;  %v8762_v7 = vpack.c.bf16 %v7971_v26, %v7952_v35  ;;  %v8763_v26 = vpack.c.bf16 %v7978_v38, %v7963_v45  ;;  %v2935_v45 = vld [vmem:[%s8746_s4 + $0x170] sm:$0xff] }
 0x42d   : > { %v5592_v51 = vadd.f32 %v5591_v15, %v5590_v48  ;;  %v8197_v3 = vpop.f32.mrf.mxu0  ;;  %v5156_v48 = vcombine.high %v2895_v41, %v2903_v30 }
 0x42e   : > { %v5593_v24 = vpop.f32.mrf.mxu1 }
 0x42f   : > { %v8202_v18 = vadd.f32 %v5592_v51, %v8007_v60  ;;  %v8204_v52 = vpop.f32.mrf.mxu0  ;;  %5807 = vmatpush3.bf16.msra.mxu1 %v3117_v20 }
 0x430   : > { %v5594_v63 = vpop.f32.mrf.mxu1  ;;  %5808 = vmatprep.subr.bf16.mxu1 %v3124_v58 }
 0x431   : > { %v5595_v22 = vadd.f32 %v5594_v63, %v5593_v24  ;;  %v8208_v57 = vpop.f32.mrf.mxu0  ;;  %v5155_v24 = vcombine.low %v2895_v41, %v2903_v30  ;;  %v2927_v41 = vld [vmem:[%s8746_s4 + $0x130] sm:$0xff] }
 0x432   : > { %v5596_v60 = vpop.f32.mrf.mxu1  ;;  %4367 = vmatmul.mubr.bf16.gmra.mxu1 %v5249_v11 }
 0x433   : > { %v8215_v43 = vadd.f32 %v5595_v22, %v8023_v37  ;;  %v8217_v2 = vpop.f32.mrf.mxu0  ;;  %5809 = vmatpush3.bf16.msra.mxu1 %v8760_v39  ;;  %4374 = vmatprep.mubr.bf16.mxu1 %v5266_v32  ;;  %v5172_v32 = vcombine.high %v2911_v21, %v2919_v28 }
 0x434   : > { %v5597_v8 = vpop.f32.mrf.mxu1  ;;  %5810 = vmatprep.subr.bf16.mxu1 %v3123_v59 }
 0x435   : > { %v5598_v13 = vadd.f32 %v5597_v8, %v5596_v60  ;;  %v8228_v37 = vpop.f32.mrf.mxu0 }
 0x436   : > { %v5599_v55 = vpop.f32.mrf.mxu1 }
 0x437   : > { %v8233_v31 = vadd.f32 %v5598_v13, %v8044_v14  ;;  %v8235_v16 = vpop.f32.mrf.mxu0  ;;  %5811 = vmatpush3.bf16.msra.mxu1 %v8761_v12 }
 0x438   : > { %v5600_v15 = vpop.f32.mrf.mxu1  ;;  %5812 = vmatprep.subr.bf16.mxu1 %v3122_v0  ;;  %v5171_v0 = vcombine.low %v2911_v21, %v2919_v28 }
 0x439   : > { %v5601_v20 = vadd.f32 %v5600_v15, %v5599_v55  ;;  %v8240_v51 = vpop.f32.mrf.mxu0 }
 0x43a   : > { %v5602_v49 = vpop.f32.mrf.mxu1  ;;  %4375 = vmatmul.mubr.bf16.gmra.mxu1 %v5265_v46  ;;  %v5188_v46 = vcombine.high %v2927_v41, %v2935_v45 }
 0x43b   : > { %v8245_v14 = vadd.f32 %v5601_v20, %v8059_v40  ;;  %v8247_v17 = vpop.f32.mrf.mxu0  ;;  %5813 = vmatpush3.bf16.msra.mxu1 %v8762_v7  ;;  %4415 = vmatprep.mubr.bf16.mxu1 %v5156_v48 }
 0x43c   : > { %v5603_v47 = vpop.f32.mrf.mxu1  ;;  %5814 = vmatprep.subr.bf16.mxu1 %v3121_v25 }
 0x43d   : > { %v5604_v10 = vadd.f32 %v5603_v47, %v5602_v49  ;;  %v8258_v40 = vpop.f32.mrf.mxu0  ;;  %v2951_v47 = vld [vmem:[%s8746_s4 + $0x1f0] sm:$0xff] }
 0x43e   : > { %v5605_v58 = vpop.f32.mrf.mxu1 }
 0x43f   : > { %v8261_v11 = vadd.f32 %v5604_v10, %v8078_v44  ;;  %v8263_v35 = vpop.f32.mrf.mxu0  ;;  %5815 = vmatpush3.bf16.msra.mxu1 %v8763_v26 }
 0x440   : > { %v5606_v63 = vpop.f32.mrf.mxu1 }
 0x441   : > { %v5607_v22 = vadd.f32 %v5606_v63, %v5605_v58  ;;  %v8268_v59 = vpop.f32.mrf.mxu0  ;;  %v5187_v58 = vcombine.low %v2927_v41, %v2935_v45  ;;  %v2967_v41 = vld [vmem:[%s8746_s4 + $0x270] sm:$0xff] }
 0x442   : > { %v5624_v60 = vpop.f32.mrf.mxu1  ;;  %4416 = vmatmul.mubr.bf16.vlgmr.msra.gmra.mxu1 %v5155_v24 }
 0x443   : > { %v8271_v39 = vadd.f32 %v5607_v22, %v8088_v36  ;;  %v8273_v8 = vpop.f32.mrf.mxu0  ;;  %4423 = vmatprep.mubr.bf16.mxu1 %v5172_v32 }
 0x444   : > { %v5625_v44 = vpop.f32.mrf.mxu1 }
 0x445   : > { %v5626_v38 = vadd.f32 %v5625_v44, %v5624_v60  ;;  %v8281_v30 = vpop.f32.mrf.mxu0 }
 0x446   : > { %v5627_v13 = vpop.f32.mrf.mxu1 }
 0x447   : > { %v8284_v36 = vadd.f32 %v5626_v38, %v8101_v33  ;;  %v8286_v55 = vpop.f32.mrf.mxu0  ;;  %v2943_v33 = vld [vmem:[%s8746_s4 + $0x1b0] sm:$0xff] }
 0x448   : > { %v5628_v12 = vpop.f32.mrf.mxu1  ;;  %v5204_v26 = vcombine.high %v2943_v33, %v2951_v47 }
 0x449   : > { %v5629_v48 = vadd.f32 %v5628_v12, %v5627_v13  ;;  %v8288_v15 = vpop.f32.mrf.mxu0  ;;  %v5203_v12 = vcombine.low %v2943_v33, %v2951_v47  ;;  %v2975_v33 = vld [vmem:[%s8746_s4 + $0x2b0] sm:$0xff] }
 0x44a   : > { %v5630_v20 = vpop.f32.mrf.mxu1  ;;  %4424 = vmatmul.mubr.bf16.gmra.mxu1 %v5171_v0 }
 0x44b   : > { %v8291_v25 = vadd.f32 %v5629_v48, %v8108_v61  ;;  %v8293_v49 = vpop.f32.mrf.mxu0  ;;  %4431 = vmatprep.mubr.bf16.mxu1 %v5188_v46 }
 0x44c   : > { %v5631_v7 = vpop.f32.mrf.mxu1 }
 0x44d   : > { %v5632_v21 = vadd.f32 %v5631_v7, %v5630_v20  ;;  %v8301_v28 = vpop.f32.mrf.mxu0 }
 0x44e   : > { %v5633_v10 = vpop.f32.mrf.mxu1 }
 0x44f   : > { %v8304_v61 = vadd.f32 %v5632_v21, %v8121_v62  ;;  %v8306_v24 = vpop.f32.mrf.mxu0  ;;  %v2959_v62 = vld [vmem:[%s8746_s4 + $0x230] sm:$0xff] }
 0x450   : > { %v5634_v32 = vpop.f32.mrf.mxu1  ;;  %v5220_v20 = vcombine.high %v2959_v62, %v2967_v41 }
 0x451   : > { %v5635_v63 = vadd.f32 %v5634_v32, %v5633_v10  ;;  %v8308_v22 = vpop.f32.mrf.mxu0 }
 0x452   : > { %v5636_v60 = vpop.f32.mrf.mxu1  ;;  %4432 = vmatmul.mubr.bf16.gmra.mxu1 %v5187_v58 }
 0x453   : > { %v8311_v44 = vadd.f32 %v5635_v63, %v8128_v50  ;;  %v6206_v38 = vpop.f32.mrf.mxu0  ;;  %4439 = vmatprep.mubr.bf16.mxu1 %v5204_v26  ;;  %v8764_v26 = vld [vmem:[#allocation4_spill] sm:$0xff] }
 0x454   : > { %v5637_v13 = vpop.f32.mrf.mxu1 }
 0x455   : > { %v5638_v45 = vadd.f32 %v5637_v13, %v5636_v60  ;;  %v2858_v0 = vpop.f32.mrf.mxu0 }
 0x456   : > { %v5639_v46 = vpop.f32.mrf.mxu1 }
 0x457   : > { %v8320_v48 = vadd.f32 %v5638_v45, %v8139_v6  ;;  %v6207_v50 = vpop.f32.mrf.mxu0  ;;  %v2983_v6 = vld [vmem:[%s8746_s4 + $0x2f0] sm:$0xff]  ;;  %v5219_v45 = vcombine.low %v2959_v62, %v2967_v41 }
 0x458   : > { %v5640_v7 = vpop.f32.mrf.mxu1  ;;  %v2991_v62 = vld [vmem:[%s8746_s4 + $0x330] sm:$0xff]  ;;  %v3142_v41 = vpack.c.bf16 %v6207_v50, %v6206_v38 }
 0x459   : > { %v5641_v21 = vadd.f32 %v5640_v7, %v5639_v46  ;;  %v2861_v10 = vpop.f32.mrf.mxu0  ;;  %v5236_v7 = vcombine.high %v2975_v33, %v2983_v6  ;;  %v3015_v38 = vld [vmem:[%s8746_s4 + $0x3f0] sm:$0xff] }
 0x45a   : > { %v5642_v58 = vpop.f32.mrf.mxu1  ;;  %4440 = vmatmul.mubr.bf16.gmra.mxu1 %v5203_v12 }
 0x45b   : > { %v8323_v32 = vadd.f32 %v5641_v21, %v8764_v26  ;;  %v6210_v63 = vpop.f32.mrf.mxu0  ;;  %4447 = vmatprep.mubr.bf16.mxu1 %v5220_v20  ;;  %v3136_v26 = vpack.c.bf16 %v8263_v35, %v8247_v17  ;;  %v2999_v17 = vld [vmem:[%s8746_s4 + $0x370] sm:$0xff] }
 0x45c   : > { %v5643_v1 = vpop.f32.mrf.mxu1  ;;  %v5251_v50 = vcombine.low %v2991_v62, %v2999_v17 }
 0x45d   : > { %8765 = vst [vmem:[#allocation5_spill] sm:$0xff] %v8323_v32  ;;  %v5644_v47 = vadd.f32 %v5643_v1, %v5642_v58  ;;  %v2874_v60 = vpop.f32.mrf.mxu0 }
 0x45e   : > { %v5645_v13 = vpop.f32.mrf.mxu1 }
 0x45f   : > { %v8332_v46 = vadd.f32 %v5644_v47, %v8151_v56  ;;  %v6211_v12 = vpop.f32.mrf.mxu0  ;;  %v3134_v47 = vpack.c.bf16 %v8235_v16, %v8217_v2  ;;  %v3133_v2 = vpack.c.bf16 %v8240_v51, %v8228_v37  ;;  %v8766_v51 = vpack.c.bf16 %v8204_v52, %v8187_v23 }
 0x460   : > { %v3144_v21 = vpack.c.bf16 %v6211_v12, %v6210_v63  ;;  %v5646_v20 = vpop.f32.mrf.mxu1  ;;  %v3139_v12 = vpack.c.bf16 %v8308_v22, %v8301_v28  ;;  %v2904_v28 = vld [vmem:[%s8746_s4 + $0x78] sm:$0xff]  ;;  %v8767_v52 = vpack.c.bf16 %v8208_v57, %v8197_v3 }
 0x461   : > { %v5647_v54 = vadd.f32 %v5646_v20, %v5645_v13  ;;  %v2877_v19 = vpop.f32.mrf.mxu0  ;;  %v3141_v13 = vpack.c.bf16 %v2861_v10, %v2858_v0  ;;  %v2912_v3 = vld [vmem:[%s8746_s4 + $0xb8] sm:$0xff] }
 0x462   : > { %v3143_v9 = vpack.c.bf16 %v2877_v19, %v2874_v60  ;;  %v5648_v32 = vpop.f32.mrf.mxu1  ;;  %4448 = vmatmul.mubr.bf16.gmra.mxu1 %v5219_v45  ;;  %5864 = vmatprep.subr.bf16.mxu1 %v3144_v21  ;;  %v3135_v19 = vpack.c.bf16 %v8268_v59, %v8258_v40  ;;  %v2920_v57 = vld [vmem:[%s8746_s4 + $0xf8] sm:$0xff] }
 0x463   : > { %v8337_v1 = vadd.f32 %v5647_v54, %v8156_v34  ;;  %5865 = vmatpush3.bf16.msra.mxu1 %v3136_v26  ;;  %4455 = vmatprep.mubr.bf16.mxu1 %v5236_v7  ;;  %v5235_v34 = vcombine.low %v2975_v33, %v2983_v6 }
 0x464   : > { %v5649_v56 = vpop.f32.mrf.mxu1  ;;  %5866 = vmatprep.subr.bf16.mxu1 %v3143_v9  ;;  %v5252_v9 = vcombine.high %v2991_v62, %v2999_v17  ;;  %v3137_v62 = vpack.c.bf16 %v8288_v15, %v8281_v30 }
 0x465   : > { %v5650_v35 = vadd.f32 %v5649_v56, %v5648_v32 }
 0x466   : > { %v5651_v58 = vpop.f32.mrf.mxu1 }
 0x467   : > { %v8348_v54 = vadd.f32 %v5650_v35, %v8171_v27  ;;  %5867 = vmatpush3.bf16.msra.mxu1 %v3135_v19  ;;  %v3007_v27 = vld [vmem:[%s8746_s4 + $0x3b0] sm:$0xff] }
 0x468   : > { %v5652_v63 = vpop.f32.mrf.mxu1  ;;  %5868 = vmatprep.subr.bf16.mxu1 %v3142_v41  ;;  %v5268_v32 = vcombine.high %v3007_v27, %v3015_v38  ;;  %v5267_v21 = vcombine.low %v3007_v27, %v3015_v38 }
 0x469   : > { %v5653_v60 = vadd.f32 %v5652_v63, %v5651_v58  ;;  %v2928_v63 = vld [vmem:[%s8746_s4 + $0x138] sm:$0xff] }
 0x46a   : > { %v5654_v45 = vpop.f32.mrf.mxu1  ;;  %4456 = vmatmul.mubr.bf16.gmra.mxu1 %v5235_v34 }
 0x46b   : > { %v8353_v40 = vadd.f32 %v5653_v60, %v8185_v53  ;;  %5869 = vmatpush3.bf16.msra.mxu1 %v3134_v47  ;;  %4463 = vmatprep.mubr.bf16.mxu1 %v5252_v9  ;;  %v3140_v53 = vpack.c.bf16 %v8306_v24, %v8293_v49  ;;  %v2896_v49 = vld [vmem:[%s8746_s4 + $0x38] sm:$0xff]  ;;  %v5173_v47 = vcombine.low %v2912_v3, %v2920_v57 }
 0x46c   : > { %v5655_v59 = vpop.f32.mrf.mxu1  ;;  %5870 = vmatprep.subr.bf16.mxu1 %v3141_v13  ;;  %v5158_v20 = vcombine.high %v2896_v49, %v2904_v28  ;;  %v5157_v19 = vcombine.low %v2896_v49, %v2904_v28 }
 0x46d   : > { %v5656_v16 = vadd.f32 %v5655_v59, %v5654_v45 }
 0x46e   : > { %v5657_v0 = vpop.f32.mrf.mxu1 }
 0x46f   : > { %v8366_v10 = vadd.f32 %v5656_v16, %v8202_v18  ;;  %5871 = vmatpush3.bf16.msra.mxu1 %v3133_v2  ;;  %v2944_v2 = vld [vmem:[%s8746_s4 + $0x1b8] sm:$0xff] }
 0x470   : > { %v5658_v33 = vpop.f32.mrf.mxu1  ;;  %5872 = vmatprep.subr.bf16.mxu1 %v3140_v53  ;;  %v2952_v16 = vld [vmem:[%s8746_s4 + $0x1f8] sm:$0xff] }
 0x471   : > { %v5659_v6 = vadd.f32 %v5658_v33, %v5657_v0  ;;  %v5205_v28 = vcombine.low %v2944_v2, %v2952_v16 }
 0x472   : > { %v5660_v7 = vpop.f32.mrf.mxu1  ;;  %4464 = vmatmul.mubr.bf16.gmra.mxu1 %v5251_v50 }
 0x473   : > { %v8371_v37 = vadd.f32 %v5659_v6, %v8215_v43  ;;  %5873 = vmatpush3.bf16.msra.mxu1 %v8766_v51  ;;  %4471 = vmatprep.mubr.bf16.mxu1 %v5268_v32  ;;  %v3138_v43 = vpack.c.bf16 %v8286_v55, %v8273_v8  ;;  %v5206_v32 = vcombine.high %v2944_v2, %v2952_v16  ;;  %v2960_v51 = vld [vmem:[%s8746_s4 + $0x238] sm:$0xff] }
 0x474   : > { %v5661_v18 = vpop.f32.mrf.mxu1  ;;  %5874 = vmatprep.subr.bf16.mxu1 %v3139_v12 }
 0x475   : > { %v5662_v24 = vadd.f32 %v5661_v18, %v5660_v7  ;;  %v2968_v18 = vld [vmem:[%s8746_s4 + $0x278] sm:$0xff] }
 0x476   : > { %v5663_v22 = vpop.f32.mrf.mxu1 }
 0x477   : > { %v8385_v23 = vadd.f32 %v5662_v24, %v8233_v31  ;;  %5875 = vmatpush3.bf16.msra.mxu1 %v8767_v52  ;;  %v8768_v31 = vpack.c.bf16 %v8173_v4, %v8158_v42  ;;  %v8769_v42 = vpack.c.bf16 %v8179_v29, %v8168_v5  ;;  %v5174_v4 = vcombine.high %v2912_v3, %v2920_v57  ;;  %v8770_v52 = vld [vmem:[#allocation5_spill] sm:$0xff] }
 0x478   : > { %v5664_v26 = vpop.f32.mrf.mxu1  ;;  %5876 = vmatprep.subr.bf16.mxu1 %v3138_v43  ;;  %v5222_v43 = vcombine.high %v2960_v51, %v2968_v18 }
 0x479   : > { %v5665_v56 = vadd.f32 %v5664_v26, %v5663_v22 }
 0x47a   : > { %v5666_v17 = vpop.f32.mrf.mxu1  ;;  %4472 = vmatmul.mubr.bf16.gmra.mxu1 %v5267_v21 }
 0x47b   : > { %v8393_v8 = vadd.f32 %v5665_v56, %v8245_v14  ;;  %5877 = vmatpush3.bf16.msra.mxu1 %v8768_v31  ;;  %4512 = vmatprep.mubr.bf16.mxu1 %v5158_v20  ;;  %v2976_v56 = vld [vmem:[%s8746_s4 + $0x2b8] sm:$0xff]  ;;  %v5221_v31 = vcombine.low %v2960_v51, %v2968_v18 }
 0x47c   : > { %v5667_v55 = vpop.f32.mrf.mxu1  ;;  %5878 = vmatprep.subr.bf16.mxu1 %v3137_v62  ;;  %v2984_v62 = vld [vmem:[%s8746_s4 + $0x2f8] sm:$0xff] }
 0x47d   : > { %v5668_v30 = vadd.f32 %v5667_v55, %v5666_v17  ;;  %v5238_v3 = vcombine.high %v2976_v56, %v2984_v62 }
 0x47e   : > { %v5669_v15 = vpop.f32.mrf.mxu1 }
 0x47f   : > { %v8405_v14 = vadd.f32 %v5668_v30, %v8261_v11  ;;  %5879 = vmatpush3.bf16.msra.mxu1 %v8769_v42  ;;  %v2936_v11 = vld [vmem:[%s8746_s4 + $0x178] sm:$0xff] }
 0x480   : > { %v5670_v35 = vpop.f32.mrf.mxu1  ;;  %v5190_v13 = vcombine.high %v2928_v63, %v2936_v11  ;;  %v5189_v0 = vcombine.low %v2928_v63, %v2936_v11 }
 0x481   : > { %v5671_v41 = vadd.f32 %v5670_v35, %v5669_v15  ;;  %v3000_v35 = vld [vmem:[%s8746_s4 + $0x378] sm:$0xff] }
 0x482   : > { %v5688_v58 = vpop.f32.mrf.mxu1  ;;  %4513 = vmatmul.mubr.bf16.vlgmr.msra.gmra.mxu1 %v5157_v19 }
 0x483   : > { %v8411_v34 = vadd.f32 %v5671_v41, %v8271_v39  ;;  %4520 = vmatprep.mubr.bf16.mxu1 %v5174_v4  ;;  %v2992_v4 = vld [vmem:[%s8746_s4 + $0x338] sm:$0xff] }
 0x484   : > { %v5689_v9 = vpop.f32.mrf.mxu1  ;;  %v5254_v63 = vcombine.high %v2992_v4, %v3000_v35 }
 0x485   : > { %v5690_v5 = vadd.f32 %v5689_v9, %v5688_v58  ;;  %v5237_v58 = vcombine.low %v2976_v56, %v2984_v62 }
 0x486   : > { %v5691_v29 = vpop.f32.mrf.mxu1 }
 0x487   : > { %v8420_v60 = vadd.f32 %v5690_v5, %v8284_v36 }
 0x488   : > { %v5692_v45 = vpop.f32.mrf.mxu1 }
 0x489   : > { %v5693_v39 = vadd.f32 %v5692_v45, %v5691_v29  ;;  %v3016_v45 = vld [vmem:[%s8746_s4 + $0x3f8] sm:$0xff] }
 0x48a   : > { %v5694_v59 = vpop.f32.mrf.mxu1  ;;  %4521 = vmatmul.mubr.bf16.gmra.mxu1 %v5173_v47 }
 0x48b   : > { %v8423_v27 = vadd.f32 %v5693_v39, %v8291_v25  ;;  %4528 = vmatprep.mubr.bf16.mxu1 %v5190_v13  ;;  %v3008_v13 = vld [vmem:[%s8746_s4 + $0x3b8] sm:$0xff] }
 0x48c   : > { %v5695_v38 = vpop.f32.mrf.mxu1  ;;  %v5270_v2 = vcombine.high %v3008_v13, %v3016_v45 }
 0x48d   : > { %v5696_v36 = vadd.f32 %v5695_v38, %v5694_v59  ;;  %v5253_v59 = vcombine.low %v2992_v4, %v3000_v35 }
 0x48e   : > { %v5697_v53 = vpop.f32.mrf.mxu1 }
 0x48f   : > { %v8432_v50 = vadd.f32 %v5696_v36, %v8304_v61 }
 0x490   : > { %v5698_v33 = vpop.f32.mrf.mxu1 }
 0x491   : > { %v5699_v25 = vadd.f32 %v5698_v33, %v5697_v53 }
 0x492   : > { %v5700_v6 = vpop.f32.mrf.mxu1  ;;  %4529 = vmatmul.mubr.bf16.gmra.mxu1 %v5189_v0 }
 0x493   : > { %v8435_v12 = vadd.f32 %v5699_v25, %v8311_v44  ;;  %4536 = vmatprep.mubr.bf16.mxu1 %v5206_v32  ;;  %v5269_v25 = vcombine.low %v3008_v13, %v3016_v45 }
 0x494   : > { %v5701_v7 = vpop.f32.mrf.mxu1 }
 0x495   : > { %v5702_v61 = vadd.f32 %v5701_v7, %v5700_v6 }
 0x496   : > { %v5703_v49 = vpop.f32.mrf.mxu1 }
 0x497   : > { %v8444_v24 = vadd.f32 %v5702_v61, %v8320_v48 }
 0x498   : > { %v5704_v22 = vpop.f32.mrf.mxu1 }
 0x499   : > { %v5705_v44 = vadd.f32 %v5704_v22, %v5703_v49 }
 0x49a   : > { %v5706_v21 = vpop.f32.mrf.mxu1  ;;  %4537 = vmatmul.mubr.bf16.gmra.mxu1 %v5205_v28 }
 0x49b   : > { %v8447_v20 = vadd.f32 %v5705_v44, %v8770_v52  ;;  %4544 = vmatprep.mubr.bf16.mxu1 %v5222_v43 }
 0x49c   : > { %v5707_v26 = vpop.f32.mrf.mxu1 }
 0x49d   : > { %v5708_v48 = vadd.f32 %v5707_v26, %v5706_v21 }
 0x49e   : > { %v5709_v17 = vpop.f32.mrf.mxu1 }
 0x49f   : > { %v8456_v55 = vadd.f32 %v5708_v48, %v8332_v46 }
 0x4a0   : > { %v5710_v57 = vpop.f32.mrf.mxu1 }
 0x4a1   : > { %v5711_v30 = vadd.f32 %v5710_v57, %v5709_v17 }
 0x4a2   : > { %v5712_v15 = vpop.f32.mrf.mxu1  ;;  %4545 = vmatmul.mubr.bf16.gmra.mxu1 %v5221_v31 }
 0x4a3   : > { %v8459_v19 = vadd.f32 %v5711_v30, %v8337_v1  ;;  %4552 = vmatprep.mubr.bf16.mxu1 %v5238_v3 }
 0x4a4   : > { %v5713_v42 = vpop.f32.mrf.mxu1 }
 0x4a5   : > { %v5714_v46 = vadd.f32 %v5713_v42, %v5712_v15 }
 0x4a6   : > { %v5715_v41 = vpop.f32.mrf.mxu1 }
 0x4a7   : > { %v8468_v9 = vadd.f32 %v5714_v46, %v8348_v54 }
 0x4a8   : > { %v5716_v11 = vpop.f32.mrf.mxu1 }
 0x4a9   : > { %v5717_v1 = vadd.f32 %v5716_v11, %v5715_v41 }
 0x4aa   : > { %v5718_v5 = vpop.f32.mrf.mxu1  ;;  %4553 = vmatmul.mubr.bf16.gmra.mxu1 %v5237_v58 }
 0x4ab   : > { %v8471_v29 = vadd.f32 %v5717_v1, %v8353_v40  ;;  %4560 = vmatprep.mubr.bf16.mxu1 %v5254_v63 }
 0x4ac   : > { %v5719_v47 = vpop.f32.mrf.mxu1 }
 0x4ad   : > { %v5720_v54 = vadd.f32 %v5719_v47, %v5718_v5 }
 0x4ae   : > { %v5721_v39 = vpop.f32.mrf.mxu1 }
 0x4af   : > { %v8480_v38 = vadd.f32 %v5720_v54, %v8366_v10 }
 0x4b0   : > { %v5722_v16 = vpop.f32.mrf.mxu1 }
 0x4b1   : > { %v5723_v40 = vadd.f32 %v5722_v16, %v5721_v39 }
 0x4b2   : > { %v5724_v36 = vpop.f32.mrf.mxu1  ;;  %4561 = vmatmul.mubr.bf16.gmra.mxu1 %v5253_v59 }
 0x4b3   : > { %v8483_v53 = vadd.f32 %v5723_v40, %v8371_v37  ;;  %4568 = vmatprep.mubr.bf16.mxu1 %v5270_v2 }
 0x4b4   : > { %v5725_v0 = vpop.f32.mrf.mxu1 }
 0x4b5   : > { %v5726_v32 = vadd.f32 %v5725_v0, %v5724_v36 }
 0x4b6   : > { %v5727_v33 = vpop.f32.mrf.mxu1 }
 0x4b7   : > { %v8486_v6 = vadd.f32 %v5726_v32, %v8385_v23 }
 0x4b8   : > { %v5728_v7 = vpop.f32.mrf.mxu1 }
 0x4b9   : > { %v5729_v51 = vadd.f32 %v5728_v7, %v5727_v33 }
 0x4ba   : > { %v5730_v10 = vpop.f32.mrf.mxu1  ;;  %4569 = vmatmul.mubr.bf16.gmra.mxu1 %v5269_v25 }
 0x4bb   : > { %v8489_v18 = vadd.f32 %v5729_v51, %v8393_v8 }
 0x4bc   : > { %v5731_v61 = vpop.f32.mrf.mxu1 }
 0x4bd   : > { %v5732_v49 = vadd.f32 %v5731_v61, %v5730_v10 }
 0x4be   : > { %v5733_v28 = vpop.f32.mrf.mxu1 }
 0x4bf   : > { %v8492_v37 = vadd.f32 %v5732_v49, %v8405_v14 }
 0x4c0   : > { %v5734_v43 = vpop.f32.mrf.mxu1 }
 0x4c1   : > { %v5735_v22 = vadd.f32 %v5734_v43, %v5733_v28 }
 0x4c2   : > { %v5752_v44 = vpop.f32.mrf.mxu1 }
 0x4c3   : > { %v8495_v21 = vadd.f32 %v5735_v22, %v8411_v34 }
 0x4c4   : > { %v5753_v23 = vpop.f32.mrf.mxu1 }
 0x4c5   : > { %v5754_v52 = vadd.f32 %v5753_v23, %v5752_v44 }
 0x4c6   : > { %v5755_v26 = vpop.f32.mrf.mxu1 }
 0x4c7   : > { %v8498_v56 = vadd.f32 %v5754_v52, %v8420_v60 }
 0x4c8   : > { %v5756_v8 = vpop.f32.mrf.mxu1 }
 0x4c9   : > { %v5757_v62 = vadd.f32 %v5756_v8, %v5755_v26 }
 0x4ca   : > { %v5758_v48 = vpop.f32.mrf.mxu1 }
 0x4cb   : > { %v8501_v17 = vadd.f32 %v5757_v62, %v8423_v27 }
 0x4cc   : > { %v5759_v14 = vpop.f32.mrf.mxu1 }
 0x4cd   : > { %v5760_v31 = vadd.f32 %v5759_v14, %v5758_v48 }
 0x4ce   : > { %v5761_v3 = vpop.f32.mrf.mxu1 }
 0x4cf   : > { %v8504_v57 = vadd.f32 %v5760_v31, %v8432_v50 }
 0x4d0   : > { %v5762_v34 = vpop.f32.mrf.mxu1 }
 0x4d1   : > { %v5763_v30 = vadd.f32 %v5762_v34, %v5761_v3 }
 0x4d2   : > { %v5764_v15 = vpop.f32.mrf.mxu1 }
 0x4d3   : > { %v8507_v42 = vadd.f32 %v5763_v30, %v8435_v12 }
 0x4d4   : > { %v5765_v60 = vpop.f32.mrf.mxu1 }
 0x4d5   : > { %v5766_v4 = vadd.f32 %v5765_v60, %v5764_v15 }
 0x4d6   : > { %v5767_v35 = vpop.f32.mrf.mxu1 }
 0x4d7   : > { %v8510_v46 = vadd.f32 %v5766_v4, %v8444_v24 }
 0x4d8   : > { %v5768_v27 = vpop.f32.mrf.mxu1 }
 0x4d9   : > { %v5769_v41 = vadd.f32 %v5768_v27, %v5767_v35 }
 0x4da   : > { %v5770_v58 = vpop.f32.mrf.mxu1 }
 0x4db   : > { %v8513_v63 = vadd.f32 %v5769_v41, %v8447_v20 }
 0x4dc   : > { %v5771_v50 = vpop.f32.mrf.mxu1 }
 0x4dd   : > { %v5772_v11 = vadd.f32 %v5771_v50, %v5770_v58 }
 0x4de   : > { %v5773_v1 = vpop.f32.mrf.mxu1 }
 0x4df   : > { %v8516_v5 = vadd.f32 %v5772_v11, %v8456_v55 }
 0x4e0   : > { %v5774_v12 = vpop.f32.mrf.mxu1 }
 0x4e1   : > { %v5775_v47 = vadd.f32 %v5774_v12, %v5773_v1 }
 0x4e2   : > { %v5776_v13 = vpop.f32.mrf.mxu1 }
 0x4e3   : > { %v8519_v45 = vadd.f32 %v5775_v47, %v8459_v19 }
 0x4e4   : > { %v5777_v24 = vpop.f32.mrf.mxu1 }
 0x4e5   : > { %v5778_v54 = vadd.f32 %v5777_v24, %v5776_v13 }
 0x4e6   : > { %v5779_v39 = vpop.f32.mrf.mxu1 }
 0x4e7   : > { %v8522_v59 = vadd.f32 %v5778_v54, %v8468_v9 }
 0x4e8   : > { %v5780_v20 = vpop.f32.mrf.mxu1 }
 0x4e9   : > { %v5781_v2 = vadd.f32 %v5780_v20, %v5779_v39 }
 0x4ea   : > { %v5782_v16 = vpop.f32.mrf.mxu1 }
 0x4eb   : > { %v8525_v40 = vadd.f32 %v5781_v2, %v8471_v29 }
 0x4ec   : > { %v5783_v55 = vpop.f32.mrf.mxu1 }
 0x4ed   : > { %v5784_v36 = vadd.f32 %v5783_v55, %v5782_v16 }
 0x4ee   : > { %v5785_v0 = vpop.f32.mrf.mxu1 }
 0x4ef   : > { %v8528_v32 = vadd.f32 %v5784_v36, %v8480_v38 }
 0x4f0   : > { %v5786_v19 = vpop.f32.mrf.mxu1 }
 0x4f1   : > { %v5787_v33 = vadd.f32 %v5786_v19, %v5785_v0 }
 0x4f2   : > { %v5788_v25 = vpop.f32.mrf.mxu1 }
 0x4f3   : > { %v8531_v7 = vadd.f32 %v5787_v33, %v8483_v53 }
 0x4f4   : > { %v5789_v9 = vpop.f32.mrf.mxu1 }
 0x4f5   : > { %v5790_v51 = vadd.f32 %v5789_v9, %v5788_v25 }
 0x4f6   : > { %v5791_v10 = vpop.f32.mrf.mxu1 }
 0x4f7   : > { %v8534_v61 = vadd.f32 %v5790_v51, %v8486_v6 }
 0x4f8   : > { %v5792_v29 = vpop.f32.mrf.mxu1 }
 0x4f9   : > { %v5793_v49 = vadd.f32 %v5792_v29, %v5791_v10 }
 0x4fa   : > { %v5794_v28 = vpop.f32.mrf.mxu1 }
 0x4fb   : > { %v8537_v43 = vadd.f32 %v5793_v49, %v8489_v18 }
 0x4fc   : > { %v5795_v38 = vpop.f32.mrf.mxu1 }
 0x4fd   : > { %v5796_v22 = vadd.f32 %v5795_v38, %v5794_v28 }
 0x4fe   : > { %v5797_v44 = vpop.f32.mrf.mxu1 }
 0x4ff   : > { %v8540_v23 = vadd.f32 %v5796_v22, %v8492_v37 }
 0x500   : > { %v5798_v53 = vpop.f32.mrf.mxu1 }
 0x501   : > { %v5799_v52 = vadd.f32 %v5798_v53, %v5797_v44 }
 0x502   : > { %v5816_v26 = vpop.f32.mrf.mxu1 }
 0x503   : > { %v8543_v8 = vadd.f32 %v5799_v52, %v8495_v21 }
 0x504   : > { %v5817_v6 = vpop.f32.mrf.mxu1 }
 0x505   : > { %v5818_v62 = vadd.f32 %v5817_v6, %v5816_v26 }
 0x506   : > { %v5819_v48 = vpop.f32.mrf.mxu1 }
 0x507   : > { %v8546_v14 = vadd.f32 %v5818_v62, %v8498_v56 }
 0x508   : > { %v5820_v18 = vpop.f32.mrf.mxu1 }
 0x509   : > { %v5821_v31 = vadd.f32 %v5820_v18, %v5819_v48 }
 0x50a   : > { %v5822_v3 = vpop.f32.mrf.mxu1 }
 0x50b   : > { %v8549_v34 = vadd.f32 %v5821_v31, %v8501_v17 }
 0x50c   : > { %v5823_v37 = vpop.f32.mrf.mxu1 }
 0x50d   : > { %v5824_v30 = vadd.f32 %v5823_v37, %v5822_v3 }
 0x50e   : > { %v5825_v15 = vpop.f32.mrf.mxu1 }
 0x50f   : > { %v8552_v60 = vadd.f32 %v5824_v30, %v8504_v57 }
 0x510   : > { %v5826_v21 = vpop.f32.mrf.mxu1 }
 0x511   : > { %v5827_v4 = vadd.f32 %v5826_v21, %v5825_v15 }
 0x512   : > { %v5828_v35 = vpop.f32.mrf.mxu1 }
 0x513   : > { %v8555_v27 = vadd.f32 %v5827_v4, %v8507_v42 }
 0x514   : > { %v5829_v56 = vpop.f32.mrf.mxu1 }
 0x515   : > { %v5830_v41 = vadd.f32 %v5829_v56, %v5828_v35 }
 0x516   : > { %v5831_v58 = vpop.f32.mrf.mxu1 }
 0x517   : > { %v8558_v50 = vadd.f32 %v5830_v41, %v8510_v46 }
 0x518   : > { %v5832_v17 = vpop.f32.mrf.mxu1 }
 0x519   : > { %v5833_v11 = vadd.f32 %v5832_v17, %v5831_v58 }
 0x51a   : > { %v5834_v1 = vpop.f32.mrf.mxu1 }
 0x51b   : > { %v8561_v12 = vadd.f32 %v5833_v11, %v8513_v63  ;;  %v6436_v63 = vld [vmem:[%s8748_s6] sm:$0xff]  }
 0x51c   : > { %v5835_v57 = vpop.f32.mrf.mxu1  ;;  %6228 = vmatprep.mubr.bf16.mxu0 %v6436_v63 }
 0x51d   : > { %v5836_v47 = vadd.f32 %v5835_v57, %v5834_v1 }
 0x51e   : > { %v5837_v13 = vpop.f32.mrf.mxu1 }
 0x51f   : > { %v8564_v24 = vadd.f32 %v5836_v47, %v8516_v5 }
 0x520   : > { %v5838_v42 = vpop.f32.mrf.mxu1 }
 0x521   : > { %v5839_v54 = vadd.f32 %v5838_v42, %v5837_v13 }
 0x522   : > { %v5840_v39 = vpop.f32.mrf.mxu1 }
 0x523   : > { %v8567_v20 = vadd.f32 %v5839_v54, %v8519_v45 }
 0x524   : > { %v5841_v46 = vpop.f32.mrf.mxu1 }
 0x525   : > { %v5842_v2 = vadd.f32 %v5841_v46, %v5840_v39 }
 0x526   : > { %v5843_v16 = vpop.f32.mrf.mxu1 }
 0x527   : > { %v8573_v55 = vadd.f32 %v5842_v2, %v8522_v59 }
 0x528   : > { %v5844_v36 = vpop.f32.mrf.mxu1 }
 0x529   : > { %v5845_v5 = vadd.f32 %v5844_v36, %v5843_v16 }
 0x52a   : > { %v5846_v0 = vpop.f32.mrf.mxu1 }
 0x52b   : > { %v8576_v19 = vadd.f32 %v5845_v5, %v8525_v40 }
 0x52c   : > { %v5847_v33 = vpop.f32.mrf.mxu1 }
 0x52d   : > { %v5848_v45 = vadd.f32 %v5847_v33, %v5846_v0 }
 0x52e   : > { %v5849_v25 = vpop.f32.mrf.mxu1 }
 0x52f   : > { %v8579_v9 = vadd.f32 %v5848_v45, %v8528_v32 }
 0x530   : > { %v5850_v51 = vpop.f32.mrf.mxu1 }
 0x531   : > { %v5851_v10 = vadd.f32 %v5850_v51, %v5849_v25 }
 0x532   : > { %v5852_v29 = vpop.f32.mrf.mxu1 }
 0x533   : > { %v8582_v49 = vadd.f32 %v5851_v10, %v8531_v7 }
 0x534   : > { %v5853_v59 = vpop.f32.mrf.mxu1 }
 0x535   : > { %v5854_v28 = vadd.f32 %v5853_v59, %v5852_v29 }
 0x536   : > { %v5855_v38 = vpop.f32.mrf.mxu1 }
 0x537   : > { %v8585_v22 = vadd.f32 %v5854_v28, %v8534_v61 }
 0x538   : > { %v5856_v40 = vpop.f32.mrf.mxu1 }
 0x539   : > { %v5857_v44 = vadd.f32 %v5856_v40, %v5855_v38 }
 0x53a   : > { %v5858_v53 = vpop.f32.mrf.mxu1 }
 0x53b   : > { %v8588_v52 = vadd.f32 %v5857_v44, %v8537_v43 }
 0x53c   : > { %v5859_v32 = vpop.f32.mrf.mxu1 }
 0x53d   : > { %v5860_v26 = vadd.f32 %v5859_v32, %v5858_v53 }
 0x53e   : > { %v5861_v6 = vpop.f32.mrf.mxu1 }
 0x53f   : > { %v8591_v62 = vadd.f32 %v5860_v26, %v8540_v23 }
 0x540   : > { %v5862_v7 = vpop.f32.mrf.mxu1 }
 0x541   : > { %v5863_v48 = vadd.f32 %v5862_v7, %v5861_v6 }
 0x542   : > { %v5880_v18 = vpop.f32.mrf.mxu1 }
 0x543   : > { %v8594_v31 = vadd.f32 %v5863_v48, %v8543_v8 }
 0x544   : > { %v5881_v61 = vpop.f32.mrf.mxu1 }
 0x545   : > { %v5882_v3 = vadd.f32 %v5881_v61, %v5880_v18 }
 0x546   : > { %v5883_v37 = vpop.f32.mrf.mxu1 }
 0x547   : > { %v4515_v30 = vadd.f32 %v5882_v3, %v8546_v14 }
 0x548   : > { %v5884_v15 = vpop.f32.mrf.mxu1 }
 0x549   : > { %v5885_v43 = vadd.f32 %v5884_v15, %v5883_v37  ;;  %v4577_v56 = vmax.f32 %v4515_v30, 0.0 }
 0x54a   : > { %v5886_v21 = vpop.f32.mrf.mxu1 }
 0x54b   : > { %v4518_v4 = vadd.f32 %v5885_v43, %v8549_v34 }
 0x54c   : > { %v5887_v35 = vpop.f32.mrf.mxu1 }
 0x54d   : > { %v4578_v23 = vmax.f32 %v4518_v4, 0.0  ;;  %v5888_v41 = vadd.f32 %v5887_v35, %v5886_v21 }
 0x54e   : > { %v5889_v58 = vpop.f32.mrf.mxu1 }
 0x54f   : > { %v4523_v17 = vadd.f32 %v5888_v41, %v8552_v60  ;;  %v8599_v11 = vpack.c.bf16 %v4578_v23, %v4577_v56 }
 0x550   : > { %v5890_v8 = vpop.f32.mrf.mxu1 }
 0x551   : > { %v5891_v1 = vadd.f32 %v5890_v8, %v5889_v58  ;;  %v4579_v13 = vmax.f32 %v4523_v17, 0.0 }
 0x552   : > { %v5892_v57 = vpop.f32.mrf.mxu1 }
 0x553   : > { %v4526_v47 = vadd.f32 %v5891_v1, %v8555_v27 }
 0x554   : > { %v5893_v14 = vpop.f32.mrf.mxu1 }
 0x555   : > { %v4580_v42 = vmax.f32 %v4526_v47, 0.0  ;;  %v5894_v54 = vadd.f32 %v5893_v14, %v5892_v57 }
 0x556   : > { %v5895_v39 = vpop.f32.mrf.mxu1 }
 0x557   : > { %v4531_v34 = vadd.f32 %v5894_v54, %v8558_v50  ;;  %v8603_v46 = vpack.c.bf16 %v4580_v42, %v4579_v13 }
 0x558   : > { %v5896_v2 = vpop.f32.mrf.mxu1 }
 0x559   : > { %v5897_v16 = vadd.f32 %v5896_v2, %v5895_v39  ;;  %v4581_v5 = vmax.f32 %v4531_v34, 0.0 }
 0x55a   : > { %v5898_v63 = vpop.f32.mrf.mxu1 }
 0x55b   : > { %v4534_v60 = vadd.f32 %v5897_v16, %v8561_v12 }
 0x55c   : > { %v5899_v36 = vpop.f32.mrf.mxu1 }
 0x55d   : > { %v4582_v0 = vmax.f32 %v4534_v60, 0.0  ;;  %v5900_v33 = vadd.f32 %v5899_v36, %v5898_v63  ;;  %v6443_v60 = vld [vmem:[%s8748_s6 + $0x38] sm:$0xff]   ;;  %v4619_v36 = vld [vmem:[%s8749_s7 + $0x10] sm:$0xff] }
 0x55e   : > { %v5901_v45 = vpop.f32.mrf.mxu1 }
 0x55f   : > { %v4611_v27 = vpack.c.bf16 %v4582_v0, %v4581_v5  ;;  %v4539_v51 = vadd.f32 %v5900_v33, %v8564_v24  ;;  %v4617_v0 = vld [vmem:[%s8749_s7] sm:$0xff] }
 0x560   : > { %v5902_v25 = vpop.f32.mrf.mxu1 }
 0x561   : > { %v5903_v10 = vadd.f32 %v5902_v25, %v5901_v45  ;;  %v4583_v28 = vmax.f32 %v4539_v51, 0.0 }
 0x562   : > { %v5904_v29 = vpop.f32.mrf.mxu1 }
 0x563   : > { %v4542_v50 = vadd.f32 %v5903_v10, %v8567_v20  ;;  %v4618_v10 = vld [vmem:[%s8749_s7 + $0x8] sm:$0xff] }
 0x564   : > { %v5905_v59 = vpop.f32.mrf.mxu1 }
 0x565   : > { %v4584_v38 = vmax.f32 %v4542_v50, 0.0  ;;  %v5906_v40 = vadd.f32 %v5905_v59, %v5904_v29  ;;  %v4623_v59 = vld [vmem:[%s8749_s7 + $0x30] sm:$0xff] }
 0x566   : > { %v5907_v44 = vpop.f32.mrf.mxu1 }
 0x567   : > { %v4612_v53 = vpack.c.bf16 %v4584_v38, %v4583_v28  ;;  %v4547_v32 = vadd.f32 %v5906_v40, %v8573_v55  ;;  %v4621_v40 = vld [vmem:[%s8749_s7 + $0x20] sm:$0xff] }
 0x568   : > { %v5908_v12 = vpop.f32.mrf.mxu1 }
 0x569   : > { %v5909_v26 = vadd.f32 %v5908_v12, %v5907_v44  ;;  %v4585_v18 = vmax.f32 %v4547_v32, 0.0  ;;  %v4624_v12 = vld [vmem:[%s8749_s7 + $0x38] sm:$0xff] }
 0x56a   : > { %v5910_v6 = vpop.f32.mrf.mxu1 }
 0x56b   : > { %v4550_v7 = vadd.f32 %v5909_v26, %v8576_v19 }
 0x56c   : > { %v5911_v48 = vpop.f32.mrf.mxu1 }
 0x56d   : > { %v4586_v24 = vmax.f32 %v4550_v7, 0.0  ;;  %v5912_v61 = vadd.f32 %v5911_v48, %v5910_v6  ;;  %v4622_v6 = vld [vmem:[%s8749_s7 + $0x28] sm:$0xff] }
 0x56e   : > { %v5913_v3 = vpop.f32.mrf.mxu1 }
 0x56f   : > { %v4613_v37 = vpack.c.bf16 %v4586_v24, %v4585_v18  ;;  %v4555_v30 = vadd.f32 %v5912_v61, %v8579_v9  ;;  %v4627_v18 = vld [vmem:[%s8749_s7 + $0x50] sm:$0xff] }
 0x570   : > { %v5914_v20 = vpop.f32.mrf.mxu1 }
 0x571   : > { %v5915_v15 = vadd.f32 %v5914_v20, %v5913_v3  ;;  %v4587_v35 = vmax.f32 %v4555_v30, 0.0  ;;  %v4625_v3 = vld [vmem:[%s8749_s7 + $0x40] sm:$0xff]  ;;  %v4628_v30 = vld [vmem:[%s8749_s7 + $0x58] sm:$0xff] }
 0x572   : > { %v5916_v43 = vpop.f32.mrf.mxu1 }
 0x573   : > { %v4558_v21 = vadd.f32 %v5915_v15, %v8582_v49 }
 0x574   : > { %v5917_v4 = vpop.f32.mrf.mxu1 }
 0x575   : > { %v4588_v55 = vmax.f32 %v4558_v21, 0.0  ;;  %v5918_v56 = vadd.f32 %v5917_v4, %v5916_v43  ;;  %v4626_v21 = vld [vmem:[%s8749_s7 + $0x48] sm:$0xff] }
 0x576   : > { %v5919_v23 = vpop.f32.mrf.mxu1 }
 0x577   : > { %v4614_v41 = vpack.c.bf16 %v4588_v55, %v4587_v35  ;;  %v4563_v58 = vadd.f32 %v5918_v56, %v8585_v22  ;;  %v6437_v22 = vld [vmem:[%s8748_s6 + $0x8] sm:$0xff]   ;;  %v4631_v55 = vld [vmem:[%s8749_s7 + $0x70] sm:$0xff] }
 0x578   : > { %v5920_v19 = vpop.f32.mrf.mxu1 }
 0x579   : > { %v5921_v17 = vadd.f32 %v5920_v19, %v5919_v23  ;;  %v4589_v47 = vmax.f32 %v4563_v58, 0.0 }
 0x57a   : > { %v5922_v8 = vpop.f32.mrf.mxu1 }
 0x57b   : > { %v4566_v1 = vadd.f32 %v5921_v17, %v8588_v52  ;;  %v6438_v52 = vld [vmem:[%s8748_s6 + $0x10] sm:$0xff]   ;;  %v4632_v17 = vld [vmem:[%s8749_s7 + $0x78] sm:$0xff] }
 0x57c   : > { %v5923_v57 = vpop.f32.mrf.mxu1 }
 0x57d   : > { %v4590_v9 = vmax.f32 %v4566_v1, 0.0  ;;  %v5924_v14 = vadd.f32 %v5923_v57, %v5922_v8  ;;  %v4630_v57 = vld [vmem:[%s8749_s7 + $0x68] sm:$0xff] }
 0x57e   : > { %v5925_v13 = vpop.f32.mrf.mxu1 }
 0x57f   : > { %v4615_v42 = vpack.c.bf16 %v4590_v9, %v4589_v47  ;;  %v4571_v54 = vadd.f32 %v5924_v14, %v8591_v62  ;;  %v6439_v62 = vld [vmem:[%s8748_s6 + $0x18] sm:$0xff]  }
 0x580   : > { %v5926_v49 = vpop.f32.mrf.mxu1 }
 0x581   : > { %v5927_v39 = vadd.f32 %v5926_v49, %v5925_v13  ;;  %v4591_v2 = vmax.f32 %v4571_v54, 0.0 }
 0x583   : > { %v4574_v34 = vadd.f32 %v5927_v39, %v8594_v31  ;;  %v6440_v31 = vld [vmem:[%s8748_s6 + $0x20] sm:$0xff]  }
 0x585   : > { %v4592_v16 = vmax.f32 %v4574_v34, 0.0 }
 0x587   : > { %v4616_v63 = vpack.c.bf16 %v4592_v16, %v4591_v2 }
 0x589   : > { %6212 = vmatprep.subr.bf16.mxu0 %v4616_v63 }
 0x58a   : > { %6213 = vmatpush3.bf16.msra.mxu0 %v4616_v63 }
 0x58b   : > { %6214 = vmatprep.subr.bf16.mxu0 %v4615_v42 }
 0x58e   : > { %6215 = vmatpush3.bf16.msra.mxu0 %v4615_v42 }
 0x58f   : > { %6216 = vmatprep.subr.bf16.mxu0 %v4614_v41 }
 0x592   : > { %6217 = vmatpush3.bf16.msra.mxu0 %v4614_v41  ;;  %v4629_v41 = vld [vmem:[%s8749_s7 + $0x60] sm:$0xff] }
 0x593   : > { %6218 = vmatprep.subr.bf16.mxu0 %v4613_v37 }
 0x596   : > { %6219 = vmatpush3.bf16.msra.mxu0 %v4613_v37 }
 0x597   : > { %6220 = vmatprep.subr.bf16.mxu0 %v4612_v53 }
 0x59a   : > { %6221 = vmatpush3.bf16.msra.mxu0 %v4612_v53 }
 0x59b   : > { %6222 = vmatprep.subr.bf16.mxu0 %v4611_v27 }
 0x59e   : > { %6223 = vmatpush3.bf16.msra.mxu0 %v4611_v27  ;;  %v4620_v27 = vld [vmem:[%s8749_s7 + $0x18] sm:$0xff] }
 0x59f   : > { %6224 = vmatprep.subr.bf16.mxu0 %v8603_v46 }
 0x5a2   : > { %6225 = vmatpush3.bf16.msra.mxu0 %v8603_v46  ;;  %v6442_v46 = vld [vmem:[%s8748_s6 + $0x30] sm:$0xff]  }
 0x5a3   : > { %6226 = vmatprep.subr.bf16.mxu0 %v8599_v11 }
 0x5a6   : > { %6227 = vmatpush3.bf16.msra.mxu0 %v8599_v11  ;;  %v6441_v11 = vld [vmem:[%s8748_s6 + $0x28] sm:$0xff]  }
 0x5a9   : > { %6229 = vmatmul.mubr.bf16.vlgmr.msra.gmra.mxu0 %v6437_v22 }
 0x5aa   : > { %6232 = vmatprep.mubr.bf16.mxu0 %v6438_v52 }
 0x5b1   : > { %6233 = vmatmul.mubr.bf16.gmra.mxu0 %v6439_v62 }
 0x5b2   : > { %6236 = vmatprep.mubr.bf16.mxu0 %v6440_v31 }
 0x5b9   : > { %6237 = vmatmul.mubr.bf16.gmra.mxu0 %v6441_v11 }
 0x5ba   : > { %6240 = vmatprep.mubr.bf16.mxu0 %v6442_v46 }
 0x5c1   : > { %6241 = vmatmul.mubr.bf16.gmra.mxu0 %v6443_v60 }
 0x669   : > { %v6230_v5 = vpop.f32.mrf.mxu0 }
 0x66a   : > { %v4724_v33 = vadd.f32 %v6230_v5, %v4619_v36 }
 0x66b   : > { %v4715_v45 = vpop.f32.mrf.mxu0 }
 0x66c   : > { %4780 = vst.msk [vmem:[%s6615_s21 + $0x10] sm:$0xff] %vm517_vm2, %v4724_v33  ;;  %v4716_v25 = vadd.f32 %v4715_v45, %v4617_v0 }
 0x66d   : > { %v6231_v51 = vpop.f32.mrf.mxu0 }
 0x66e   : > { %4778 = vst.msk [vmem:[%s6615_s21] sm:$0xff] %vm517_vm2, %v4716_v25  ;;  %v4727_v29 = vadd.f32 %v6231_v51, %v4620_v27 }
 0x66f   : > { %v4718_v50 = vpop.f32.mrf.mxu0 }
 0x670   : > { %4781 = vst.msk [vmem:[%s6615_s21 + $0x18] sm:$0xff] %vm517_vm2, %v4727_v29  ;;  %v4719_v28 = vadd.f32 %v4718_v50, %v4618_v10 }
 0x671   : > { %v6234_v38 = vpop.f32.mrf.mxu0 }
 0x672   : > { %4779 = vst.msk [vmem:[%s6615_s21 + $0x8] sm:$0xff] %vm517_vm2, %v4719_v28  ;;  %v4740_v44 = vadd.f32 %v6234_v38, %v4623_v59 }
 0x673   : > { %v4731_v53 = vpop.f32.mrf.mxu0 }
 0x674   : > { %4784 = vst.msk [vmem:[%s6615_s21 + $0x30] sm:$0xff] %vm517_vm2, %v4740_v44  ;;  %v4732_v32 = vadd.f32 %v4731_v53, %v4621_v40 }
 0x675   : > { %v6235_v26 = vpop.f32.mrf.mxu0 }
 0x676   : > { %4782 = vst.msk [vmem:[%s6615_s21 + $0x20] sm:$0xff] %vm517_vm2, %v4732_v32  ;;  %v4743_v7 = vadd.f32 %v6235_v26, %v4624_v12 }
 0x677   : > { %v4734_v48 = vpop.f32.mrf.mxu0 }
 0x678   : > { %4785 = vst.msk [vmem:[%s6615_s21 + $0x38] sm:$0xff] %vm517_vm2, %v4743_v7  ;;  %v4735_v24 = vadd.f32 %v4734_v48, %v4622_v6 }
 0x679   : > { %v6238_v61 = vpop.f32.mrf.mxu0 }
 0x67a   : > { %4783 = vst.msk [vmem:[%s6615_s21 + $0x28] sm:$0xff] %vm517_vm2, %v4735_v24  ;;  %v4756_v37 = vadd.f32 %v6238_v61, %v4627_v18 }
 0x67b   : > { %v4747_v20 = vpop.f32.mrf.mxu0 }
 0x67c   : > { %4788 = vst.msk [vmem:[%s6615_s21 + $0x50] sm:$0xff] %vm517_vm2, %v4756_v37  ;;  %v4748_v15 = vadd.f32 %v4747_v20, %v4625_v3 }
 0x67d   : > { %v6239_v43 = vpop.f32.mrf.mxu0 }
 0x67e   : > { %4786 = vst.msk [vmem:[%s6615_s21 + $0x40] sm:$0xff] %vm517_vm2, %v4748_v15  ;;  %v4759_v4 = vadd.f32 %v6239_v43, %v4628_v30 }
 0x67f   : > { %v4750_v35 = vpop.f32.mrf.mxu0 }
 0x680   : > { %4789 = vst.msk [vmem:[%s6615_s21 + $0x58] sm:$0xff] %vm517_vm2, %v4759_v4  ;;  %v4751_v56 = vadd.f32 %v4750_v35, %v4626_v21 }
 0x681   : > { %v6242_v23 = vpop.f32.mrf.mxu0 }
 0x682   : > { %4787 = vst.msk [vmem:[%s6615_s21 + $0x48] sm:$0xff] %vm517_vm2, %v4751_v56  ;;  %v4772_v19 = vadd.f32 %v6242_v23, %v4631_v55 }
 0x683   : > { %v4763_v58 = vpop.f32.mrf.mxu0 }
 0x684   : > { %4792 = vst.msk [vmem:[%s6615_s21 + $0x70] sm:$0xff] %vm517_vm2, %v4772_v19  ;;  %v4764_v8 = vadd.f32 %v4763_v58, %v4629_v41 }
 0x685   : > { %v6243_v1 = vpop.f32.mrf.mxu0 }
 0x686   : > { %4790 = vst.msk [vmem:[%s6615_s21 + $0x60] sm:$0xff] %vm517_vm2, %v4764_v8  ;;  %v4775_v47 = vadd.f32 %v6243_v1, %v4632_v17 }
 0x687   : > { %v4766_v9 = vpop.f32.mrf.mxu0 }
 0x688   : > { %4793 = vst.msk [vmem:[%s6615_s21 + $0x78] sm:$0xff] %vm517_vm2, %v4775_v47  ;;  %v4767_v14 = vadd.f32 %v4766_v9, %v4630_v57 }
 0x68a   : > { %4791 = vst.msk [vmem:[%s6615_s21 + $0x68] sm:$0xff] %vm517_vm2, %v4767_v14 }
 0x68b PF: > { %s18_s11 = sadd.s32 1, %s6498_s11   ;;  %s8771_s27 = smov %s6478_s28 }
 0x68c   : > { %p15_p13 = scmp.ge.s32.totalorder %s18_s11, 6   ;;  %s8772_s28 = smov %s6598_s18 }
 0x68d   : > { %s8773_s29 = smov %s6490_s9  ;;  %s8774_s30 = smov %s6494_s10 }
 0x68e   : > { %s8775_s9 = smov %s8778_s12  ;;  %s8776_s10 = smov %s8782_s13 }
 0x68f   :  { %17 = sbr.rel (!%p15_p13) target bundleno = 4 (0x4), region = 136 }

</bundles_post_ra>
